<compile_context>
chip_gen: v7x
topology: tpu7x:2x2x1
jax: 0.10.0
libtpu: 0.0.40
codegen_flags: <defaults>
</compile_context>

<pallas_src>
import functools

import jax
import jax.numpy as jnp
from jax.experimental import pallas as pl
from jax.experimental.pallas import tpu as pltpu

_EPS = 1e-5  # torch.nn.LayerNorm default


# ------------------------------ tiling helpers ------------------------------

def _row_tile(M, target=512):
    """Largest multiple-of-8 row tile <= target that divides M (fallback M)."""
    if M <= target:
        return M
    t = (target // 8) * 8
    while t >= 8:
        if M % t == 0:
            return t
        t -= 8
    return M


def _batch_tile(B, N, C, budget_bytes=4 << 20):
    """Batch tile so one (bt, N, C) f32 block stays within a few MiB."""
    per = max(1, budget_bytes // max(1, N * C * 4))
    bt = min(B, per)
    while bt > 1 and B % bt:
        bt -= 1
    return bt


def _ln_f32(x, gamma, beta):
    mu = jnp.mean(x, axis=-1, keepdims=True)
    var = jnp.mean(jnp.square(x - mu), axis=-1, keepdims=True)
    y = (x - mu) * jax.lax.rsqrt(var + _EPS)
    return y * gamma + beta


# ------------------------------ Pallas kernels -------------------------------

def _pyramid_stage_kernel(x_ref, w1_ref, b1_ref, w2_ref, b2_ref, *rest,
                          has_residual, want_fm):
    """h = relu(x@w1+b1); [fm=h]; y = h@w2+b2 [+ residual]."""
    idx = 0
    res_ref = None
    if has_residual:
        res_ref = rest[idx]; idx += 1
    fm_ref = None
    if want_fm:
        fm_ref = rest[idx]; idx += 1
    y_ref = rest[idx]

    x = x_ref[...].astype(jnp.bfloat16)
    h = jnp.dot(x, w1_ref[...], preferred_element_type=jnp.float32)
    h = jnp.maximum(h + b1_ref[...].astype(jnp.float32), 0.0)
    if want_fm:
        fm_ref[...] = h.astype(fm_ref.dtype)
    y = jnp.dot(h.astype(jnp.bfloat16), w2_ref[...],
                preferred_element_type=jnp.float32)
    y = y + b2_ref[...].astype(jnp.float32)
    if has_residual:
        y = y + res_ref[...].astype(jnp.float32)
    y_ref[...] = y.astype(y_ref.dtype)


def pyramid_stage(x2d, w1, b1, w2, b2, residual=None, want_fm=True, tm_target=512):
    """Fused (stand-in conv + 1x1 proj [+ residual]) over rows of x2d:(M,K)."""
    M, K = x2d.shape
    C1 = w1.shape[1]
    C2 = w2.shape[1]
    tm = _row_tile(M, tm_target)

    in_specs = [pl.BlockSpec((tm, K), lambda i: (i, 0)),
                pl.BlockSpec((K, C1), lambda i: (0, 0)),
                pl.BlockSpec((1, C1), lambda i: (0, 0)),
                pl.BlockSpec((C1, C2), lambda i: (0, 0)),
                pl.BlockSpec((1, C2), lambda i: (0, 0))]
    args = [x2d, w1, b1.reshape(1, C1), w2, b2.reshape(1, C2)]
    if residual is not None:
        in_specs.append(pl.BlockSpec((tm, C2), lambda i: (i, 0)))
        args.append(residual)

    if want_fm:
        out_shape = (jax.ShapeDtypeStruct((M, C1), x2d.dtype),
                     jax.ShapeDtypeStruct((M, C2), x2d.dtype))
        out_specs = (pl.BlockSpec((tm, C1), lambda i: (i, 0)),
                     pl.BlockSpec((tm, C2), lambda i: (i, 0)))
    else:
        out_shape = jax.ShapeDtypeStruct((M, C2), x2d.dtype)
        out_specs = pl.BlockSpec((tm, C2), lambda i: (i, 0))

    res = pl.pallas_call(
        functools.partial(_pyramid_stage_kernel,
                          has_residual=residual is not None, want_fm=want_fm),
        out_shape=out_shape,
        grid=(M // tm,),
        in_specs=in_specs,
        out_specs=out_specs,
        compiler_params=pltpu.CompilerParams(dimension_semantics=("parallel",)),
    )(*args)
    return res  # tuple (fm, y) if want_fm else y


def _add_ln_mean_kernel(a_ref, b_ref, g_ref, be_ref, skip_ref, cls_ref):
    s = a_ref[...] + b_ref[...]
    skip_ref[...] = s
    y = _ln_f32(s.astype(jnp.float32),
                g_ref[...].astype(jnp.float32), be_ref[...].astype(jnp.float32))
    cls_ref[...] = jnp.mean(y, axis=1, keepdims=True).astype(cls_ref.dtype)


def add_ln_mean(a, b, gamma, beta):
    """skipped = a + b ; cls = mean_tokens(LayerNorm(skipped)). Shapes (B,N,C)."""
    B, N, C = a.shape
    bt = _batch_tile(B, N, C)
    skipped, cls = pl.pallas_call(
        _add_ln_mean_kernel,
        out_shape=(jax.ShapeDtypeStruct((B, N, C), a.dtype),
                   jax.ShapeDtypeStruct((B, 1, C), a.dtype)),
        grid=(B // bt,),
        in_specs=[pl.BlockSpec((bt, N, C), lambda i: (i, 0, 0)),
                  pl.BlockSpec((bt, N, C), lambda i: (i, 0, 0)),
                  pl.BlockSpec((1, 1, C), lambda i: (0, 0, 0)),
                  pl.BlockSpec((1, 1, C), lambda i: (0, 0, 0))],
        out_specs=(pl.BlockSpec((bt, N, C), lambda i: (i, 0, 0)),
                   pl.BlockSpec((bt, 1, C), lambda i: (i, 0, 0))),
        compiler_params=pltpu.CompilerParams(dimension_semantics=("parallel",)),
    )(a, b, gamma.reshape(1, 1, C), beta.reshape(1, 1, C))
    return skipped, cls


def _ln_mean_kernel(x_ref, g_ref, b_ref, cls_ref):
    y = _ln_f32(x_ref[...].astype(jnp.float32),
                g_ref[...].astype(jnp.float32), b_ref[...].astype(jnp.float32))
    cls_ref[...] = jnp.mean(y, axis=1, keepdims=True).astype(cls_ref.dtype)


def ln_mean(x, gamma, beta):
    """cls = mean_tokens(LayerNorm(x)) for (B,N,C)."""
    B, N, C = x.shape
    bt = _batch_tile(B, N, C)
    return pl.pallas_call(
        _ln_mean_kernel,
        out_shape=jax.ShapeDtypeStruct((B, 1, C), x.dtype),
        grid=(B // bt,),
        in_specs=[pl.BlockSpec((bt, N, C), lambda i: (i, 0, 0)),
                  pl.BlockSpec((1, 1, C), lambda i: (0, 0, 0)),
                  pl.BlockSpec((1, 1, C), lambda i: (0, 0, 0))],
        out_specs=pl.BlockSpec((bt, 1, C), lambda i: (i, 0, 0)),
        compiler_params=pltpu.CompilerParams(dimension_semantics=("parallel",)),
    )(x, gamma.reshape(1, 1, C), beta.reshape(1, 1, C))


def _pos_ln_kernel(x_ref, pos_ref, g_ref, b_ref, o_ref):
    x = x_ref[...].astype(jnp.float32) + pos_ref[...].astype(jnp.float32)
    y = _ln_f32(x, g_ref[...].astype(jnp.float32), b_ref[...].astype(jnp.float32))
    o_ref[...] = y.astype(o_ref.dtype)


def pos_embed_layernorm(x, pos, gamma, beta):
    """out = LayerNorm(x + pos_embed) for (B,T,C); pos broadcasts over batch."""
    B, T, C = x.shape
    bt = _batch_tile(B, T, C)
    return pl.pallas_call(
        _pos_ln_kernel,
        out_shape=jax.ShapeDtypeStruct((B, T, C), x.dtype),
        grid=(B // bt,),
        in_specs=[pl.BlockSpec((bt, T, C), lambda i: (i, 0, 0)),
                  pl.BlockSpec((1, T, C), lambda i: (0, 0, 0)),
                  pl.BlockSpec((1, 1, C), lambda i: (0, 0, 0)),
                  pl.BlockSpec((1, 1, C), lambda i: (0, 0, 0))],
        out_specs=pl.BlockSpec((bt, T, C), lambda i: (i, 0, 0)),
        compiler_params=pltpu.CompilerParams(dimension_semantics=("parallel",)),
    )(x, pos, gamma.reshape(1, 1, C), beta.reshape(1, 1, C))


def _pm_kernel(x_ref, g_ref, b_ref, w_ref, o_ref):
    y = _ln_f32(x_ref[...].astype(jnp.float32),
                g_ref[...].astype(jnp.float32), b_ref[...].astype(jnp.float32))
    o_ref[...] = jnp.dot(y.astype(jnp.bfloat16), w_ref[...],
                         preferred_element_type=jnp.float32).astype(o_ref.dtype)


# ------------------------------- JAX glue ------------------------------------

def space_to_depth(x_nhwc, r):
    B, H, W, C = x_nhwc.shape
    x = x_nhwc.reshape(B, H // r, r, W // r, r, C)
    x = jnp.transpose(x, (0, 1, 3, 2, 4, 5))
    return x.reshape(B, H // r, W // r, r * r * C)


def patch_merging(x_tokens, H, W, norm_g, norm_b, red_w):
    """Swin PatchMerging: 2x2 gather -> LayerNorm(4C) -> Linear(4C,2C,no bias).

    The 2x2 gather is one reshape/transpose reproducing the Swin concat order
    [x0(ee), x1(oe), x2(eo), x3(oo)] along channels; LN + reduction are fused
    in a single row-tiled Pallas kernel (no zeros bias materialized).
    """
    B, L, C = x_tokens.shape
    x = x_tokens.reshape(B, H // 2, 2, W // 2, 2, C)        # (B,Hh,r,Wh,s,C)
    x = jnp.transpose(x, (0, 1, 3, 4, 2, 5))                # (B,Hh,Wh,s,r,C)
    xm = x.reshape(B * (H // 2) * (W // 2), 4 * C)
    M, K = xm.shape
    N = red_w.shape[1]
    tm = _row_tile(M)
    out = pl.pallas_call(
        _pm_kernel,
        out_shape=jax.ShapeDtypeStruct((M, N), x_tokens.dtype),
        grid=(M // tm,),
        in_specs=[pl.BlockSpec((tm, K), lambda i: (i, 0)),
                  pl.BlockSpec((1, K), lambda i: (0, 0)),
                  pl.BlockSpec((1, K), lambda i: (0, 0)),
                  pl.BlockSpec((K, N), lambda i: (0, 0))],
        out_specs=pl.BlockSpec((tm, N), lambda i: (i, 0)),
        compiler_params=pltpu.CompilerParams(dimension_semantics=("parallel",)),
    )(xm, norm_g.reshape(1, K), norm_b.reshape(1, K), red_w)
    return out.reshape(B, (H // 2) * (W // 2), N)


# ----------------------------- forward passes --------------------------------

def pyramid_forward(p, x_nchw):
    x = jnp.transpose(x_nchw, (0, 2, 3, 1))  # NCHW -> NHWC
    B = x.shape[0]

    # --- stage 1: stem (stand-in) fused with p1_ch 1x1 projection -------------
    # TODO(synk): torchvision ResNet50 stem+layer1 (resnet_layers[0:5]) is an
    # external pretrained module; stand-in = stride-4 space-to-depth + matmul + ReLU
    # that reproduces only the (B, cnn_fm[0], S/4, S/4) shape contract.
    s1 = space_to_depth(x, 4)
    _, H1, W1, K1 = s1.shape
    fm1_rows, fm1_ch_rows = pyramid_stage(
        s1.reshape(-1, K1), p['stem_w'], p['stem_b'], p['p1_ch_w'], p['p1_ch_b'],
        residual=None, want_fm=True)
    C_cnn1 = p['stem_w'].shape[1]
    C1 = p['p1_ch_w'].shape[1]
    fm1 = fm1_rows.reshape(B, H1, W1, C_cnn1)
    fm1_reshaped = fm1_ch_rows.reshape(B, H1 * W1, C1)       # 'b c h w -> b (h w) c'

    # TODO(synk): Swin BasicLayer (swin_transformer.layers[0]) is not defined in
    # the reference source; identity pass-through.
    sw1 = fm1_reshaped
    # fused: residual add + LayerNorm + AdaptiveAvgPool1d(1)
    sw1_skipped, sw1_cls = add_ln_mean(fm1_reshaped, sw1, p['norm_1_g'], p['norm_1_b'])

    fm1_sw1 = patch_merging(sw1_skipped, H1, W1,
                            p['p1_pm_norm_g'], p['p1_pm_norm_b'], p['p1_pm_red_w'])
    # TODO(synk): Swin BasicLayer layers[1] not defined; identity pass-through.
    fm1_sw2 = fm1_sw1

    # --- stage 2: p2 (stand-in) fused with p2_ch + token residual add ---------
    # TODO(synk): ResNet layer5 (self.p2) stand-in: stride-2 space-to-depth + matmul + ReLU.
    s2 = space_to_depth(fm1, 2)
    _, H2, W2, K2 = s2.shape
    C2 = p['p2_ch_w'].shape[1]
    fm2_rows, fm2_skip_rows = pyramid_stage(
        s2.reshape(-1, K2), p['p2_w'], p['p2_b'], p['p2_ch_w'], p['p2_ch_b'],
        residual=fm1_sw2.reshape(-1, C2), want_fm=True)
    fm2 = fm2_rows.reshape(B, H2, W2, p['p2_w'].shape[1])
    fm2_sw2_skipped = fm2_skip_rows.reshape(B, H2 * W2, C2)

    fm2_sw2 = patch_merging(fm2_sw2_skipped, H2, W2,
                            p['p2_pm_norm_g'], p['p2_pm_norm_b'], p['p2_pm_red_w'])
    # TODO(synk): Swin BasicLayer layers[2] not defined; identity pass-through.
    fm2_sw3 = fm2_sw2

    # --- stage 3: p3 (stand-in) fused with p3_ch + token residual add ---------
    # TODO(synk): ResNet layer6 (self.p3) stand-in: stride-2 space-to-depth + matmul + ReLU.
    s3 = space_to_depth(fm2, 2)
    _, H3, W3, K3 = s3.shape
    C3 = p['p3_ch_w'].shape[1]
    fm3_skip_rows = pyramid_stage(
        s3.reshape(-1, K3), p['p3_w'], p['p3_b'], p['p3_ch_w'], p['p3_ch_b'],
        residual=fm2_sw3.reshape(-1, C3), want_fm=False)
    fm3_sw3_skipped = fm3_skip_rows.reshape(B, H3 * W3, C3)
    sw3_cls = ln_mean(fm3_sw3_skipped, p['norm_2_g'], p['norm_2_b'])

    out0 = jnp.concatenate([sw1_cls, sw1_skipped], axis=1)       # (B, 1+n_p1, embed0)
    out1 = jnp.concatenate([sw3_cls, fm3_sw3_skipped], axis=1)   # (B, 1+n_p2, embed1)
    return [out0, out1]


def all2cross_forward(p, x_nchw):
    xs = pyramid_forward(p, x_nchw)
    # TODO(synk): MultiScaleBlock (cross-attention fusion) class is not defined
    # in the reference source; identity pass-through for the block list.
    # fused: cross positional embedding add + output LayerNorm
    xs = [pos_embed_layernorm(xs[i], p['pos_embed'][i],
                              p['out_norm_g'][i], p['out_norm_b'][i])
          for i in range(2)]
    return xs


# ----------------------------- parameter init --------------------------------

def init_params(key, *, in_channels, cnn_fm, swin_fm, embed_dim, num_patches):
    keys = iter(jax.random.split(key, 32))

    def tn(shape, std=0.02, dtype=jnp.bfloat16):  # trunc_normal_(std=0.02); MXU weights in bf16
        return (std * jax.random.truncated_normal(next(keys), -2.0, 2.0, shape)
                ).astype(dtype)

    p = {}
    # stand-in CNN projections (shape-contract only) -- bf16 MXU weights, f32 bias
    p['stem_w'] = tn((16 * in_channels, cnn_fm[0])); p['stem_b'] = jnp.zeros((cnn_fm[0],), jnp.float32)
    p['p2_w'] = tn((4 * cnn_fm[0], cnn_fm[1]));      p['p2_b'] = jnp.zeros((cnn_fm[1],), jnp.float32)
    p['p3_w'] = tn((4 * cnn_fm[1], cnn_fm[2]));      p['p3_b'] = jnp.zeros((cnn_fm[2],), jnp.float32)
    # 1x1 channel projections p1_ch / p2_ch / p3_ch
    p['p1_ch_w'] = tn((cnn_fm[0], swin_fm[0]));      p['p1_ch_b'] = jnp.zeros((swin_fm[0],), jnp.float32)
    p['p2_ch_w'] = tn((cnn_fm[1], swin_fm[1]));      p['p2_ch_b'] = jnp.zeros((swin_fm[1],), jnp.float32)
    p['p3_ch_w'] = tn((cnn_fm[2], swin_fm[2]));      p['p3_ch_b'] = jnp.zeros((swin_fm[2],), jnp.float32)
    # LayerNorms in the pyramid (f32)
    p['norm_1_g'] = jnp.ones((swin_fm[0],), jnp.float32); p['norm_1_b'] = jnp.zeros((swin_fm[0],), jnp.float32)
    p['norm_2_g'] = jnp.ones((swin_fm[2],), jnp.float32); p['norm_2_b'] = jnp.zeros((swin_fm[2],), jnp.float32)
    # PatchMerging modules
    p['p1_pm_norm_g'] = jnp.ones((4 * swin_fm[0],), jnp.float32)
    p['p1_pm_norm_b'] = jnp.zeros((4 * swin_fm[0],), jnp.float32)
    p['p1_pm_red_w'] = tn((4 * swin_fm[0], 2 * swin_fm[0]))
    p['p2_pm_norm_g'] = jnp.ones((4 * swin_fm[1],), jnp.float32)
    p['p2_pm_norm_b'] = jnp.zeros((4 * swin_fm[1],), jnp.float32)
    p['p2_pm_red_w'] = tn((4 * swin_fm[1], 2 * swin_fm[1]))
    # All2Cross positional embeddings + output norms (f32)
    p['pos_embed'] = [tn((1, 1 + num_patches[i], embed_dim[i]), dtype=jnp.float32)
                      for i in range(2)]
    p['out_norm_g'] = [jnp.ones((embed_dim[i],), jnp.float32) for i in range(2)]
    p['out_norm_b'] = [jnp.zeros((embed_dim[i],), jnp.float32) for i in range(2)]
    return p


# ---------------------------------- main --------------------------------------

if __name__ == "__main__":
    # small synthetic config consistent with the module's shape algebra
    B, in_channels, in_size, patch_size = 2, 3, 32, 4
    cnn_fm = [64, 128, 256]      # scaled-down cnn_pyramid_fm
    swin_fm = [32, 64, 128]      # scaled-down swin_pyramid_fm
    embed_dim = (swin_fm[0], swin_fm[2])
    n_p1 = (in_size // patch_size) ** 2            # 64
    n_p2 = (in_size // patch_size // 4) ** 2       # 4

    params = init_params(jax.random.PRNGKey(0),
                         in_channels=in_channels, cnn_fm=cnn_fm, swin_fm=swin_fm,
                         embed_dim=embed_dim, num_patches=(n_p1, n_p2))

    x = jax.random.normal(jax.random.PRNGKey(0),
                          (B, in_channels, in_size, in_size), jnp.float32)

    fwd = jax.jit(all2cross_forward)
    xs = fwd(params, x)
    xs = [jax.block_until_ready(y) for y in xs]

    assert xs[0].shape == (B, 1 + n_p1, embed_dim[0]), xs[0].shape
    assert xs[1].shape == (B, 1 + n_p2, embed_dim[1]), xs[1].shape
    assert all(bool(jnp.isfinite(y).all()) for y in xs)
    print("KERNEL_OK")
</pallas_src>

<mosaic_0001>
module attributes {stable_mosaic.version = 11 : i64} {
  func.func @_pyramid_stage_kernel(%arg0: i32, %arg1: memref<128x48xf32, #tpu.memory_space<vmem>>, %arg2: memref<48x64xbf16, #tpu.memory_space<vmem>>, %arg3: memref<1x64xf32, #tpu.memory_space<vmem>>, %arg4: memref<64x32xbf16, #tpu.memory_space<vmem>>, %arg5: memref<1x32xf32, #tpu.memory_space<vmem>>, %arg6: memref<128x64xf32, #tpu.memory_space<vmem>>, %arg7: memref<128x32xf32, #tpu.memory_space<vmem>>) attributes {dimension_semantics = [#tpu.dimension_semantics<parallel>], iteration_bounds = array<i64: 1>, scalar_prefetch = 0 : i64, scratch_operands = 0 : i64, tpu.core_type = #tpu.core_type<tc>, window_params = [{transform_indices = @transform_0, window_bounds = array<i64: 128, 48>}, {pipeline_mode = #tpu.pipeline_mode<synchronous>, transform_indices = @transform_1, window_bounds = array<i64: 48, 64>}, {pipeline_mode = #tpu.pipeline_mode<synchronous>, transform_indices = @transform_2, window_bounds = array<i64: 1, 64>}, {pipeline_mode = #tpu.pipeline_mode<synchronous>, transform_indices = @transform_3, window_bounds = array<i64: 64, 32>}, {pipeline_mode = #tpu.pipeline_mode<synchronous>, transform_indices = @transform_4, window_bounds = array<i64: 1, 32>}, {transform_indices = @transform_5, window_bounds = array<i64: 128, 64>}, {transform_indices = @transform_6, window_bounds = array<i64: 128, 32>}]} {
    %c0 = arith.constant 0 : index
    %c0_0 = arith.constant 0 : index
    %0 = vector.load %arg1[%c0, %c0_0] : memref<128x48xf32, #tpu.memory_space<vmem>>, vector<128x48xf32>
    %1 = arith.truncf %0 : vector<128x48xf32> to vector<128x48xbf16>
    %c0_1 = arith.constant 0 : index
    %c0_2 = arith.constant 0 : index
    %2 = vector.load %arg2[%c0_1, %c0_2] : memref<48x64xbf16, #tpu.memory_space<vmem>>, vector<48x64xbf16>
    %cst = arith.constant dense<0.000000e+00> : vector<128x64xf32>
    %3 = tpu.matmul %1, %2, %cst {dimension_numbers = #tpu.dot_dimension_numbers<[1], [0], [0], [1], [0, 0, 1, 1], [], []>} : vector<128x48xbf16>, vector<48x64xbf16>, vector<128x64xf32> -> vector<128x64xf32>
    %c0_3 = arith.constant 0 : index
    %c0_4 = arith.constant 0 : index
    %4 = vector.load %arg3[%c0_3, %c0_4] : memref<1x64xf32, #tpu.memory_space<vmem>>, vector<1x64xf32>
    %5 = vector.broadcast %4 : vector<1x64xf32> to vector<128x64xf32>
    %6 = arith.addf %3, %5 : vector<128x64xf32>
    %cst_5 = arith.constant 0.000000e+00 : f32
    %7 = vector.broadcast %cst_5 : f32 to vector<128x64xf32>
    %8 = arith.maximumf %6, %7 : vector<128x64xf32>
    %c0_6 = arith.constant 0 : index
    %c0_7 = arith.constant 0 : index
    %9 = vector.load %arg6[%c0_6, %c0_7] : memref<128x64xf32, #tpu.memory_space<vmem>>, vector<128x64xf32>
    tpu.vector_store %arg6[%c0_6, %c0_7], %8 {strides = array<i32>} : memref<128x64xf32, #tpu.memory_space<vmem>>, vector<128x64xf32>,
    %10 = arith.truncf %8 : vector<128x64xf32> to vector<128x64xbf16>
    %c0_8 = arith.constant 0 : index
    %c0_9 = arith.constant 0 : index
    %11 = vector.load %arg4[%c0_8, %c0_9] : memref<64x32xbf16, #tpu.memory_space<vmem>>, vector<64x32xbf16>
    %cst_10 = arith.constant dense<0.000000e+00> : vector<128x32xf32>
    %12 = tpu.matmul %10, %11, %cst_10 {dimension_numbers = #tpu.dot_dimension_numbers<[1], [0], [0], [1], [0, 0, 1, 1], [], []>} : vector<128x64xbf16>, vector<64x32xbf16>, vector<128x32xf32> -> vector<128x32xf32>
    %c0_11 = arith.constant 0 : index
    %c0_12 = arith.constant 0 : index
    %13 = vector.load %arg5[%c0_11, %c0_12] : memref<1x32xf32, #tpu.memory_space<vmem>>, vector<1x32xf32>
    %14 = vector.broadcast %13 : vector<1x32xf32> to vector<128x32xf32>
    %15 = arith.addf %12, %14 : vector<128x32xf32>
    %c0_13 = arith.constant 0 : index
    %c0_14 = arith.constant 0 : index
    %16 = vector.load %arg7[%c0_13, %c0_14] : memref<128x32xf32, #tpu.memory_space<vmem>>, vector<128x32xf32>
    tpu.vector_store %arg7[%c0_13, %c0_14], %15 {strides = array<i32>} : memref<128x32xf32, #tpu.memory_space<vmem>>, vector<128x32xf32>,
    return
  }
  func.func @transform_0(%arg0: i32) -> (i32, i32) {
    %c0_i32 = arith.constant 0 : i32
    %c0_i32_0 = arith.constant 0 : i32
    return %arg0, %c0_i32 : i32, i32
  }
  func.func @transform_1(%arg0: i32) -> (i32, i32) {
    %c0_i32 = arith.constant 0 : i32
    %c0_i32_0 = arith.constant 0 : i32
    %c0_i32_1 = arith.constant 0 : i32
    return %c0_i32, %c0_i32_0 : i32, i32
  }
  func.func @transform_2(%arg0: i32) -> (i32, i32) {
    %c0_i32 = arith.constant 0 : i32
    %c0_i32_0 = arith.constant 0 : i32
    %c0_i32_1 = arith.constant 0 : i32
    return %c0_i32, %c0_i32_0 : i32, i32
  }
  func.func @transform_3(%arg0: i32) -> (i32, i32) {
    %c0_i32 = arith.constant 0 : i32
    %c0_i32_0 = arith.constant 0 : i32
    %c0_i32_1 = arith.constant 0 : i32
    return %c0_i32, %c0_i32_0 : i32, i32
  }
  func.func @transform_4(%arg0: i32) -> (i32, i32) {
    %c0_i32 = arith.constant 0 : i32
    %c0_i32_0 = arith.constant 0 : i32
    %c0_i32_1 = arith.constant 0 : i32
    return %c0_i32, %c0_i32_0 : i32, i32
  }
  func.func @transform_5(%arg0: i32) -> (i32, i32) {
    %c0_i32 = arith.constant 0 : i32
    %c0_i32_0 = arith.constant 0 : i32
    return %arg0, %c0_i32 : i32, i32
  }
  func.func @transform_6(%arg0: i32) -> (i32, i32) {
    %c0_i32 = arith.constant 0 : i32
    %c0_i32_0 = arith.constant 0 : i32
    return %arg0, %c0_i32 : i32, i32
  }
}

module attributes {stable_mosaic.version = 11 : i64} {
  func.func @_add_ln_mean_kernel(%arg0: i32, %arg1: memref<2x64x32xf32, #tpu.memory_space<vmem>>, %arg2: memref<2x64x32xf32, #tpu.memory_space<vmem>>, %arg3: memref<1x1x32xf32, #tpu.memory_space<vmem>>, %arg4: memref<1x1x32xf32, #tpu.memory_space<vmem>>, %arg5: memref<2x64x32xf32, #tpu.memory_space<vmem>>, %arg6: memref<2x1x32xf32, #tpu.memory_space<vmem>>) attributes {dimension_semantics = [#tpu.dimension_semantics<parallel>], iteration_bounds = array<i64: 1>, scalar_prefetch = 0 : i64, scratch_operands = 0 : i64, tpu.core_type = #tpu.core_type<tc>, window_params = [{transform_indices = @transform_0, window_bounds = array<i64: 2, 64, 32>}, {transform_indices = @transform_1, window_bounds = array<i64: 2, 64, 32>}, {pipeline_mode = #tpu.pipeline_mode<synchronous>, transform_indices = @transform_2, window_bounds = array<i64: 1, 1, 32>}, {pipeline_mode = #tpu.pipeline_mode<synchronous>, transform_indices = @transform_3, window_bounds = array<i64: 1, 1, 32>}, {transform_indices = @transform_4, window_bounds = array<i64: 2, 64, 32>}, {transform_indices = @transform_5, window_bounds = array<i64: 2, 1, 32>}]} {
    %c0 = arith.constant 0 : index
    %c0_0 = arith.constant 0 : index
    %c0_1 = arith.constant 0 : index
    %0 = vector.load %arg1[%c0, %c0_0, %c0_1] : memref<2x64x32xf32, #tpu.memory_space<vmem>>, vector<2x64x32xf32>
    %c0_2 = arith.constant 0 : index
    %c0_3 = arith.constant 0 : index
    %c0_4 = arith.constant 0 : index
    %1 = vector.load %arg2[%c0_2, %c0_3, %c0_4] : memref<2x64x32xf32, #tpu.memory_space<vmem>>, vector<2x64x32xf32>
    %2 = arith.addf %0, %1 : vector<2x64x32xf32>
    %c0_5 = arith.constant 0 : index
    %c0_6 = arith.constant 0 : index
    %c0_7 = arith.constant 0 : index
    %3 = vector.load %arg5[%c0_5, %c0_6, %c0_7] : memref<2x64x32xf32, #tpu.memory_space<vmem>>, vector<2x64x32xf32>
    tpu.vector_store %arg5[%c0_5, %c0_6, %c0_7], %2 {strides = array<i32>} : memref<2x64x32xf32, #tpu.memory_space<vmem>>, vector<2x64x32xf32>,
    %c0_8 = arith.constant 0 : index
    %c0_9 = arith.constant 0 : index
    %c0_10 = arith.constant 0 : index
    %4 = vector.load %arg3[%c0_8, %c0_9, %c0_10] : memref<1x1x32xf32, #tpu.memory_space<vmem>>, vector<1x1x32xf32>
    %c0_11 = arith.constant 0 : index
    %c0_12 = arith.constant 0 : index
    %c0_13 = arith.constant 0 : index
    %5 = vector.load %arg4[%c0_11, %c0_12, %c0_13] : memref<1x1x32xf32, #tpu.memory_space<vmem>>, vector<1x1x32xf32>
    %cst = arith.constant dense<0.000000e+00> : vector<2x64xf32>
    %6 = vector.multi_reduction <add>, %2, %cst [2] : vector<2x64x32xf32> to vector<2x64xf32>
    %7 = vector.shape_cast %6 : vector<2x64xf32> to vector<2x64x1xf32>
    %cst_14 = arith.constant 3.200000e+01 : f32
    %8 = vector.broadcast %cst_14 : f32 to vector<2x64x1xf32>
    %9 = arith.divf %7, %8 : vector<2x64x1xf32>
    %10 = vector.broadcast %9 : vector<2x64x1xf32> to vector<2x64x32xf32>
    %11 = arith.subf %2, %10 : vector<2x64x32xf32>
    %12 = arith.mulf %11, %11 : vector<2x64x32xf32>
    %cst_15 = arith.constant dense<0.000000e+00> : vector<2x64xf32>
    %13 = vector.multi_reduction <add>, %12, %cst_15 [2] : vector<2x64x32xf32> to vector<2x64xf32>
    %14 = vector.shape_cast %13 : vector<2x64xf32> to vector<2x64x1xf32>
    %cst_16 = arith.constant 3.200000e+01 : f32
    %15 = vector.broadcast %cst_16 : f32 to vector<2x64x1xf32>
    %16 = arith.divf %14, %15 : vector<2x64x1xf32>
    %17 = vector.broadcast %9 : vector<2x64x1xf32> to vector<2x64x32xf32>
    %18 = arith.subf %2, %17 : vector<2x64x32xf32>
    %cst_17 = arith.constant 9.99999974E-6 : f32
    %19 = vector.broadcast %cst_17 : f32 to vector<2x64x1xf32>
    %20 = arith.addf %16, %19 : vector<2x64x1xf32>
    %21 = math.rsqrt %20 : vector<2x64x1xf32>
    %22 = vector.broadcast %21 : vector<2x64x1xf32> to vector<2x64x32xf32>
    %23 = arith.mulf %18, %22 : vector<2x64x32xf32>
    %24 = vector.broadcast %4 : vector<1x1x32xf32> to vector<2x64x32xf32>
    %25 = arith.mulf %23, %24 : vector<2x64x32xf32>
    %26 = vector.broadcast %5 : vector<1x1x32xf32> to vector<2x64x32xf32>
    %27 = arith.addf %25, %26 : vector<2x64x32xf32>
    %cst_18 = arith.constant dense<0.000000e+00> : vector<2x32xf32>
    %28 = vector.multi_reduction <add>, %27, %cst_18 [1] : vector<2x64x32xf32> to vector<2x32xf32>
    %29 = vector.shape_cast %28 : vector<2x32xf32> to vector<2x1x32xf32>
    %cst_19 = arith.constant 6.400000e+01 : f32
    %30 = vector.broadcast %cst_19 : f32 to vector<2x1x32xf32>
    %31 = arith.divf %29, %30 : vector<2x1x32xf32>
    %c0_20 = arith.constant 0 : index
    %c0_21 = arith.constant 0 : index
    %c0_22 = arith.constant 0 : index
    %32 = vector.load %arg6[%c0_20, %c0_21, %c0_22] : memref<2x1x32xf32, #tpu.memory_space<vmem>>, vector<2x1x32xf32>
    tpu.vector_store %arg6[%c0_20, %c0_21, %c0_22], %31 {strides = array<i32>} : memref<2x1x32xf32, #tpu.memory_space<vmem>>, vector<2x1x32xf32>,
    return
  }
  func.func @transform_0(%arg0: i32) -> (i32, i32, i32) {
    %c0_i32 = arith.constant 0 : i32
    %c0_i32_0 = arith.constant 0 : i32
    %c0_i32_1 = arith.constant 0 : i32
    return %arg0, %c0_i32, %c0_i32_0 : i32, i32, i32
  }
  func.func @transform_1(%arg0: i32) -> (i32, i32, i32) {
    %c0_i32 = arith.constant 0 : i32
    %c0_i32_0 = arith.constant 0 : i32
    %c0_i32_1 = arith.constant 0 : i32
    return %arg0, %c0_i32, %c0_i32_0 : i32, i32, i32
  }
  func.func @transform_2(%arg0: i32) -> (i32, i32, i32) {
    %c0_i32 = arith.constant 0 : i32
    %c0_i32_0 = arith.constant 0 : i32
    %c0_i32_1 = arith.constant 0 : i32
    %c0_i32_2 = arith.constant 0 : i32
    return %c0_i32, %c0_i32_0, %c0_i32_1 : i32, i32, i32
  }
  func.func @transform_3(%arg0: i32) -> (i32, i32, i32) {
    %c0_i32 = arith.constant 0 : i32
    %c0_i32_0 = arith.constant 0 : i32
    %c0_i32_1 = arith.constant 0 : i32
    %c0_i32_2 = arith.constant 0 : i32
    return %c0_i32, %c0_i32_0, %c0_i32_1 : i32, i32, i32
  }
  func.func @transform_4(%arg0: i32) -> (i32, i32, i32) {
    %c0_i32 = arith.constant 0 : i32
    %c0_i32_0 = arith.constant 0 : i32
    %c0_i32_1 = arith.constant 0 : i32
    return %arg0, %c0_i32, %c0_i32_0 : i32, i32, i32
  }
  func.func @transform_5(%arg0: i32) -> (i32, i32, i32) {
    %c0_i32 = arith.constant 0 : i32
    %c0_i32_0 = arith.constant 0 : i32
    %c0_i32_1 = arith.constant 0 : i32
    return %arg0, %c0_i32, %c0_i32_0 : i32, i32, i32
  }
}

module attributes {stable_mosaic.version = 11 : i64} {
  func.func @_pm_kernel(%arg0: i32, %arg1: memref<32x128xf32, #tpu.memory_space<vmem>>, %arg2: memref<1x128xf32, #tpu.memory_space<vmem>>, %arg3: memref<1x128xf32, #tpu.memory_space<vmem>>, %arg4: memref<128x64xbf16, #tpu.memory_space<vmem>>, %arg5: memref<32x64xf32, #tpu.memory_space<vmem>>) attributes {dimension_semantics = [#tpu.dimension_semantics<parallel>], iteration_bounds = array<i64: 1>, scalar_prefetch = 0 : i64, scratch_operands = 0 : i64, tpu.core_type = #tpu.core_type<tc>, window_params = [{transform_indices = @transform_0, window_bounds = array<i64: 32, 128>}, {pipeline_mode = #tpu.pipeline_mode<synchronous>, transform_indices = @transform_1, window_bounds = array<i64: 1, 128>}, {pipeline_mode = #tpu.pipeline_mode<synchronous>, transform_indices = @transform_2, window_bounds = array<i64: 1, 128>}, {pipeline_mode = #tpu.pipeline_mode<synchronous>, transform_indices = @transform_3, window_bounds = array<i64: 128, 64>}, {transform_indices = @transform_4, window_bounds = array<i64: 32, 64>}]} {
    %c0 = arith.constant 0 : index
    %c0_0 = arith.constant 0 : index
    %0 = vector.load %arg1[%c0, %c0_0] : memref<32x128xf32, #tpu.memory_space<vmem>>, vector<32x128xf32>
    %c0_1 = arith.constant 0 : index
    %c0_2 = arith.constant 0 : index
    %1 = vector.load %arg2[%c0_1, %c0_2] : memref<1x128xf32, #tpu.memory_space<vmem>>, vector<1x128xf32>
    %c0_3 = arith.constant 0 : index
    %c0_4 = arith.constant 0 : index
    %2 = vector.load %arg3[%c0_3, %c0_4] : memref<1x128xf32, #tpu.memory_space<vmem>>, vector<1x128xf32>
    %cst = arith.constant dense<0.000000e+00> : vector<32xf32>
    %3 = vector.multi_reduction <add>, %0, %cst [1] : vector<32x128xf32> to vector<32xf32>
    %4 = vector.shape_cast %3 : vector<32xf32> to vector<32x1xf32>
    %cst_5 = arith.constant 1.280000e+02 : f32
    %5 = vector.broadcast %cst_5 : f32 to vector<32x1xf32>
    %6 = arith.divf %4, %5 : vector<32x1xf32>
    %7 = vector.broadcast %6 : vector<32x1xf32> to vector<32x128xf32>
    %8 = arith.subf %0, %7 : vector<32x128xf32>
    %9 = arith.mulf %8, %8 : vector<32x128xf32>
    %cst_6 = arith.constant dense<0.000000e+00> : vector<32xf32>
    %10 = vector.multi_reduction <add>, %9, %cst_6 [1] : vector<32x128xf32> to vector<32xf32>
    %11 = vector.shape_cast %10 : vector<32xf32> to vector<32x1xf32>
    %cst_7 = arith.constant 1.280000e+02 : f32
    %12 = vector.broadcast %cst_7 : f32 to vector<32x1xf32>
    %13 = arith.divf %11, %12 : vector<32x1xf32>
    %14 = vector.broadcast %6 : vector<32x1xf32> to vector<32x128xf32>
    %15 = arith.subf %0, %14 : vector<32x128xf32>
    %cst_8 = arith.constant 9.99999974E-6 : f32
    %16 = vector.broadcast %cst_8 : f32 to vector<32x1xf32>
    %17 = arith.addf %13, %16 : vector<32x1xf32>
    %18 = math.rsqrt %17 : vector<32x1xf32>
    %19 = vector.broadcast %18 : vector<32x1xf32> to vector<32x128xf32>
    %20 = arith.mulf %15, %19 : vector<32x128xf32>
    %21 = vector.broadcast %1 : vector<1x128xf32> to vector<32x128xf32>
    %22 = arith.mulf %20, %21 : vector<32x128xf32>
    %23 = vector.broadcast %2 : vector<1x128xf32> to vector<32x128xf32>
    %24 = arith.addf %22, %23 : vector<32x128xf32>
    %25 = arith.truncf %24 : vector<32x128xf32> to vector<32x128xbf16>
    %c0_9 = arith.constant 0 : index
    %c0_10 = arith.constant 0 : index
    %26 = vector.load %arg4[%c0_9, %c0_10] : memref<128x64xbf16, #tpu.memory_space<vmem>>, vector<128x64xbf16>
    %cst_11 = arith.constant dense<0.000000e+00> : vector<32x64xf32>
    %27 = tpu.matmul %25, %26, %cst_11 {dimension_numbers = #tpu.dot_dimension_numbers<[1], [0], [0], [1], [0, 0, 1, 1], [], []>} : vector<32x128xbf16>, vector<128x64xbf16>, vector<32x64xf32> -> vector<32x64xf32>
    %c0_12 = arith.constant 0 : index
    %c0_13 = arith.constant 0 : index
    %28 = vector.load %arg5[%c0_12, %c0_13] : memref<32x64xf32, #tpu.memory_space<vmem>>, vector<32x64xf32>
    tpu.vector_store %arg5[%c0_12, %c0_13], %27 {strides = array<i32>} : memref<32x64xf32, #tpu.memory_space<vmem>>, vector<32x64xf32>,
    return
  }
  func.func @transform_0(%arg0: i32) -> (i32, i32) {
    %c0_i32 = arith.constant 0 : i32
    %c0_i32_0 = arith.constant 0 : i32
    return %arg0, %c0_i32 : i32, i32
  }
  func.func @transform_1(%arg0: i32) -> (i32, i32) {
    %c0_i32 = arith.constant 0 : i32
    %c0_i32_0 = arith.constant 0 : i32
    %c0_i32_1 = arith.constant 0 : i32
    return %c0_i32, %c0_i32_0 : i32, i32
  }
  func.func @transform_2(%arg0: i32) -> (i32, i32) {
    %c0_i32 = arith.constant 0 : i32
    %c0_i32_0 = arith.constant 0 : i32
    %c0_i32_1 = arith.constant 0 : i32
    return %c0_i32, %c0_i32_0 : i32, i32
  }
  func.func @transform_3(%arg0: i32) -> (i32, i32) {
    %c0_i32 = arith.constant 0 : i32
    %c0_i32_0 = arith.constant 0 : i32
    %c0_i32_1 = arith.constant 0 : i32
    return %c0_i32, %c0_i32_0 : i32, i32
  }
  func.func @transform_4(%arg0: i32) -> (i32, i32) {
    %c0_i32 = arith.constant 0 : i32
    %c0_i32_0 = arith.constant 0 : i32
    return %arg0, %c0_i32 : i32, i32
  }
}

module attributes {stable_mosaic.version = 11 : i64} {
  func.func @_pyramid_stage_kernel(%arg0: i32, %arg1: memref<32x256xf32, #tpu.memory_space<vmem>>, %arg2: memref<256x128xbf16, #tpu.memory_space<vmem>>, %arg3: memref<1x128xf32, #tpu.memory_space<vmem>>, %arg4: memref<128x64xbf16, #tpu.memory_space<vmem>>, %arg5: memref<1x64xf32, #tpu.memory_space<vmem>>, %arg6: memref<32x64xf32, #tpu.memory_space<vmem>>, %arg7: memref<32x128xf32, #tpu.memory_space<vmem>>, %arg8: memref<32x64xf32, #tpu.memory_space<vmem>>) attributes {dimension_semantics = [#tpu.dimension_semantics<parallel>], iteration_bounds = array<i64: 1>, scalar_prefetch = 0 : i64, scratch_operands = 0 : i64, tpu.core_type = #tpu.core_type<tc>, window_params = [{transform_indices = @transform_0, window_bounds = array<i64: 32, 256>}, {pipeline_mode = #tpu.pipeline_mode<synchronous>, transform_indices = @transform_1, window_bounds = array<i64: 256, 128>}, {pipeline_mode = #tpu.pipeline_mode<synchronous>, transform_indices = @transform_2, window_bounds = array<i64: 1, 128>}, {pipeline_mode = #tpu.pipeline_mode<synchronous>, transform_indices = @transform_3, window_bounds = array<i64: 128, 64>}, {pipeline_mode = #tpu.pipeline_mode<synchronous>, transform_indices = @transform_4, window_bounds = array<i64: 1, 64>}, {transform_indices = @transform_5, window_bounds = array<i64: 32, 64>}, {transform_indices = @transform_6, window_bounds = array<i64: 32, 128>}, {transform_indices = @transform_7, window_bounds = array<i64: 32, 64>}]} {
    %c0 = arith.constant 0 : index
    %c0_0 = arith.constant 0 : index
    %0 = vector.load %arg1[%c0, %c0_0] : memref<32x256xf32, #tpu.memory_space<vmem>>, vector<32x256xf32>
    %1 = arith.truncf %0 : vector<32x256xf32> to vector<32x256xbf16>
    %c0_1 = arith.constant 0 : index
    %c0_2 = arith.constant 0 : index
    %2 = vector.load %arg2[%c0_1, %c0_2] : memref<256x128xbf16, #tpu.memory_space<vmem>>, vector<256x128xbf16>
    %cst = arith.constant dense<0.000000e+00> : vector<32x128xf32>
    %3 = tpu.matmul %1, %2, %cst {dimension_numbers = #tpu.dot_dimension_numbers<[1], [0], [0], [1], [0, 0, 1, 1], [], []>} : vector<32x256xbf16>, vector<256x128xbf16>, vector<32x128xf32> -> vector<32x128xf32>
    %c0_3 = arith.constant 0 : index
    %c0_4 = arith.constant 0 : index
    %4 = vector.load %arg3[%c0_3, %c0_4] : memref<1x128xf32, #tpu.memory_space<vmem>>, vector<1x128xf32>
    %5 = vector.broadcast %4 : vector<1x128xf32> to vector<32x128xf32>
    %6 = arith.addf %3, %5 : vector<32x128xf32>
    %cst_5 = arith.constant 0.000000e+00 : f32
    %7 = vector.broadcast %cst_5 : f32 to vector<32x128xf32>
    %8 = arith.maximumf %6, %7 : vector<32x128xf32>
    %c0_6 = arith.constant 0 : index
    %c0_7 = arith.constant 0 : index
    %9 = vector.load %arg7[%c0_6, %c0_7] : memref<32x128xf32, #tpu.memory_space<vmem>>, vector<32x128xf32>
    tpu.vector_store %arg7[%c0_6, %c0_7], %8 {strides = array<i32>} : memref<32x128xf32, #tpu.memory_space<vmem>>, vector<32x128xf32>,
    %10 = arith.truncf %8 : vector<32x128xf32> to vector<32x128xbf16>
    %c0_8 = arith.constant 0 : index
    %c0_9 = arith.constant 0 : index
    %11 = vector.load %arg4[%c0_8, %c0_9] : memref<128x64xbf16, #tpu.memory_space<vmem>>, vector<128x64xbf16>
    %cst_10 = arith.constant dense<0.000000e+00> : vector<32x64xf32>
    %12 = tpu.matmul %10, %11, %cst_10 {dimension_numbers = #tpu.dot_dimension_numbers<[1], [0], [0], [1], [0, 0, 1, 1], [], []>} : vector<32x128xbf16>, vector<128x64xbf16>, vector<32x64xf32> -> vector<32x64xf32>
    %c0_11 = arith.constant 0 : index
    %c0_12 = arith.constant 0 : index
    %13 = vector.load %arg5[%c0_11, %c0_12] : memref<1x64xf32, #tpu.memory_space<vmem>>, vector<1x64xf32>
    %14 = vector.broadcast %13 : vector<1x64xf32> to vector<32x64xf32>
    %15 = arith.addf %12, %14 : vector<32x64xf32>
    %c0_13 = arith.constant 0 : index
    %c0_14 = arith.constant 0 : index
    %16 = vector.load %arg6[%c0_13, %c0_14] : memref<32x64xf32, #tpu.memory_space<vmem>>, vector<32x64xf32>
    %17 = arith.addf %15, %16 : vector<32x64xf32>
    %c0_15 = arith.constant 0 : index
    %c0_16 = arith.constant 0 : index
    %18 = vector.load %arg8[%c0_15, %c0_16] : memref<32x64xf32, #tpu.memory_space<vmem>>, vector<32x64xf32>
    tpu.vector_store %arg8[%c0_15, %c0_16], %17 {strides = array<i32>} : memref<32x64xf32, #tpu.memory_space<vmem>>, vector<32x64xf32>,
    return
  }
  func.func @transform_0(%arg0: i32) -> (i32, i32) {
    %c0_i32 = arith.constant 0 : i32
    %c0_i32_0 = arith.constant 0 : i32
    return %arg0, %c0_i32 : i32, i32
  }
  func.func @transform_1(%arg0: i32) -> (i32, i32) {
    %c0_i32 = arith.constant 0 : i32
    %c0_i32_0 = arith.constant 0 : i32
    %c0_i32_1 = arith.constant 0 : i32
    return %c0_i32, %c0_i32_0 : i32, i32
  }
  func.func @transform_2(%arg0: i32) -> (i32, i32) {
    %c0_i32 = arith.constant 0 : i32
    %c0_i32_0 = arith.constant 0 : i32
    %c0_i32_1 = arith.constant 0 : i32
    return %c0_i32, %c0_i32_0 : i32, i32
  }
  func.func @transform_3(%arg0: i32) -> (i32, i32) {
    %c0_i32 = arith.constant 0 : i32
    %c0_i32_0 = arith.constant 0 : i32
    %c0_i32_1 = arith.constant 0 : i32
    return %c0_i32, %c0_i32_0 : i32, i32
  }
  func.func @transform_4(%arg0: i32) -> (i32, i32) {
    %c0_i32 = arith.constant 0 : i32
    %c0_i32_0 = arith.constant 0 : i32
    %c0_i32_1 = arith.constant 0 : i32
    return %c0_i32, %c0_i32_0 : i32, i32
  }
  func.func @transform_5(%arg0: i32) -> (i32, i32) {
    %c0_i32 = arith.constant 0 : i32
    %c0_i32_0 = arith.constant 0 : i32
    return %arg0, %c0_i32 : i32, i32
  }
  func.func @transform_6(%arg0: i32) -> (i32, i32) {
    %c0_i32 = arith.constant 0 : i32
    %c0_i32_0 = arith.constant 0 : i32
    return %arg0, %c0_i32 : i32, i32
  }
  func.func @transform_7(%arg0: i32) -> (i32, i32) {
    %c0_i32 = arith.constant 0 : i32
    %c0_i32_0 = arith.constant 0 : i32
    return %arg0, %c0_i32 : i32, i32
  }
}

module attributes {stable_mosaic.version = 11 : i64} {
  func.func @_pm_kernel(%arg0: i32, %arg1: memref<8x256xf32, #tpu.memory_space<vmem>>, %arg2: memref<1x256xf32, #tpu.memory_space<vmem>>, %arg3: memref<1x256xf32, #tpu.memory_space<vmem>>, %arg4: memref<256x128xbf16, #tpu.memory_space<vmem>>, %arg5: memref<8x128xf32, #tpu.memory_space<vmem>>) attributes {dimension_semantics = [#tpu.dimension_semantics<parallel>], iteration_bounds = array<i64: 1>, scalar_prefetch = 0 : i64, scratch_operands = 0 : i64, tpu.core_type = #tpu.core_type<tc>, window_params = [{transform_indices = @transform_0, window_bounds = array<i64: 8, 256>}, {pipeline_mode = #tpu.pipeline_mode<synchronous>, transform_indices = @transform_1, window_bounds = array<i64: 1, 256>}, {pipeline_mode = #tpu.pipeline_mode<synchronous>, transform_indices = @transform_2, window_bounds = array<i64: 1, 256>}, {pipeline_mode = #tpu.pipeline_mode<synchronous>, transform_indices = @transform_3, window_bounds = array<i64: 256, 128>}, {transform_indices = @transform_4, window_bounds = array<i64: 8, 128>}]} {
    %c0 = arith.constant 0 : index
    %c0_0 = arith.constant 0 : index
    %0 = vector.load %arg1[%c0, %c0_0] : memref<8x256xf32, #tpu.memory_space<vmem>>, vector<8x256xf32>
    %c0_1 = arith.constant 0 : index
    %c0_2 = arith.constant 0 : index
    %1 = vector.load %arg2[%c0_1, %c0_2] : memref<1x256xf32, #tpu.memory_space<vmem>>, vector<1x256xf32>
    %c0_3 = arith.constant 0 : index
    %c0_4 = arith.constant 0 : index
    %2 = vector.load %arg3[%c0_3, %c0_4] : memref<1x256xf32, #tpu.memory_space<vmem>>, vector<1x256xf32>
    %cst = arith.constant dense<0.000000e+00> : vector<8xf32>
    %3 = vector.multi_reduction <add>, %0, %cst [1] : vector<8x256xf32> to vector<8xf32>
    %4 = vector.shape_cast %3 : vector<8xf32> to vector<8x1xf32>
    %cst_5 = arith.constant 2.560000e+02 : f32
    %5 = vector.broadcast %cst_5 : f32 to vector<8x1xf32>
    %6 = arith.divf %4, %5 : vector<8x1xf32>
    %7 = vector.broadcast %6 : vector<8x1xf32> to vector<8x256xf32>
    %8 = arith.subf %0, %7 : vector<8x256xf32>
    %9 = arith.mulf %8, %8 : vector<8x256xf32>
    %cst_6 = arith.constant dense<0.000000e+00> : vector<8xf32>
    %10 = vector.multi_reduction <add>, %9, %cst_6 [1] : vector<8x256xf32> to vector<8xf32>
    %11 = vector.shape_cast %10 : vector<8xf32> to vector<8x1xf32>
    %cst_7 = arith.constant 2.560000e+02 : f32
    %12 = vector.broadcast %cst_7 : f32 to vector<8x1xf32>
    %13 = arith.divf %11, %12 : vector<8x1xf32>
    %14 = vector.broadcast %6 : vector<8x1xf32> to vector<8x256xf32>
    %15 = arith.subf %0, %14 : vector<8x256xf32>
    %cst_8 = arith.constant 9.99999974E-6 : f32
    %16 = vector.broadcast %cst_8 : f32 to vector<8x1xf32>
    %17 = arith.addf %13, %16 : vector<8x1xf32>
    %18 = math.rsqrt %17 : vector<8x1xf32>
    %19 = vector.broadcast %18 : vector<8x1xf32> to vector<8x256xf32>
    %20 = arith.mulf %15, %19 : vector<8x256xf32>
    %21 = vector.broadcast %1 : vector<1x256xf32> to vector<8x256xf32>
    %22 = arith.mulf %20, %21 : vector<8x256xf32>
    %23 = vector.broadcast %2 : vector<1x256xf32> to vector<8x256xf32>
    %24 = arith.addf %22, %23 : vector<8x256xf32>
    %25 = arith.truncf %24 : vector<8x256xf32> to vector<8x256xbf16>
    %c0_9 = arith.constant 0 : index
    %c0_10 = arith.constant 0 : index
    %26 = vector.load %arg4[%c0_9, %c0_10] : memref<256x128xbf16, #tpu.memory_space<vmem>>, vector<256x128xbf16>
    %cst_11 = arith.constant dense<0.000000e+00> : vector<8x128xf32>
    %27 = tpu.matmul %25, %26, %cst_11 {dimension_numbers = #tpu.dot_dimension_numbers<[1], [0], [0], [1], [0, 0, 1, 1], [], []>} : vector<8x256xbf16>, vector<256x128xbf16>, vector<8x128xf32> -> vector<8x128xf32>
    %c0_12 = arith.constant 0 : index
    %c0_13 = arith.constant 0 : index
    %28 = vector.load %arg5[%c0_12, %c0_13] : memref<8x128xf32, #tpu.memory_space<vmem>>, vector<8x128xf32>
    tpu.vector_store %arg5[%c0_12, %c0_13], %27 {strides = array<i32>} : memref<8x128xf32, #tpu.memory_space<vmem>>, vector<8x128xf32>,
    return
  }
  func.func @transform_0(%arg0: i32) -> (i32, i32) {
    %c0_i32 = arith.constant 0 : i32
    %c0_i32_0 = arith.constant 0 : i32
    return %arg0, %c0_i32 : i32, i32
  }
  func.func @transform_1(%arg0: i32) -> (i32, i32) {
    %c0_i32 = arith.constant 0 : i32
    %c0_i32_0 = arith.constant 0 : i32
    %c0_i32_1 = arith.constant 0 : i32
    return %c0_i32, %c0_i32_0 : i32, i32
  }
  func.func @transform_2(%arg0: i32) -> (i32, i32) {
    %c0_i32 = arith.constant 0 : i32
    %c0_i32_0 = arith.constant 0 : i32
    %c0_i32_1 = arith.constant 0 : i32
    return %c0_i32, %c0_i32_0 : i32, i32
  }
  func.func @transform_3(%arg0: i32) -> (i32, i32) {
    %c0_i32 = arith.constant 0 : i32
    %c0_i32_0 = arith.constant 0 : i32
    %c0_i32_1 = arith.constant 0 : i32
    return %c0_i32, %c0_i32_0 : i32, i32
  }
  func.func @transform_4(%arg0: i32) -> (i32, i32) {
    %c0_i32 = arith.constant 0 : i32
    %c0_i32_0 = arith.constant 0 : i32
    return %arg0, %c0_i32 : i32, i32
  }
}

module attributes {stable_mosaic.version = 11 : i64} {
  func.func @_pyramid_stage_kernel(%arg0: i32, %arg1: memref<8x512xf32, #tpu.memory_space<vmem>>, %arg2: memref<512x256xbf16, #tpu.memory_space<vmem>>, %arg3: memref<1x256xf32, #tpu.memory_space<vmem>>, %arg4: memref<256x128xbf16, #tpu.memory_space<vmem>>, %arg5: memref<1x128xf32, #tpu.memory_space<vmem>>, %arg6: memref<8x128xf32, #tpu.memory_space<vmem>>, %arg7: memref<8x128xf32, #tpu.memory_space<vmem>>) attributes {dimension_semantics = [#tpu.dimension_semantics<parallel>], iteration_bounds = array<i64: 1>, scalar_prefetch = 0 : i64, scratch_operands = 0 : i64, tpu.core_type = #tpu.core_type<tc>, window_params = [{transform_indices = @transform_0, window_bounds = array<i64: 8, 512>}, {pipeline_mode = #tpu.pipeline_mode<synchronous>, transform_indices = @transform_1, window_bounds = array<i64: 512, 256>}, {pipeline_mode = #tpu.pipeline_mode<synchronous>, transform_indices = @transform_2, window_bounds = array<i64: 1, 256>}, {pipeline_mode = #tpu.pipeline_mode<synchronous>, transform_indices = @transform_3, window_bounds = array<i64: 256, 128>}, {pipeline_mode = #tpu.pipeline_mode<synchronous>, transform_indices = @transform_4, window_bounds = array<i64: 1, 128>}, {transform_indices = @transform_5, window_bounds = array<i64: 8, 128>}, {transform_indices = @transform_6, window_bounds = array<i64: 8, 128>}]} {
    %c0 = arith.constant 0 : index
    %c0_0 = arith.constant 0 : index
    %0 = vector.load %arg1[%c0, %c0_0] : memref<8x512xf32, #tpu.memory_space<vmem>>, vector<8x512xf32>
    %1 = arith.truncf %0 : vector<8x512xf32> to vector<8x512xbf16>
    %c0_1 = arith.constant 0 : index
    %c0_2 = arith.constant 0 : index
    %2 = vector.load %arg2[%c0_1, %c0_2] : memref<512x256xbf16, #tpu.memory_space<vmem>>, vector<512x256xbf16>
    %cst = arith.constant dense<0.000000e+00> : vector<8x256xf32>
    %3 = tpu.matmul %1, %2, %cst {dimension_numbers = #tpu.dot_dimension_numbers<[1], [0], [0], [1], [0, 0, 1, 1], [], []>} : vector<8x512xbf16>, vector<512x256xbf16>, vector<8x256xf32> -> vector<8x256xf32>
    %c0_3 = arith.constant 0 : index
    %c0_4 = arith.constant 0 : index
    %4 = vector.load %arg3[%c0_3, %c0_4] : memref<1x256xf32, #tpu.memory_space<vmem>>, vector<1x256xf32>
    %5 = vector.broadcast %4 : vector<1x256xf32> to vector<8x256xf32>
    %6 = arith.addf %3, %5 : vector<8x256xf32>
    %cst_5 = arith.constant 0.000000e+00 : f32
    %7 = vector.broadcast %cst_5 : f32 to vector<8x256xf32>
    %8 = arith.maximumf %6, %7 : vector<8x256xf32>
    %9 = arith.truncf %8 : vector<8x256xf32> to vector<8x256xbf16>
    %c0_6 = arith.constant 0 : index
    %c0_7 = arith.constant 0 : index
    %10 = vector.load %arg4[%c0_6, %c0_7] : memref<256x128xbf16, #tpu.memory_space<vmem>>, vector<256x128xbf16>
    %cst_8 = arith.constant dense<0.000000e+00> : vector<8x128xf32>
    %11 = tpu.matmul %9, %10, %cst_8 {dimension_numbers = #tpu.dot_dimension_numbers<[1], [0], [0], [1], [0, 0, 1, 1], [], []>} : vector<8x256xbf16>, vector<256x128xbf16>, vector<8x128xf32> -> vector<8x128xf32>
    %c0_9 = arith.constant 0 : index
    %c0_10 = arith.constant 0 : index
    %12 = vector.load %arg5[%c0_9, %c0_10] : memref<1x128xf32, #tpu.memory_space<vmem>>, vector<1x128xf32>
    %13 = vector.broadcast %12 : vector<1x128xf32> to vector<8x128xf32>
    %14 = arith.addf %11, %13 : vector<8x128xf32>
    %c0_11 = arith.constant 0 : index
    %c0_12 = arith.constant 0 : index
    %15 = vector.load %arg6[%c0_11, %c0_12] : memref<8x128xf32, #tpu.memory_space<vmem>>, vector<8x128xf32>
    %16 = arith.addf %14, %15 : vector<8x128xf32>
    %c0_13 = arith.constant 0 : index
    %c0_14 = arith.constant 0 : index
    %17 = vector.load %arg7[%c0_13, %c0_14] : memref<8x128xf32, #tpu.memory_space<vmem>>, vector<8x128xf32>
    tpu.vector_store %arg7[%c0_13, %c0_14], %16 {strides = array<i32>} : memref<8x128xf32, #tpu.memory_space<vmem>>, vector<8x128xf32>,
    return
  }
  func.func @transform_0(%arg0: i32) -> (i32, i32) {
    %c0_i32 = arith.constant 0 : i32
    %c0_i32_0 = arith.constant 0 : i32
    return %arg0, %c0_i32 : i32, i32
  }
  func.func @transform_1(%arg0: i32) -> (i32, i32) {
    %c0_i32 = arith.constant 0 : i32
    %c0_i32_0 = arith.constant 0 : i32
    %c0_i32_1 = arith.constant 0 : i32
    return %c0_i32, %c0_i32_0 : i32, i32
  }
  func.func @transform_2(%arg0: i32) -> (i32, i32) {
    %c0_i32 = arith.constant 0 : i32
    %c0_i32_0 = arith.constant 0 : i32
    %c0_i32_1 = arith.constant 0 : i32
    return %c0_i32, %c0_i32_0 : i32, i32
  }
  func.func @transform_3(%arg0: i32) -> (i32, i32) {
    %c0_i32 = arith.constant 0 : i32
    %c0_i32_0 = arith.constant 0 : i32
    %c0_i32_1 = arith.constant 0 : i32
    return %c0_i32, %c0_i32_0 : i32, i32
  }
  func.func @transform_4(%arg0: i32) -> (i32, i32) {
    %c0_i32 = arith.constant 0 : i32
    %c0_i32_0 = arith.constant 0 : i32
    %c0_i32_1 = arith.constant 0 : i32
    return %c0_i32, %c0_i32_0 : i32, i32
  }
  func.func @transform_5(%arg0: i32) -> (i32, i32) {
    %c0_i32 = arith.constant 0 : i32
    %c0_i32_0 = arith.constant 0 : i32
    return %arg0, %c0_i32 : i32, i32
  }
  func.func @transform_6(%arg0: i32) -> (i32, i32) {
    %c0_i32 = arith.constant 0 : i32
    %c0_i32_0 = arith.constant 0 : i32
    return %arg0, %c0_i32 : i32, i32
  }
}

module attributes {stable_mosaic.version = 11 : i64} {
  func.func @_ln_mean_kernel(%arg0: i32, %arg1: memref<2x4x128xf32, #tpu.memory_space<vmem>>, %arg2: memref<1x1x128xf32, #tpu.memory_space<vmem>>, %arg3: memref<1x1x128xf32, #tpu.memory_space<vmem>>, %arg4: memref<2x1x128xf32, #tpu.memory_space<vmem>>) attributes {dimension_semantics = [#tpu.dimension_semantics<parallel>], iteration_bounds = array<i64: 1>, scalar_prefetch = 0 : i64, scratch_operands = 0 : i64, tpu.core_type = #tpu.core_type<tc>, window_params = [{transform_indices = @transform_0, window_bounds = array<i64: 2, 4, 128>}, {pipeline_mode = #tpu.pipeline_mode<synchronous>, transform_indices = @transform_1, window_bounds = array<i64: 1, 1, 128>}, {pipeline_mode = #tpu.pipeline_mode<synchronous>, transform_indices = @transform_2, window_bounds = array<i64: 1, 1, 128>}, {transform_indices = @transform_3, window_bounds = array<i64: 2, 1, 128>}]} {
    %c0 = arith.constant 0 : index
    %c0_0 = arith.constant 0 : index
    %c0_1 = arith.constant 0 : index
    %0 = vector.load %arg1[%c0, %c0_0, %c0_1] : memref<2x4x128xf32, #tpu.memory_space<vmem>>, vector<2x4x128xf32>
    %c0_2 = arith.constant 0 : index
    %c0_3 = arith.constant 0 : index
    %c0_4 = arith.constant 0 : index
    %1 = vector.load %arg2[%c0_2, %c0_3, %c0_4] : memref<1x1x128xf32, #tpu.memory_space<vmem>>, vector<1x1x128xf32>
    %c0_5 = arith.constant 0 : index
    %c0_6 = arith.constant 0 : index
    %c0_7 = arith.constant 0 : index
    %2 = vector.load %arg3[%c0_5, %c0_6, %c0_7] : memref<1x1x128xf32, #tpu.memory_space<vmem>>, vector<1x1x128xf32>
    %cst = arith.constant dense<0.000000e+00> : vector<2x4xf32>
    %3 = vector.multi_reduction <add>, %0, %cst [2] : vector<2x4x128xf32> to vector<2x4xf32>
    %4 = vector.shape_cast %3 : vector<2x4xf32> to vector<2x4x1xf32>
    %cst_8 = arith.constant 1.280000e+02 : f32
    %5 = vector.broadcast %cst_8 : f32 to vector<2x4x1xf32>
    %6 = arith.divf %4, %5 : vector<2x4x1xf32>
    %7 = vector.broadcast %6 : vector<2x4x1xf32> to vector<2x4x128xf32>
    %8 = arith.subf %0, %7 : vector<2x4x128xf32>
    %9 = arith.mulf %8, %8 : vector<2x4x128xf32>
    %cst_9 = arith.constant dense<0.000000e+00> : vector<2x4xf32>
    %10 = vector.multi_reduction <add>, %9, %cst_9 [2] : vector<2x4x128xf32> to vector<2x4xf32>
    %11 = vector.shape_cast %10 : vector<2x4xf32> to vector<2x4x1xf32>
    %cst_10 = arith.constant 1.280000e+02 : f32
    %12 = vector.broadcast %cst_10 : f32 to vector<2x4x1xf32>
    %13 = arith.divf %11, %12 : vector<2x4x1xf32>
    %14 = vector.broadcast %6 : vector<2x4x1xf32> to vector<2x4x128xf32>
    %15 = arith.subf %0, %14 : vector<2x4x128xf32>
    %cst_11 = arith.constant 9.99999974E-6 : f32
    %16 = vector.broadcast %cst_11 : f32 to vector<2x4x1xf32>
    %17 = arith.addf %13, %16 : vector<2x4x1xf32>
    %18 = math.rsqrt %17 : vector<2x4x1xf32>
    %19 = vector.broadcast %18 : vector<2x4x1xf32> to vector<2x4x128xf32>
    %20 = arith.mulf %15, %19 : vector<2x4x128xf32>
    %21 = vector.broadcast %1 : vector<1x1x128xf32> to vector<2x4x128xf32>
    %22 = arith.mulf %20, %21 : vector<2x4x128xf32>
    %23 = vector.broadcast %2 : vector<1x1x128xf32> to vector<2x4x128xf32>
    %24 = arith.addf %22, %23 : vector<2x4x128xf32>
    %cst_12 = arith.constant dense<0.000000e+00> : vector<2x128xf32>
    %25 = vector.multi_reduction <add>, %24, %cst_12 [1] : vector<2x4x128xf32> to vector<2x128xf32>
    %26 = vector.shape_cast %25 : vector<2x128xf32> to vector<2x1x128xf32>
    %cst_13 = arith.constant 4.000000e+00 : f32
    %27 = vector.broadcast %cst_13 : f32 to vector<2x1x128xf32>
    %28 = arith.divf %26, %27 : vector<2x1x128xf32>
    %c0_14 = arith.constant 0 : index
    %c0_15 = arith.constant 0 : index
    %c0_16 = arith.constant 0 : index
    %29 = vector.load %arg4[%c0_14, %c0_15, %c0_16] : memref<2x1x128xf32, #tpu.memory_space<vmem>>, vector<2x1x128xf32>
    tpu.vector_store %arg4[%c0_14, %c0_15, %c0_16], %28 {strides = array<i32>} : memref<2x1x128xf32, #tpu.memory_space<vmem>>, vector<2x1x128xf32>,
    return
  }
  func.func @transform_0(%arg0: i32) -> (i32, i32, i32) {
    %c0_i32 = arith.constant 0 : i32
    %c0_i32_0 = arith.constant 0 : i32
    %c0_i32_1 = arith.constant 0 : i32
    return %arg0, %c0_i32, %c0_i32_0 : i32, i32, i32
  }
  func.func @transform_1(%arg0: i32) -> (i32, i32, i32) {
    %c0_i32 = arith.constant 0 : i32
    %c0_i32_0 = arith.constant 0 : i32
    %c0_i32_1 = arith.constant 0 : i32
    %c0_i32_2 = arith.constant 0 : i32
    return %c0_i32, %c0_i32_0, %c0_i32_1 : i32, i32, i32
  }
  func.func @transform_2(%arg0: i32) -> (i32, i32, i32) {
    %c0_i32 = arith.constant 0 : i32
    %c0_i32_0 = arith.constant 0 : i32
    %c0_i32_1 = arith.constant 0 : i32
    %c0_i32_2 = arith.constant 0 : i32
    return %c0_i32, %c0_i32_0, %c0_i32_1 : i32, i32, i32
  }
  func.func @transform_3(%arg0: i32) -> (i32, i32, i32) {
    %c0_i32 = arith.constant 0 : i32
    %c0_i32_0 = arith.constant 0 : i32
    %c0_i32_1 = arith.constant 0 : i32
    return %arg0, %c0_i32, %c0_i32_0 : i32, i32, i32
  }
}

module attributes {stable_mosaic.version = 11 : i64} {
  func.func @_pos_ln_kernel(%arg0: i32, %arg1: memref<2x5x128xf32, #tpu.memory_space<vmem>>, %arg2: memref<1x5x128xf32, #tpu.memory_space<vmem>>, %arg3: memref<1x1x128xf32, #tpu.memory_space<vmem>>, %arg4: memref<1x1x128xf32, #tpu.memory_space<vmem>>, %arg5: memref<2x5x128xf32, #tpu.memory_space<vmem>>) attributes {dimension_semantics = [#tpu.dimension_semantics<parallel>], iteration_bounds = array<i64: 1>, scalar_prefetch = 0 : i64, scratch_operands = 0 : i64, tpu.core_type = #tpu.core_type<tc>, window_params = [{transform_indices = @transform_0, window_bounds = array<i64: 2, 5, 128>}, {pipeline_mode = #tpu.pipeline_mode<synchronous>, transform_indices = @transform_1, window_bounds = array<i64: 1, 5, 128>}, {pipeline_mode = #tpu.pipeline_mode<synchronous>, transform_indices = @transform_2, window_bounds = array<i64: 1, 1, 128>}, {pipeline_mode = #tpu.pipeline_mode<synchronous>, transform_indices = @transform_3, window_bounds = array<i64: 1, 1, 128>}, {transform_indices = @transform_4, window_bounds = array<i64: 2, 5, 128>}]} {
    %c0 = arith.constant 0 : index
    %c0_0 = arith.constant 0 : index
    %c0_1 = arith.constant 0 : index
    %0 = vector.load %arg1[%c0, %c0_0, %c0_1] : memref<2x5x128xf32, #tpu.memory_space<vmem>>, vector<2x5x128xf32>
    %c0_2 = arith.constant 0 : index
    %c0_3 = arith.constant 0 : index
    %c0_4 = arith.constant 0 : index
    %1 = vector.load %arg2[%c0_2, %c0_3, %c0_4] : memref<1x5x128xf32, #tpu.memory_space<vmem>>, vector<1x5x128xf32>
    %2 = vector.broadcast %1 : vector<1x5x128xf32> to vector<2x5x128xf32>
    %3 = arith.addf %0, %2 : vector<2x5x128xf32>
    %c0_5 = arith.constant 0 : index
    %c0_6 = arith.constant 0 : index
    %c0_7 = arith.constant 0 : index
    %4 = vector.load %arg3[%c0_5, %c0_6, %c0_7] : memref<1x1x128xf32, #tpu.memory_space<vmem>>, vector<1x1x128xf32>
    %c0_8 = arith.constant 0 : index
    %c0_9 = arith.constant 0 : index
    %c0_10 = arith.constant 0 : index
    %5 = vector.load %arg4[%c0_8, %c0_9, %c0_10] : memref<1x1x128xf32, #tpu.memory_space<vmem>>, vector<1x1x128xf32>
    %cst = arith.constant dense<0.000000e+00> : vector<2x5xf32>
    %6 = vector.multi_reduction <add>, %3, %cst [2] : vector<2x5x128xf32> to vector<2x5xf32>
    %7 = vector.shape_cast %6 : vector<2x5xf32> to vector<2x5x1xf32>
    %cst_11 = arith.constant 1.280000e+02 : f32
    %8 = vector.broadcast %cst_11 : f32 to vector<2x5x1xf32>
    %9 = arith.divf %7, %8 : vector<2x5x1xf32>
    %10 = vector.broadcast %9 : vector<2x5x1xf32> to vector<2x5x128xf32>
    %11 = arith.subf %3, %10 : vector<2x5x128xf32>
    %12 = arith.mulf %11, %11 : vector<2x5x128xf32>
    %cst_12 = arith.constant dense<0.000000e+00> : vector<2x5xf32>
    %13 = vector.multi_reduction <add>, %12, %cst_12 [2] : vector<2x5x128xf32> to vector<2x5xf32>
    %14 = vector.shape_cast %13 : vector<2x5xf32> to vector<2x5x1xf32>
    %cst_13 = arith.constant 1.280000e+02 : f32
    %15 = vector.broadcast %cst_13 : f32 to vector<2x5x1xf32>
    %16 = arith.divf %14, %15 : vector<2x5x1xf32>
    %17 = vector.broadcast %9 : vector<2x5x1xf32> to vector<2x5x128xf32>
    %18 = arith.subf %3, %17 : vector<2x5x128xf32>
    %cst_14 = arith.constant 9.99999974E-6 : f32
    %19 = vector.broadcast %cst_14 : f32 to vector<2x5x1xf32>
    %20 = arith.addf %16, %19 : vector<2x5x1xf32>
    %21 = math.rsqrt %20 : vector<2x5x1xf32>
    %22 = vector.broadcast %21 : vector<2x5x1xf32> to vector<2x5x128xf32>
    %23 = arith.mulf %18, %22 : vector<2x5x128xf32>
    %24 = vector.broadcast %4 : vector<1x1x128xf32> to vector<2x5x128xf32>
    %25 = arith.mulf %23, %24 : vector<2x5x128xf32>
    %26 = vector.broadcast %5 : vector<1x1x128xf32> to vector<2x5x128xf32>
    %27 = arith.addf %25, %26 : vector<2x5x128xf32>
    %c0_15 = arith.constant 0 : index
    %c0_16 = arith.constant 0 : index
    %c0_17 = arith.constant 0 : index
    %28 = vector.load %arg5[%c0_15, %c0_16, %c0_17] : memref<2x5x128xf32, #tpu.memory_space<vmem>>, vector<2x5x128xf32>
    tpu.vector_store %arg5[%c0_15, %c0_16, %c0_17], %27 {strides = array<i32>} : memref<2x5x128xf32, #tpu.memory_space<vmem>>, vector<2x5x128xf32>,
    return
  }
  func.func @transform_0(%arg0: i32) -> (i32, i32, i32) {
    %c0_i32 = arith.constant 0 : i32
    %c0_i32_0 = arith.constant 0 : i32
    %c0_i32_1 = arith.constant 0 : i32
    return %arg0, %c0_i32, %c0_i32_0 : i32, i32, i32
  }
  func.func @transform_1(%arg0: i32) -> (i32, i32, i32) {
    %c0_i32 = arith.constant 0 : i32
    %c0_i32_0 = arith.constant 0 : i32
    %c0_i32_1 = arith.constant 0 : i32
    %c0_i32_2 = arith.constant 0 : i32
    return %c0_i32, %c0_i32_0, %c0_i32_1 : i32, i32, i32
  }
  func.func @transform_2(%arg0: i32) -> (i32, i32, i32) {
    %c0_i32 = arith.constant 0 : i32
    %c0_i32_0 = arith.constant 0 : i32
    %c0_i32_1 = arith.constant 0 : i32
    %c0_i32_2 = arith.constant 0 : i32
    return %c0_i32, %c0_i32_0, %c0_i32_1 : i32, i32, i32
  }
  func.func @transform_3(%arg0: i32) -> (i32, i32, i32) {
    %c0_i32 = arith.constant 0 : i32
    %c0_i32_0 = arith.constant 0 : i32
    %c0_i32_1 = arith.constant 0 : i32
    %c0_i32_2 = arith.constant 0 : i32
    return %c0_i32, %c0_i32_0, %c0_i32_1 : i32, i32, i32
  }
  func.func @transform_4(%arg0: i32) -> (i32, i32, i32) {
    %c0_i32 = arith.constant 0 : i32
    %c0_i32_0 = arith.constant 0 : i32
    %c0_i32_1 = arith.constant 0 : i32
    return %arg0, %c0_i32, %c0_i32_0 : i32, i32, i32
  }
}

module attributes {stable_mosaic.version = 11 : i64} {
  func.func @_pos_ln_kernel(%arg0: i32, %arg1: memref<2x65x32xf32, #tpu.memory_space<vmem>>, %arg2: memref<1x65x32xf32, #tpu.memory_space<vmem>>, %arg3: memref<1x1x32xf32, #tpu.memory_space<vmem>>, %arg4: memref<1x1x32xf32, #tpu.memory_space<vmem>>, %arg5: memref<2x65x32xf32, #tpu.memory_space<vmem>>) attributes {dimension_semantics = [#tpu.dimension_semantics<parallel>], iteration_bounds = array<i64: 1>, scalar_prefetch = 0 : i64, scratch_operands = 0 : i64, tpu.core_type = #tpu.core_type<tc>, window_params = [{transform_indices = @transform_0, window_bounds = array<i64: 2, 65, 32>}, {pipeline_mode = #tpu.pipeline_mode<synchronous>, transform_indices = @transform_1, window_bounds = array<i64: 1, 65, 32>}, {pipeline_mode = #tpu.pipeline_mode<synchronous>, transform_indices = @transform_2, window_bounds = array<i64: 1, 1, 32>}, {pipeline_mode = #tpu.pipeline_mode<synchronous>, transform_indices = @transform_3, window_bounds = array<i64: 1, 1, 32>}, {transform_indices = @transform_4, window_bounds = array<i64: 2, 65, 32>}]} {
    %c0 = arith.constant 0 : index
    %c0_0 = arith.constant 0 : index
    %c0_1 = arith.constant 0 : index
    %0 = vector.load %arg1[%c0, %c0_0, %c0_1] : memref<2x65x32xf32, #tpu.memory_space<vmem>>, vector<2x65x32xf32>
    %c0_2 = arith.constant 0 : index
    %c0_3 = arith.constant 0 : index
    %c0_4 = arith.constant 0 : index
    %1 = vector.load %arg2[%c0_2, %c0_3, %c0_4] : memref<1x65x32xf32, #tpu.memory_space<vmem>>, vector<1x65x32xf32>
    %2 = vector.broadcast %1 : vector<1x65x32xf32> to vector<2x65x32xf32>
    %3 = arith.addf %0, %2 : vector<2x65x32xf32>
    %c0_5 = arith.constant 0 : index
    %c0_6 = arith.constant 0 : index
    %c0_7 = arith.constant 0 : index
    %4 = vector.load %arg3[%c0_5, %c0_6, %c0_7] : memref<1x1x32xf32, #tpu.memory_space<vmem>>, vector<1x1x32xf32>
    %c0_8 = arith.constant 0 : index
    %c0_9 = arith.constant 0 : index
    %c0_10 = arith.constant 0 : index
    %5 = vector.load %arg4[%c0_8, %c0_9, %c0_10] : memref<1x1x32xf32, #tpu.memory_space<vmem>>, vector<1x1x32xf32>
    %cst = arith.constant dense<0.000000e+00> : vector<2x65xf32>
    %6 = vector.multi_reduction <add>, %3, %cst [2] : vector<2x65x32xf32> to vector<2x65xf32>
    %7 = vector.shape_cast %6 : vector<2x65xf32> to vector<2x65x1xf32>
    %cst_11 = arith.constant 3.200000e+01 : f32
    %8 = vector.broadcast %cst_11 : f32 to vector<2x65x1xf32>
    %9 = arith.divf %7, %8 : vector<2x65x1xf32>
    %10 = vector.broadcast %9 : vector<2x65x1xf32> to vector<2x65x32xf32>
    %11 = arith.subf %3, %10 : vector<2x65x32xf32>
    %12 = arith.mulf %11, %11 : vector<2x65x32xf32>
    %cst_12 = arith.constant dense<0.000000e+00> : vector<2x65xf32>
    %13 = vector.multi_reduction <add>, %12, %cst_12 [2] : vector<2x65x32xf32> to vector<2x65xf32>
    %14 = vector.shape_cast %13 : vector<2x65xf32> to vector<2x65x1xf32>
    %cst_13 = arith.constant 3.200000e+01 : f32
    %15 = vector.broadcast %cst_13 : f32 to vector<2x65x1xf32>
    %16 = arith.divf %14, %15 : vector<2x65x1xf32>
    %17 = vector.broadcast %9 : vector<2x65x1xf32> to vector<2x65x32xf32>
    %18 = arith.subf %3, %17 : vector<2x65x32xf32>
    %cst_14 = arith.constant 9.99999974E-6 : f32
    %19 = vector.broadcast %cst_14 : f32 to vector<2x65x1xf32>
    %20 = arith.addf %16, %19 : vector<2x65x1xf32>
    %21 = math.rsqrt %20 : vector<2x65x1xf32>
    %22 = vector.broadcast %21 : vector<2x65x1xf32> to vector<2x65x32xf32>
    %23 = arith.mulf %18, %22 : vector<2x65x32xf32>
    %24 = vector.broadcast %4 : vector<1x1x32xf32> to vector<2x65x32xf32>
    %25 = arith.mulf %23, %24 : vector<2x65x32xf32>
    %26 = vector.broadcast %5 : vector<1x1x32xf32> to vector<2x65x32xf32>
    %27 = arith.addf %25, %26 : vector<2x65x32xf32>
    %c0_15 = arith.constant 0 : index
    %c0_16 = arith.constant 0 : index
    %c0_17 = arith.constant 0 : index
    %28 = vector.load %arg5[%c0_15, %c0_16, %c0_17] : memref<2x65x32xf32, #tpu.memory_space<vmem>>, vector<2x65x32xf32>
    tpu.vector_store %arg5[%c0_15, %c0_16, %c0_17], %27 {strides = array<i32>} : memref<2x65x32xf32, #tpu.memory_space<vmem>>, vector<2x65x32xf32>,
    return
  }
  func.func @transform_0(%arg0: i32) -> (i32, i32, i32) {
    %c0_i32 = arith.constant 0 : i32
    %c0_i32_0 = arith.constant 0 : i32
    %c0_i32_1 = arith.constant 0 : i32
    return %arg0, %c0_i32, %c0_i32_0 : i32, i32, i32
  }
  func.func @transform_1(%arg0: i32) -> (i32, i32, i32) {
    %c0_i32 = arith.constant 0 : i32
    %c0_i32_0 = arith.constant 0 : i32
    %c0_i32_1 = arith.constant 0 : i32
    %c0_i32_2 = arith.constant 0 : i32
    return %c0_i32, %c0_i32_0, %c0_i32_1 : i32, i32, i32
  }
  func.func @transform_2(%arg0: i32) -> (i32, i32, i32) {
    %c0_i32 = arith.constant 0 : i32
    %c0_i32_0 = arith.constant 0 : i32
    %c0_i32_1 = arith.constant 0 : i32
    %c0_i32_2 = arith.constant 0 : i32
    return %c0_i32, %c0_i32_0, %c0_i32_1 : i32, i32, i32
  }
  func.func @transform_3(%arg0: i32) -> (i32, i32, i32) {
    %c0_i32 = arith.constant 0 : i32
    %c0_i32_0 = arith.constant 0 : i32
    %c0_i32_1 = arith.constant 0 : i32
    %c0_i32_2 = arith.constant 0 : i32
    return %c0_i32, %c0_i32_0, %c0_i32_1 : i32, i32, i32
  }
  func.func @transform_4(%arg0: i32) -> (i32, i32, i32) {
    %c0_i32 = arith.constant 0 : i32
    %c0_i32_0 = arith.constant 0 : i32
    %c0_i32_1 = arith.constant 0 : i32
    return %arg0, %c0_i32, %c0_i32_0 : i32, i32, i32
  }
}

</mosaic_0001>

<bundles_post_ra>
// kernel: all2cross_forward.10
= control target key start
LH: loop header
LB: loop body
LE: loop exit
PB: predicated region body
PF: predicated region fallthrough
CT: control target
= control target key end

     0   :  { %vm67_vm0 = vcmask 261120   ;;  %vm384_vm1 = vcmask 253952   ;;  %s875_s0 = inlined_call_operand.vmem [shape: f32[2,64,32], index: 0, kind: input, shape index: {}, may-alias: {0,1}]   ;;  %s876_s1 = inlined_call_operand.vmem [shape: f32[2,64,32], index: 1, kind: input, shape index: {}, may-alias: {0,1}]   ;;  %s877_s4 = inlined_call_operand.vmem [shape: f32[2,64,32], index: 4, kind: output, shape index: {0}]   ;;  %s878_s2 = inlined_call_operand.vmem [shape: f32[1,1,32], index: 2, kind: input, shape index: {}]   ;;  %s879_s3 = inlined_call_operand.vmem [shape: f32[1,1,32], index: 3, kind: input, shape index: {}]   ;;  %s880_s5 = inlined_call_operand.vmem [shape: f32[2,1,32], index: 5, kind: output, shape index: {1}]  }
   0x1   :  { %v19_v0 = vld [vmem:[%s875_s0] sm:$0xff]  ;;  %v20_v5 = vld [vmem:[%s875_s0 + $0x8] sm:$0xff]  ;;  %v21_v11 = vld [vmem:[%s875_s0 + $0x10] sm:$0xff] }
   0x2   :  { %v35_v1 = vld [vmem:[%s876_s1] sm:$0xff]  ;;  %v36_v6 = vld [vmem:[%s876_s1 + $0x8] sm:$0xff]  ;;  %v37_v14 = vld [vmem:[%s876_s1 + $0x10] sm:$0xff] }
   0x3   :  { %v27_v2 = vld [vmem:[%s875_s0 + $0x40] sm:$0xff]  ;;  %v468_v3 = vadd.f32 %v35_v1, %v19_v0  ;;  %v481_v8 = vadd.f32 %v36_v6, %v20_v5  ;;  %v28_v9 = vld [vmem:[%s875_s0 + $0x48] sm:$0xff]  ;;  %v29_v15 = vld [vmem:[%s875_s0 + $0x50] sm:$0xff]  ;;  %v522_v18 = vadd.f32 %v37_v14, %v21_v11 }
   0x4   :  { %v43_v4 = vld [vmem:[%s876_s1 + $0x40] sm:$0xff]  ;;  %v44_v10 = vld [vmem:[%s876_s1 + $0x48] sm:$0xff]  ;;  %v45_v16 = vld [vmem:[%s876_s1 + $0x50] sm:$0xff] }
   0x5   :  { %v479_v7 = vadd.f32 %v43_v4, %v27_v2  ;;  %v86_v12 = vsel %vm67_vm0, %v468_v3, 0.0  ;;  %68 = vst.msk [vmem:[%s877_s4] sm:$0xff] %vm67_vm0, %v468_v3  ;;  %v499_v13 = vadd.f32 %v44_v10, %v28_v9  ;;  %69 = vst.msk [vmem:[%s877_s4 + $0x8] sm:$0xff] %vm67_vm0, %v481_v8  ;;  %v524_v19 = vadd.f32 %v45_v16, %v29_v15  ;;  %v22_v20 = vld [vmem:[%s875_s0 + $0x18] sm:$0xff]  ;;  %v23_v26 = vld [vmem:[%s875_s0 + $0x20] sm:$0xff] }
   0x6   :  { %87 = vadd.xlane.f32.xlu0 %v86_v12  ;;  %v38_v21 = vld [vmem:[%s876_s1 + $0x18] sm:$0xff]  ;;  %v89_v23 = vsel %vm67_vm0, %v481_v8, 0.0  ;;  %v39_v27 = vld [vmem:[%s876_s1 + $0x20] sm:$0xff]  ;;  %70 = vst.msk [vmem:[%s877_s4 + $0x10] sm:$0xff] %vm67_vm0, %v522_v18  ;;  %v24_v33 = vld [vmem:[%s875_s0 + $0x28] sm:$0xff]  ;;  %v92_v43 = vsel %vm67_vm0, %v522_v18, 0.0 }
   0x7   :  { %v110_v17 = vsel %vm67_vm0, %v479_v7, 0.0  ;;  %76 = vst.msk [vmem:[%s877_s4 + $0x40] sm:$0xff] %vm67_vm0, %v479_v7  ;;  %v30_v22 = vld [vmem:[%s875_s0 + $0x58] sm:$0xff]  ;;  %77 = vst.msk [vmem:[%s877_s4 + $0x48] sm:$0xff] %vm67_vm0, %v499_v13  ;;  %v542_v24 = vadd.f32 %v38_v21, %v22_v20  ;;  %v113_v28 = vsel %vm67_vm0, %v499_v13, 0.0  ;;  %v567_v30 = vadd.f32 %v39_v27, %v23_v26  ;;  %v31_v31 = vld [vmem:[%s875_s0 + $0x60] sm:$0xff] }
   0x8   :  { %111 = vadd.xlane.f32.xlu1 %v110_v17  ;;  %v46_v25 = vld [vmem:[%s876_s1 + $0x58] sm:$0xff]  ;;  %78 = vst.msk [vmem:[%s877_s4 + $0x50] sm:$0xff] %vm67_vm0, %v524_v19  ;;  %v47_v32 = vld [vmem:[%s876_s1 + $0x60] sm:$0xff]  ;;  %v40_v35 = vld [vmem:[%s876_s1 + $0x28] sm:$0xff]  ;;  %v116_v48 = vsel %vm67_vm0, %v524_v19, 0.0 }
   0x9   :  { %v565_v29 = vadd.f32 %v46_v25, %v30_v22  ;;  %71 = vst.msk [vmem:[%s877_s4 + $0x18] sm:$0xff] %vm67_vm0, %v542_v24  ;;  %v583_v34 = vadd.f32 %v47_v32, %v31_v31  ;;  %v32_v36 = vld [vmem:[%s875_s0 + $0x68] sm:$0xff]  ;;  %72 = vst.msk [vmem:[%s877_s4 + $0x20] sm:$0xff] %vm67_vm0, %v567_v30  ;;  %v604_v38 = vadd.f32 %v40_v35, %v24_v33  ;;  %v25_v40 = vld [vmem:[%s875_s0 + $0x30] sm:$0xff]  ;;  %v95_v54 = vsel %vm67_vm0, %v542_v24, 0.0 }
   0xa   :  { %v48_v37 = vld [vmem:[%s876_s1 + $0x68] sm:$0xff]  ;;  %90 = vadd.xlane.f32.xlu0 %v89_v23  ;;  %v41_v41 = vld [vmem:[%s876_s1 + $0x30] sm:$0xff]  ;;  %v26_v46 = vld [vmem:[%s875_s0 + $0x38] sm:$0xff]  ;;  %v98_v56 = vsel %vm67_vm0, %v567_v30, 0.0 }
   0xb   :  { %79 = vst.msk [vmem:[%s877_s4 + $0x58] sm:$0xff] %vm67_vm0, %v565_v29  ;;  %v606_v39 = vadd.f32 %v48_v37, %v32_v36  ;;  %v33_v42 = vld [vmem:[%s875_s0 + $0x70] sm:$0xff]  ;;  %80 = vst.msk [vmem:[%s877_s4 + $0x60] sm:$0xff] %vm67_vm0, %v583_v34  ;;  %v624_v44 = vadd.f32 %v41_v41, %v25_v40  ;;  %v42_v47 = vld [vmem:[%s876_s1 + $0x38] sm:$0xff]  ;;  %v119_v55 = vsel %vm67_vm0, %v565_v29, 0.0  ;;  %v122_v57 = vsel %vm67_vm0, %v583_v34, 0.0 }
   0xc   :  { %114 = vadd.xlane.f32.xlu1 %v113_v28  ;;  %v49_v45 = vld [vmem:[%s876_s1 + $0x70] sm:$0xff]  ;;  %73 = vst.msk [vmem:[%s877_s4 + $0x28] sm:$0xff] %vm67_vm0, %v604_v38  ;;  %v649_v50 = vadd.f32 %v42_v47, %v26_v46  ;;  %v34_v51 = vld [vmem:[%s875_s0 + $0x78] sm:$0xff]  ;;  %v101_v58 = vsel %vm67_vm0, %v604_v38, 0.0 }
   0xd   :  { %81 = vst.msk [vmem:[%s877_s4 + $0x68] sm:$0xff] %vm67_vm0, %v606_v39  ;;  %v647_v49 = vadd.f32 %v49_v45, %v33_v42  ;;  %v50_v52 = vld [vmem:[%s876_s1 + $0x78] sm:$0xff]  ;;  %74 = vst.msk [vmem:[%s877_s4 + $0x30] sm:$0xff] %vm67_vm0, %v624_v44  ;;  %v125_v59 = vsel %vm67_vm0, %v606_v39, 0.0  ;;  %v104_v60 = vsel %vm67_vm0, %v624_v44, 0.0 }
   0xe   :  { %v662_v53 = vadd.f32 %v50_v52, %v34_v51  ;;  %93 = vadd.xlane.f32.xlu0 %v92_v43  ;;  %75 = vst.msk [vmem:[%s877_s4 + $0x38] sm:$0xff] %vm67_vm0, %v649_v50  ;;  %v107_v62 = vsel %vm67_vm0, %v649_v50, 0.0 }
   0xf   :  { %82 = vst.msk [vmem:[%s877_s4 + $0x70] sm:$0xff] %vm67_vm0, %v647_v49  ;;  %v128_v61 = vsel %vm67_vm0, %v647_v49, 0.0 }
  0x10   :  { %117 = vadd.xlane.f32.xlu1 %v116_v48  ;;  %83 = vst.msk [vmem:[%s877_s4 + $0x78] sm:$0xff] %vm67_vm0, %v662_v53  ;;  %v131_v63 = vsel %vm67_vm0, %v662_v53, 0.0 }
  0x12   :  { %96 = vadd.xlane.f32.xlu0 %v95_v54 }
  0x14   :  { %120 = vadd.xlane.f32.xlu1 %v119_v55 }
  0x16   :  { %99 = vadd.xlane.f32.xlu0 %v98_v56 }
  0x18   :  { %123 = vadd.xlane.f32.xlu1 %v122_v57 }
  0x1a   :  { %102 = vadd.xlane.f32.xlu0 %v101_v58 }
  0x1c   :  { %126 = vadd.xlane.f32.xlu1 %v125_v59 }
  0x1e   :  { %105 = vadd.xlane.f32.xlu0 %v104_v60 }
  0x20   :  { %129 = vadd.xlane.f32.xlu1 %v128_v61 }
  0x22   :  { %108 = vadd.xlane.f32.xlu0 %v107_v62 }
  0x24   :  { %132 = vadd.xlane.f32.xlu1 %v131_v63 }
  0x93   :  { %v88_v0 = vpop.xlane.xlu0 %87 }
  0x94   :  { %v135_v1 = vmul.f32 0.03125, %v88_v0 }
  0x95   :  { %v112_v2 = vpop.xlane.xlu1 %111 }
  0x96   :  { %v143_v4 = vmul.f32 0.03125, %v112_v2  ;;  %v700_v5 = vsub.f32 %v468_v3, %v135_v1 }
  0x97   :  { %v91_v9 = vpop.xlane.xlu0 %90 }
  0x98   :  { %v703_v6 = vsub.f32 %v479_v7, %v143_v4  ;;  %v136_v10 = vmul.f32 0.03125, %v91_v9  ;;  %v167_v12 = vmul.f32 %v700_v5, %v700_v5 }
  0x99   :  { %v115_v11 = vpop.xlane.xlu1 %114 }
  0x9a   :  { %v144_v14 = vmul.f32 0.03125, %v115_v11  ;;  %v175_v15 = vmul.f32 %v703_v6, %v703_v6  ;;  %v710_v16 = vsub.f32 %v481_v8, %v136_v10  ;;  %v183_v17 = vsel %vm67_vm0, %v167_v12, 0.0 }
  0x9b   :  { %184 = vadd.xlane.f32.xlu0 %v183_v17  ;;  %v94_v7 = vpop.xlane.xlu0 %93 }
  0x9c   :  { %v714_v3 = vsub.f32 %v499_v13, %v144_v14  ;;  %v137_v20 = vmul.f32 0.03125, %v94_v7  ;;  %v207_v22 = vsel %vm67_vm0, %v175_v15, 0.0  ;;  %v168_v23 = vmul.f32 %v710_v16, %v710_v16 }
  0x9d   :  { %v118_v21 = vpop.xlane.xlu1 %117 }
  0x9e   :  { %v145_v25 = vmul.f32 0.03125, %v118_v21  ;;  %v176_v26 = vmul.f32 %v714_v3, %v714_v3  ;;  %v722_v8 = vsub.f32 %v522_v18, %v137_v20  ;;  %v186_v27 = vsel %vm67_vm0, %v168_v23, 0.0 }
  0x9f   :  { %208 = vadd.xlane.f32.xlu0 %v207_v22  ;;  %187 = vadd.xlane.f32.xlu1 %v186_v27  ;;  %v97_v28 = vpop.xlane.xlu0 %96 }
  0xa0   :  { %v726_v13 = vsub.f32 %v524_v19, %v145_v25  ;;  %v138_v31 = vmul.f32 0.03125, %v97_v28  ;;  %v210_v33 = vsel %vm67_vm0, %v176_v26, 0.0  ;;  %v169_v35 = vmul.f32 %v722_v8, %v722_v8 }
  0xa1   :  { %v121_v32 = vpop.xlane.xlu1 %120 }
  0xa2   :  { %v146_v36 = vmul.f32 0.03125, %v121_v32  ;;  %v177_v18 = vmul.f32 %v726_v13, %v726_v13  ;;  %v734_v37 = vsub.f32 %v542_v24, %v138_v31  ;;  %v189_v19 = vsel %vm67_vm0, %v169_v35, 0.0 }
  0xa3   :  { %211 = vadd.xlane.f32.xlu1 %v210_v33  ;;  %190 = vadd.xlane.f32.xlu0 %v189_v19  ;;  %v100_v41 = vpop.xlane.xlu0 %99 }
  0xa4   :  { %v738_v40 = vsub.f32 %v565_v29, %v146_v36  ;;  %v139_v42 = vmul.f32 0.03125, %v100_v41  ;;  %v213_v45 = vsel %vm67_vm0, %v177_v18, 0.0  ;;  %v170_v46 = vmul.f32 %v734_v37, %v734_v37 }
  0xa5   :  { %v124_v43 = vpop.xlane.xlu1 %123 }
  0xa6   :  { %v147_v47 = vmul.f32 0.03125, %v124_v43  ;;  %v178_v24 = vmul.f32 %v738_v40, %v738_v40  ;;  %v746_v48 = vsub.f32 %v567_v30, %v139_v42  ;;  %v192_v29 = vsel %vm67_vm0, %v170_v46, 0.0 }
  0xa7   :  { %214 = vadd.xlane.f32.xlu1 %v213_v45  ;;  %193 = vadd.xlane.f32.xlu0 %v192_v29  ;;  %v103_v52 = vpop.xlane.xlu0 %102 }
  0xa8   :  { %v750_v51 = vsub.f32 %v583_v34, %v147_v47  ;;  %v140_v54 = vmul.f32 0.03125, %v103_v52  ;;  %v216_v56 = vsel %vm67_vm0, %v178_v24, 0.0  ;;  %v171_v57 = vmul.f32 %v746_v48, %v746_v48 }
  0xa9   :  { %v127_v55 = vpop.xlane.xlu1 %126 }
  0xaa   :  { %v148_v58 = vmul.f32 0.03125, %v127_v55  ;;  %v179_v30 = vmul.f32 %v750_v51, %v750_v51  ;;  %v758_v59 = vsub.f32 %v604_v38, %v140_v54  ;;  %v195_v34 = vsel %vm67_vm0, %v171_v57, 0.0 }
  0xab   :  { %217 = vadd.xlane.f32.xlu1 %v216_v56  ;;  %196 = vadd.xlane.f32.xlu0 %v195_v34  ;;  %v106_v61 = vpop.xlane.xlu0 %105 }
  0xac   :  { %v762_v60 = vsub.f32 %v606_v39, %v148_v58  ;;  %v141_v62 = vmul.f32 0.03125, %v106_v61  ;;  %v219_v0 = vsel %vm67_vm0, %v179_v30, 0.0  ;;  %v172_v1 = vmul.f32 %v758_v59, %v758_v59 }
  0xad   :  { %v130_v63 = vpop.xlane.xlu1 %129 }
  0xae   :  { %v149_v2 = vmul.f32 0.03125, %v130_v63  ;;  %v180_v38 = vmul.f32 %v762_v60, %v762_v60  ;;  %v770_v4 = vsub.f32 %v624_v44, %v141_v62  ;;  %v198_v39 = vsel %vm67_vm0, %v172_v1, 0.0 }
  0xaf   :  { %220 = vadd.xlane.f32.xlu1 %v219_v0  ;;  %199 = vadd.xlane.f32.xlu0 %v198_v39  ;;  %v109_v10 = vpop.xlane.xlu0 %108 }
  0xb0   :  { %v774_v9 = vsub.f32 %v647_v49, %v149_v2  ;;  %v142_v11 = vmul.f32 0.03125, %v109_v10  ;;  %v222_v14 = vsel %vm67_vm0, %v180_v38, 0.0  ;;  %v173_v15 = vmul.f32 %v770_v4, %v770_v4 }
  0xb1   :  { %v133_v12 = vpop.xlane.xlu1 %132 }
  0xb2   :  { %v150_v17 = vmul.f32 0.03125, %v133_v12  ;;  %v181_v44 = vmul.f32 %v774_v9, %v774_v9  ;;  %v782_v7 = vsub.f32 %v649_v50, %v142_v11  ;;  %v201_v49 = vsel %vm67_vm0, %v173_v15, 0.0 }
  0xb3   :  { %223 = vadd.xlane.f32.xlu1 %v222_v14  ;;  %202 = vadd.xlane.f32.xlu0 %v201_v49 }
  0xb4   :  { %v786_v20 = vsub.f32 %v662_v53, %v150_v17  ;;  %v225_v21 = vsel %vm67_vm0, %v181_v44, 0.0  ;;  %v174_v22 = vmul.f32 %v782_v7, %v782_v7 }
  0xb6   :  { %v182_v23 = vmul.f32 %v786_v20, %v786_v20  ;;  %v204_v25 = vsel %vm67_vm0, %v174_v22, 0.0  ;;  %v799_v22 = vld [vmem:[%s878_s2] ss:$0 sm:$0xff] }
  0xb7   :  { %226 = vadd.xlane.f32.xlu1 %v225_v21  ;;  %205 = vadd.xlane.f32.xlu0 %v204_v25 }
  0xb8   :  { %v228_v50 = vsel %vm67_vm0, %v182_v23, 0.0 }
  0xbb   :  { %229 = vadd.xlane.f32.xlu1 %v228_v50 }
 0x128   :  { %v185_v26 = vpop.xlane.xlu0 %184 }
 0x129   :  { %v231_v53 = vmul.f32 0.03125, %v185_v26 }
 0x12b   :  { %v247_v35 = vadd.f32 1e-05, %v231_v53 }
 0x12c   :  { %v188_v27 = vpop.xlane.xlu1 %187  ;;  %v209_v28 = vpop.xlane.xlu0 %208 }
 0x12d   :  { %v232_v31 = vmul.f32 0.03125, %v188_v27  ;;  %v239_v32 = vmul.f32 0.03125, %v209_v28 }
 0x12f   :  { %v248_v33 = vadd.f32 1e-05, %v232_v31  ;;  %v255_v19 = vadd.f32 1e-05, %v239_v32 }
 0x130   :  { %v212_v36 = vpop.xlane.xlu1 %211  ;;  %v191_v18 = vpop.xlane.xlu0 %190 }
 0x131   :  { %v240_v41 = vmul.f32 0.03125, %v212_v36  ;;  %v233_v42 = vmul.f32 0.03125, %v191_v18  ;;  %397 = vrsqrt.f32 %v248_v33 }
 0x132   :  { %399 = vrsqrt.f32 %v247_v35 }
 0x133   :  { %v256_v43 = vadd.f32 1e-05, %v240_v41  ;;  %v249_v45 = vadd.f32 1e-05, %v233_v42  ;;  %401 = vrsqrt.f32 %v255_v19 }
 0x134   :  { %v215_v46 = vpop.xlane.xlu1 %214  ;;  %v194_v47 = vpop.xlane.xlu0 %193 }
 0x135   :  { %v241_v24 = vmul.f32 0.03125, %v215_v46  ;;  %v234_v29 = vmul.f32 0.03125, %v194_v47  ;;  %403 = vrsqrt.f32 %v249_v45 }
 0x136   :  { %405 = vrsqrt.f32 %v256_v43 }
 0x137   :  { %v257_v52 = vadd.f32 1e-05, %v241_v24  ;;  %v250_v54 = vadd.f32 1e-05, %v234_v29 }
 0x138   :  { %v218_v55 = vpop.xlane.xlu1 %217  ;;  %v197_v56 = vpop.xlane.xlu0 %196 }
 0x139   :  { %407 = vrsqrt.f32 %v257_v52  ;;  %v242_v57 = vmul.f32 0.03125, %v218_v55  ;;  %v235_v58 = vmul.f32 0.03125, %v197_v56 }
 0x13a   :  { %409 = vrsqrt.f32 %v250_v54 }
 0x13b   :  { %v258_v30 = vadd.f32 1e-05, %v242_v57  ;;  %v251_v34 = vadd.f32 1e-05, %v235_v58  ;;  %v398_v63 = vpop.eup %397 }
 0x13c   :  { %v221_v61 = vpop.xlane.xlu1 %220  ;;  %v200_v62 = vpop.xlane.xlu0 %199  ;;  %v280_v12 = vmul.f32 %v398_v63, %v710_v16 }
 0x13d   :  { %411 = vrsqrt.f32 %v258_v30  ;;  %v243_v0 = vmul.f32 0.03125, %v221_v61  ;;  %v236_v1 = vmul.f32 0.03125, %v200_v62  ;;  %v400_v2 = vpop.eup %399 }
 0x13e   :  { %413 = vrsqrt.f32 %v251_v34  ;;  %v402_v38 = vpop.eup %401  ;;  %v279_v23 = vmul.f32 %v400_v2, %v700_v5  ;;  %v302_v53 = vmul.f32 %v799_v22, %v280_v12 }
 0x13f   :  { %v259_v39 = vadd.f32 1e-05, %v243_v0  ;;  %v252_v10 = vadd.f32 1e-05, %v236_v1  ;;  %v404_v11 = vpop.eup %403  ;;  %v287_v25 = vmul.f32 %v402_v38, %v703_v6 }
 0x140   :  { %v224_v14 = vpop.xlane.xlu1 %223  ;;  %v203_v15 = vpop.xlane.xlu0 %202  ;;  %v281_v50 = vmul.f32 %v404_v11, %v722_v8  ;;  %v811_v8 = vld [vmem:[%s879_s3] ss:$0 sm:$0xff]  ;;  %v301_v18 = vmul.f32 %v799_v22, %v279_v23 }
 0x141   :  { %v406_v17 = vpop.eup %405  ;;  %415 = vrsqrt.f32 %v259_v39  ;;  %v244_v44 = vmul.f32 0.03125, %v224_v14  ;;  %v237_v49 = vmul.f32 0.03125, %v203_v15  ;;  %v324_v42 = vadd.f32 %v811_v8, %v302_v53 }
 0x142   :  { %417 = vrsqrt.f32 %v252_v10  ;;  %v288_v27 = vmul.f32 %v406_v17, %v714_v3  ;;  %v309_v3 = vmul.f32 %v799_v22, %v287_v25  ;;  %v303_v19 = vmul.f32 %v799_v22, %v281_v50 }
 0x143   :  { %v408_v21 = vpop.eup %407  ;;  %v260_v16 = vadd.f32 1e-05, %v244_v44  ;;  %v253_v28 = vadd.f32 1e-05, %v237_v49  ;;  %v323_v55 = vadd.f32 %v811_v8, %v301_v18  ;;  %v340_v62 = vsel %vm67_vm0, %v324_v42, 0.0 }
 0x144   :  { %v410_v26 = vpop.eup %409  ;;  %v227_v31 = vpop.xlane.xlu1 %226  ;;  %v289_v36 = vmul.f32 %v408_v21, %v726_v13  ;;  %v310_v13 = vmul.f32 %v799_v22, %v288_v27  ;;  %v325_v56 = vadd.f32 %v811_v8, %v303_v19  ;;  %v331_v30 = vadd.f32 %v811_v8, %v309_v3 }
 0x145   :  { %v206_v32 = vpop.xlane.xlu0 %205  ;;  %v282_v33 = vmul.f32 %v410_v26, %v734_v37  ;;  %419 = vrsqrt.f32 %v260_v16  ;;  %v245_v35 = vmul.f32 0.03125, %v227_v31  ;;  %v339_v39 = vsel %vm67_vm0, %v323_v55, 0.0 }
 0x146   :  { %421 = vrsqrt.f32 %v253_v28  ;;  %v238_v5 = vmul.f32 0.03125, %v206_v32  ;;  %v311_v52 = vmul.f32 %v799_v22, %v289_v36  ;;  %v332_v34 = vadd.f32 %v811_v8, %v310_v13 }
 0x147   :  { %v412_v6 = vpop.eup %411  ;;  %v261_v41 = vadd.f32 1e-05, %v245_v35  ;;  %v304_v47 = vmul.f32 %v799_v22, %v282_v33  ;;  %v342_v10 = vsel %vm67_vm0, %v325_v56, 0.0  ;;  %v341_v14 = vadd.f32 %v340_v62, %v339_v39 }
 0x148   :  { %v414_v37 = vpop.eup %413  ;;  %v290_v43 = vmul.f32 %v412_v6, %v738_v40  ;;  %v254_v45 = vadd.f32 1e-05, %v238_v5  ;;  %v230_v46 = vpop.xlane.xlu1 %229  ;;  %v333_v1 = vadd.f32 %v811_v8, %v311_v52  ;;  %v361_v15 = vsel %vm67_vm0, %v332_v34, 0.0 }
 0x149   :  { %v283_v24 = vmul.f32 %v414_v37, %v746_v48  ;;  %423 = vrsqrt.f32 %v261_v41  ;;  %v246_v29 = vmul.f32 0.03125, %v230_v46  ;;  %v326_v63 = vadd.f32 %v811_v8, %v304_v47 }
 0x14a   :  { %425 = vrsqrt.f32 %v254_v45  ;;  %v312_v48 = vmul.f32 %v799_v22, %v290_v43  ;;  %v360_v44 = vsel %vm67_vm0, %v331_v30, 0.0  ;;  %v343_v25 = vadd.f32 %v342_v10, %v341_v14 }
 0x14b   :  { %v416_v54 = vpop.eup %415  ;;  %v305_v57 = vmul.f32 %v799_v22, %v283_v24  ;;  %v262_v58 = vadd.f32 1e-05, %v246_v29  ;;  %v344_v49 = vsel %vm67_vm0, %v326_v63, 0.0  ;;  %v363_v50 = vsel %vm67_vm0, %v333_v1, 0.0 }
 0x14c   :  { %v418_v40 = vpop.eup %417  ;;  %v291_v61 = vmul.f32 %v416_v54, %v750_v51  ;;  %v362_v27 = vadd.f32 %v361_v15, %v360_v44  ;;  %v345_v32 = vadd.f32 %v344_v49, %v343_v25 }
 0x14d   :  { %v284_v0 = vmul.f32 %v418_v40, %v758_v59  ;;  %427 = vrsqrt.f32 %v262_v58  ;;  %v327_v11 = vadd.f32 %v811_v8, %v305_v57  ;;  %v334_v59 = vadd.f32 %v811_v8, %v312_v48 }
 0x14e   :  { %v313_v2 = vmul.f32 %v799_v22, %v291_v61  ;;  %v364_v36 = vadd.f32 %v363_v50, %v362_v27 }
 0x14f   :  { %v420_v38 = vpop.eup %419  ;;  %v306_v51 = vmul.f32 %v799_v22, %v284_v0  ;;  %v346_v28 = vsel %vm67_vm0, %v327_v11, 0.0  ;;  %v365_v33 = vsel %vm67_vm0, %v334_v59, 0.0 }
 0x150   :  { %v422_v12 = vpop.eup %421  ;;  %v292_v17 = vmul.f32 %v420_v38, %v762_v60  ;;  %v335_v16 = vadd.f32 %v811_v8, %v313_v2  ;;  %v347_v3 = vadd.f32 %v346_v28, %v345_v32  ;;  %v366_v42 = vadd.f32 %v365_v33, %v364_v36 }
 0x151   :  { %v328_v21 = vadd.f32 %v811_v8, %v306_v51  ;;  %v285_v23 = vmul.f32 %v422_v12, %v770_v4 }
 0x152   :  { %v314_v26 = vmul.f32 %v799_v22, %v292_v17  ;;  %v367_v19 = vsel %vm67_vm0, %v335_v16, 0.0 }
 0x153   :  { %v424_v53 = vpop.eup %423  ;;  %v307_v60 = vmul.f32 %v799_v22, %v285_v23  ;;  %v348_v5 = vsel %vm67_vm0, %v328_v21, 0.0  ;;  %v368_v24 = vadd.f32 %v367_v19, %v366_v42 }
 0x154   :  { %v426_v31 = vpop.eup %425  ;;  %v336_v35 = vadd.f32 %v811_v8, %v314_v26  ;;  %v293_v4 = vmul.f32 %v424_v53, %v774_v9  ;;  %v349_v45 = vadd.f32 %v348_v5, %v347_v3 }
 0x155   :  { %v329_v6 = vadd.f32 %v811_v8, %v307_v60  ;;  %v286_v18 = vmul.f32 %v426_v31, %v782_v7 }
 0x156   :  { %v315_v41 = vmul.f32 %v799_v22, %v293_v4  ;;  %v369_v9 = vsel %vm67_vm0, %v336_v35, 0.0 }
 0x157   :  { %v428_v37 = vpop.eup %427  ;;  %v350_v13 = vsel %vm67_vm0, %v329_v6, 0.0  ;;  %v308_v43 = vmul.f32 %v799_v22, %v286_v18  ;;  %v370_v55 = vadd.f32 %v369_v9, %v368_v24 }
 0x158   :  { %v337_v46 = vadd.f32 %v811_v8, %v315_v41  ;;  %v294_v47 = vmul.f32 %v428_v37, %v786_v20  ;;  %v351_v29 = vadd.f32 %v350_v13, %v349_v45 }
 0x159   :  { %v330_v7 = vadd.f32 %v811_v8, %v308_v43 }
 0x15a   :  { %v371_v52 = vsel %vm67_vm0, %v337_v46, 0.0  ;;  %v316_v54 = vmul.f32 %v799_v22, %v294_v47 }
 0x15b   :  { %v352_v56 = vsel %vm67_vm0, %v330_v7, 0.0  ;;  %v372_v40 = vadd.f32 %v371_v52, %v370_v55 }
 0x15c   :  { %v353_v57 = vadd.f32 %v352_v56, %v351_v29  ;;  %v338_v58 = vadd.f32 %v811_v8, %v316_v54 }
 0x15e   :  { %v354_v30 = vrot.slane %v353_v57, 4  ;;  %v373_v34 = vsel %vm67_vm0, %v338_v58, 0.0 }
 0x15f   :  { %v374_v48 = vadd.f32 %v373_v34, %v372_v40 }
 0x160   :  { %v355_v20 = vadd.f32 %v354_v30, %v353_v57 }
 0x161   :  { %v375_v61 = vrot.slane %v374_v48, 4 }
 0x162   :  { %v356_v62 = vrot.slane %v355_v20, 2 }
 0x163   :  { %v376_v63 = vadd.f32 %v375_v61, %v374_v48 }
 0x164   :  { %v357_v0 = vadd.f32 %v356_v62, %v355_v20 }
 0x165   :  { %v377_v1 = vrot.slane %v376_v63, 2 }
 0x166   :  { %v358_v2 = vrot.slane %v357_v0, 1 }
 0x167   :  { %v378_v38 = vadd.f32 %v377_v1, %v376_v63 }
 0x168   :  { %v359_v22 = vadd.f32 %v358_v2, %v357_v0 }
 0x169   :  { %v379_v39 = vrot.slane %v378_v38, 1 }
 0x16a   :  { %v382_v10 = vmul.f32 0.015625, %v359_v22 }
 0x16b   :  { %v380_v11 = vadd.f32 %v379_v39, %v378_v38 }
 0x16c   :  { %385 = vst.msk [vmem:[%s880_s5] sm:$0x1] %vm384_vm1, %v382_v10 }
 0x16d   :  { %v383_v8 = vmul.f32 0.015625, %v380_v11 }
 0x16f   :  { %386 = vst.msk [vmem:[%s880_s5 + $0x1] sm:$0x1] %vm384_vm1, %v383_v8 }

// kernel: all2cross_forward.9
= control target key start
LH: loop header
LB: loop body
LE: loop exit
PB: predicated region body
PF: predicated region fallthrough
CT: control target
= control target key end

     0   :  { %vm78_vm0 = vcmask 392192   ;;  %vm216_vm1 = vcmask 523264   ;;  %vm401_vm2 = vcmask 261120   ;;  %s799_s1 = inlined_call_operand.vmem [shape: bf16[48,64], index: 1, kind: input, shape index: {}]   ;;  %s800_s0 = inlined_call_operand.vmem [shape: f32[128,48], index: 0, kind: input, shape index: {}]   ;;  %s801_s3 = inlined_call_operand.vmem [shape: bf16[64,32], index: 3, kind: input, shape index: {}]   ;;  %s802_s2 = inlined_call_operand.vmem [shape: f32[1,64], index: 2, kind: input, shape index: {}]   ;;  %s803_s5 = inlined_call_operand.vmem [shape: f32[128,64], index: 5, kind: output, shape index: {0}]   ;;  %s804_s4 = inlined_call_operand.vmem [shape: f32[1,32], index: 4, kind: input, shape index: {}]   ;;  %s805_s6 = inlined_call_operand.vmem [shape: f32[128,32], index: 6, kind: output, shape index: {1}]  }
   0x1   :  { %v520_v0 = vld [vmem:[%s799_s1] sm:$0xff]   ;;  %v521_v1 = vld [vmem:[%s799_s1 + $0x8] sm:$0xff]   ;;  %v522_v4 = vld [vmem:[%s799_s1 + $0x10] sm:$0xff]  }
   0x2   :  { %474 = vmatprep.subr.bf16.mxu0 %v520_v0  ;;  %v23_v2 = vld [vmem:[%s800_s0] sm:$0xff]  ;;  %v24_v3 = vld [vmem:[%s800_s0 + $0x8] sm:$0xff]  ;;  %v25_v6 = vld [vmem:[%s800_s0 + $0x10] sm:$0xff] }
   0x3   :  { %475 = vmatpush3.bf16.msra.mxu0 %v520_v0  ;;  %v39_v5 = vpack.c.bf16 %v24_v3, %v23_v2  ;;  %v26_v7 = vld [vmem:[%s800_s0 + $0x18] sm:$0xff]  ;;  %v27_v8 = vld [vmem:[%s800_s0 + $0x20] sm:$0xff]  ;;  %v28_v9 = vld [vmem:[%s800_s0 + $0x28] sm:$0xff] }
   0x4   :  { %476 = vmatprep.subr.bf16.mxu0 %v521_v1  ;;  %v523_v10 = vld [vmem:[%s801_s3] sm:$0xff]   ;;  %v40_v11 = vpack.c.bf16 %v26_v7, %v25_v6  ;;  %v524_v12 = vld [vmem:[%s801_s3 + $0x8] sm:$0xff]   ;;  %v41_v13 = vpack.c.bf16 %v28_v9, %v27_v8  ;;  %v29_v14 = vld [vmem:[%s800_s0 + $0x30] sm:$0xff] }
   0x5   :  { %480 = vmatprep.mubr.msk.bf16.mxu0 %vm78_vm0, %v39_v5  ;;  %496 = vmatprep.subr.bf16.mxu1 %v523_v10  ;;  %v30_v15 = vld [vmem:[%s800_s0 + $0x38] sm:$0xff]  ;;  %v31_v16 = vld [vmem:[%s800_s0 + $0x40] sm:$0xff]  ;;  %v32_v17 = vld [vmem:[%s800_s0 + $0x48] sm:$0xff] }
   0x6   :  { %497 = vmatpush3.bf16.msra.mxu1 %v523_v10  ;;  %v42_v18 = vpack.c.bf16 %v30_v15, %v29_v14  ;;  %v43_v19 = vpack.c.bf16 %v32_v17, %v31_v16  ;;  %v33_v20 = vld [vmem:[%s800_s0 + $0x50] sm:$0xff]  ;;  %v34_v21 = vld [vmem:[%s800_s0 + $0x58] sm:$0xff]  ;;  %v35_v22 = vld [vmem:[%s800_s0 + $0x60] sm:$0xff] }
   0x7   :  { %477 = vmatpush3.bf16.msra.mxu0 %v521_v1  ;;  %498 = vmatprep.subr.bf16.mxu1 %v524_v12  ;;  %v36_v23 = vld [vmem:[%s800_s0 + $0x68] sm:$0xff]  ;;  %v44_v24 = vpack.c.bf16 %v34_v21, %v33_v20  ;;  %v37_v26 = vld [vmem:[%s800_s0 + $0x70] sm:$0xff]  ;;  %v38_v27 = vld [vmem:[%s800_s0 + $0x78] sm:$0xff] }
   0x8   :  { %478 = vmatprep.subr.bf16.mxu0 %v522_v4  ;;  %v45_v25 = vpack.c.bf16 %v36_v23, %v35_v22  ;;  %v46_v28 = vpack.c.bf16 %v38_v27, %v37_v26  ;;  %v525_v29 = vld [vmem:[%s801_s3 + $0x10] sm:$0xff]   ;;  %v526_v30 = vld [vmem:[%s801_s3 + $0x18] sm:$0xff]   ;;  %v642_v31 = vld [vmem:[%s802_s2] ss:$0 sm:$0xff] }
   0xa   :  { %499 = vmatpush3.bf16.msra.mxu1 %v524_v12 }
   0xb   :  { %479 = vmatpush3.bf16.msra.mxu0 %v522_v4  ;;  %500 = vmatprep.subr.bf16.mxu1 %v525_v29 }
   0xe   :  { %481 = vmatmul.mubr.msk.bf16.vlgmr.msra.gmra.mrb[0].mxu0 %vm78_vm0, %v40_v11  ;;  %501 = vmatpush3.bf16.msra.mxu1 %v525_v29 }
   0xf   :  { %484 = vmatprep.mubr.msk.bf16.mxu0 %vm78_vm0, %v41_v13  ;;  %502 = vmatprep.subr.bf16.mxu1 %v526_v30 }
  0x12   :  { %503 = vmatpush3.bf16.msra.mxu1 %v526_v30 }
  0x16   :  { %485 = vmatmul.mubr.msk.bf16.gmra.mrb[4].mxu0 %vm78_vm0, %v42_v18 }
  0x17   :  { %488 = vmatprep.mubr.msk.bf16.mxu0 %vm78_vm0, %v43_v19 }
  0x1e   :  { %489 = vmatmul.mubr.msk.bf16.gmra.mrb[8].mxu0 %vm78_vm0, %v44_v24  ;;  %v438_v24 = vld [vmem:[%s804_s4] ss:$0 sm:$0xff] }
  0x1f   :  { %492 = vmatprep.mubr.msk.bf16.mxu0 %vm78_vm0, %v45_v25 }
  0x26   :  { %493 = vmatmul.mubr.msk.bf16.gmra.mrb[12].mxu0 %vm78_vm0, %v46_v28 }
  0xe1   :  { %v482_v32 = vpop.f32.mrb[0].mxu0 }
  0xe2   :  { %v146_v33 = vadd.f32 %v482_v32, %v642_v31  ;;  %v137_v34 = vpop.f32.mrb[1].mxu0 }
  0xe3   :  { %v138_v35 = vadd.f32 %v642_v31, %v137_v34  ;;  %v483_v36 = vpop.f32.mrb[2].mxu0 }
  0xe4   :  { %v202_v37 = vmax.f32 %v146_v33, 0.0  ;;  %v149_v38 = vadd.f32 %v483_v36, %v642_v31  ;;  %v140_v39 = vpop.f32.mrb[3].mxu0 }
  0xe5   :  { %v200_v40 = vmax.f32 %v138_v35, 0.0  ;;  %v141_v41 = vadd.f32 %v642_v31, %v140_v39 }
  0xe6   :  { %219 = vst.msk [vmem:[%s803_s5 + $0x10] sm:$0xff] %vm216_vm1, %v202_v37  ;;  %v203_v42 = vmax.f32 %v149_v38, 0.0 }
  0xe7   :  { %217 = vst.msk [vmem:[%s803_s5] sm:$0xff] %vm216_vm1, %v200_v40  ;;  %v201_v43 = vmax.f32 %v141_v41, 0.0 }
  0xe8   :  { %220 = vst.msk [vmem:[%s803_s5 + $0x18] sm:$0xff] %vm216_vm1, %v203_v42  ;;  %v234_v44 = vpack.c.bf16 %v203_v42, %v202_v37 }
  0xe9   :  { %218 = vst.msk [vmem:[%s803_s5 + $0x8] sm:$0xff] %vm216_vm1, %v201_v43  ;;  %v486_v45 = vpop.f32.mrb[4].mxu0  ;;  %v233_v46 = vpack.c.bf16 %v201_v43, %v200_v40 }
  0xea   :  { %v162_v47 = vadd.f32 %v486_v45, %v642_v31  ;;  %v153_v48 = vpop.f32.mrb[5].mxu0 }
  0xeb   :  { %v154_v49 = vadd.f32 %v642_v31, %v153_v48  ;;  %v487_v50 = vpop.f32.mrb[6].mxu0  ;;  %504 = vmatprep.mubr.msk.bf16.mxu1 %vm216_vm1, %v233_v46 }
  0xec   :  { %v206_v51 = vmax.f32 %v162_v47, 0.0  ;;  %v165_v52 = vadd.f32 %v487_v50, %v642_v31  ;;  %v156_v53 = vpop.f32.mrb[7].mxu0  ;;  %505 = vmatmul.mubr.msk.bf16.vlgmr.msra.gmra.mrb[0].mxu1 %vm216_vm1, %v234_v44 }
  0xed   :  { %v204_v54 = vmax.f32 %v154_v49, 0.0  ;;  %v157_v55 = vadd.f32 %v642_v31, %v156_v53 }
  0xee   :  { %223 = vst.msk [vmem:[%s803_s5 + $0x30] sm:$0xff] %vm216_vm1, %v206_v51  ;;  %v207_v56 = vmax.f32 %v165_v52, 0.0 }
  0xef   :  { %221 = vst.msk [vmem:[%s803_s5 + $0x20] sm:$0xff] %vm216_vm1, %v204_v54  ;;  %v205_v57 = vmax.f32 %v157_v55, 0.0 }
  0xf0   :  { %224 = vst.msk [vmem:[%s803_s5 + $0x38] sm:$0xff] %vm216_vm1, %v207_v56  ;;  %v236_v58 = vpack.c.bf16 %v207_v56, %v206_v51 }
  0xf1   :  { %222 = vst.msk [vmem:[%s803_s5 + $0x28] sm:$0xff] %vm216_vm1, %v205_v57  ;;  %v235_v59 = vpack.c.bf16 %v205_v57, %v204_v54  ;;  %v490_v60 = vpop.f32.mrb[8].mxu0 }
  0xf2   :  { %v178_v61 = vadd.f32 %v490_v60, %v642_v31  ;;  %v169_v62 = vpop.f32.mrb[9].mxu0 }
  0xf3   :  { %v170_v63 = vadd.f32 %v642_v31, %v169_v62  ;;  %v491_v0 = vpop.f32.mrb[10].mxu0  ;;  %508 = vmatprep.mubr.msk.bf16.mxu1 %vm216_vm1, %v235_v59 }
  0xf4   :  { %v210_v1 = vmax.f32 %v178_v61, 0.0  ;;  %v181_v2 = vadd.f32 %v491_v0, %v642_v31  ;;  %v172_v3 = vpop.f32.mrb[11].mxu0  ;;  %509 = vmatmul.mubr.msk.bf16.gmra.mrb[4].mxu1 %vm216_vm1, %v236_v58 }
  0xf5   :  { %v208_v4 = vmax.f32 %v170_v63, 0.0  ;;  %v173_v5 = vadd.f32 %v642_v31, %v172_v3 }
  0xf6   :  { %227 = vst.msk [vmem:[%s803_s5 + $0x50] sm:$0xff] %vm216_vm1, %v210_v1  ;;  %v211_v6 = vmax.f32 %v181_v2, 0.0 }
  0xf7   :  { %225 = vst.msk [vmem:[%s803_s5 + $0x40] sm:$0xff] %vm216_vm1, %v208_v4  ;;  %v209_v7 = vmax.f32 %v173_v5, 0.0 }
  0xf8   :  { %228 = vst.msk [vmem:[%s803_s5 + $0x58] sm:$0xff] %vm216_vm1, %v211_v6  ;;  %v238_v8 = vpack.c.bf16 %v211_v6, %v210_v1 }
  0xf9   :  { %226 = vst.msk [vmem:[%s803_s5 + $0x48] sm:$0xff] %vm216_vm1, %v209_v7  ;;  %v237_v9 = vpack.c.bf16 %v209_v7, %v208_v4  ;;  %v494_v10 = vpop.f32.mrb[12].mxu0 }
  0xfa   :  { %v194_v11 = vadd.f32 %v494_v10, %v642_v31  ;;  %v185_v12 = vpop.f32.mrb[13].mxu0 }
  0xfb   :  { %v186_v13 = vadd.f32 %v642_v31, %v185_v12  ;;  %v495_v14 = vpop.f32.mrb[14].mxu0  ;;  %512 = vmatprep.mubr.msk.bf16.mxu1 %vm216_vm1, %v237_v9 }
  0xfc   :  { %v214_v15 = vmax.f32 %v194_v11, 0.0  ;;  %v197_v16 = vadd.f32 %v495_v14, %v642_v31  ;;  %v188_v17 = vpop.f32.mrb[15].mxu0  ;;  %513 = vmatmul.mubr.msk.bf16.gmra.mrb[8].mxu1 %vm216_vm1, %v238_v8 }
  0xfd   :  { %v212_v18 = vmax.f32 %v186_v13, 0.0  ;;  %v189_v19 = vadd.f32 %v642_v31, %v188_v17 }
  0xfe   :  { %231 = vst.msk [vmem:[%s803_s5 + $0x70] sm:$0xff] %vm216_vm1, %v214_v15  ;;  %v215_v20 = vmax.f32 %v197_v16, 0.0 }
  0xff   :  { %229 = vst.msk [vmem:[%s803_s5 + $0x60] sm:$0xff] %vm216_vm1, %v212_v18  ;;  %v213_v21 = vmax.f32 %v189_v19, 0.0 }
 0x100   :  { %232 = vst.msk [vmem:[%s803_s5 + $0x78] sm:$0xff] %vm216_vm1, %v215_v20  ;;  %v240_v22 = vpack.c.bf16 %v215_v20, %v214_v15 }
 0x101   :  { %230 = vst.msk [vmem:[%s803_s5 + $0x68] sm:$0xff] %vm216_vm1, %v213_v21  ;;  %v239_v23 = vpack.c.bf16 %v213_v21, %v212_v18 }
 0x103   :  { %516 = vmatprep.mubr.msk.bf16.mxu1 %vm216_vm1, %v239_v23 }
 0x104   :  { %517 = vmatmul.mubr.msk.bf16.gmra.mrb[12].mxu1 %vm216_vm1, %v240_v22 }
 0x1bf   :  { %v506_v25 = vpop.f32.mrb[0].mxu1 }
 0x1c0   :  { %v347_v26 = vadd.f32 %v506_v25, %v438_v24  ;;  %v338_v27 = vpop.f32.mrb[1].mxu1 }
 0x1c1   :  { %v339_v28 = vadd.f32 %v438_v24, %v338_v27  ;;  %v507_v29 = vpop.f32.mrb[2].mxu1 }
 0x1c2   :  { %404 = vst.msk [vmem:[%s805_s6 + $0x10] sm:$0xff] %vm401_vm2, %v347_v26  ;;  %v350_v30 = vadd.f32 %v507_v29, %v438_v24  ;;  %v341_v31 = vpop.f32.mrb[3].mxu1 }
 0x1c3   :  { %402 = vst.msk [vmem:[%s805_s6] sm:$0xff] %vm401_vm2, %v339_v28  ;;  %v342_v32 = vadd.f32 %v438_v24, %v341_v31 }
 0x1c4   :  { %405 = vst.msk [vmem:[%s805_s6 + $0x18] sm:$0xff] %vm401_vm2, %v350_v30 }
 0x1c5   :  { %403 = vst.msk [vmem:[%s805_s6 + $0x8] sm:$0xff] %vm401_vm2, %v342_v32 }
 0x1c7   :  { %v510_v33 = vpop.f32.mrb[4].mxu1 }
 0x1c8   :  { %v363_v34 = vadd.f32 %v510_v33, %v438_v24  ;;  %v354_v35 = vpop.f32.mrb[5].mxu1 }
 0x1c9   :  { %v355_v36 = vadd.f32 %v438_v24, %v354_v35  ;;  %v511_v37 = vpop.f32.mrb[6].mxu1 }
 0x1ca   :  { %408 = vst.msk [vmem:[%s805_s6 + $0x30] sm:$0xff] %vm401_vm2, %v363_v34  ;;  %v366_v38 = vadd.f32 %v511_v37, %v438_v24  ;;  %v357_v39 = vpop.f32.mrb[7].mxu1 }
 0x1cb   :  { %406 = vst.msk [vmem:[%s805_s6 + $0x20] sm:$0xff] %vm401_vm2, %v355_v36  ;;  %v358_v40 = vadd.f32 %v438_v24, %v357_v39 }
 0x1cc   :  { %409 = vst.msk [vmem:[%s805_s6 + $0x38] sm:$0xff] %vm401_vm2, %v366_v38 }
 0x1cd   :  { %407 = vst.msk [vmem:[%s805_s6 + $0x28] sm:$0xff] %vm401_vm2, %v358_v40 }
 0x1cf   :  { %v514_v41 = vpop.f32.mrb[8].mxu1 }
 0x1d0   :  { %v379_v42 = vadd.f32 %v514_v41, %v438_v24  ;;  %v370_v43 = vpop.f32.mrb[9].mxu1 }
 0x1d1   :  { %v371_v44 = vadd.f32 %v438_v24, %v370_v43  ;;  %v515_v45 = vpop.f32.mrb[10].mxu1 }
 0x1d2   :  { %412 = vst.msk [vmem:[%s805_s6 + $0x50] sm:$0xff] %vm401_vm2, %v379_v42  ;;  %v382_v46 = vadd.f32 %v515_v45, %v438_v24  ;;  %v373_v47 = vpop.f32.mrb[11].mxu1 }
 0x1d3   :  { %410 = vst.msk [vmem:[%s805_s6 + $0x40] sm:$0xff] %vm401_vm2, %v371_v44  ;;  %v374_v48 = vadd.f32 %v438_v24, %v373_v47 }
 0x1d4   :  { %413 = vst.msk [vmem:[%s805_s6 + $0x58] sm:$0xff] %vm401_vm2, %v382_v46 }
 0x1d5   :  { %411 = vst.msk [vmem:[%s805_s6 + $0x48] sm:$0xff] %vm401_vm2, %v374_v48 }
 0x1d7   :  { %v518_v49 = vpop.f32.mrb[12].mxu1 }
 0x1d8   :  { %v395_v50 = vadd.f32 %v518_v49, %v438_v24  ;;  %v386_v51 = vpop.f32.mrb[13].mxu1 }
 0x1d9   :  { %v387_v52 = vadd.f32 %v438_v24, %v386_v51  ;;  %v519_v53 = vpop.f32.mrb[14].mxu1 }
 0x1da   :  { %416 = vst.msk [vmem:[%s805_s6 + $0x70] sm:$0xff] %vm401_vm2, %v395_v50  ;;  %v398_v54 = vadd.f32 %v519_v53, %v438_v24  ;;  %v389_v55 = vpop.f32.mrb[15].mxu1 }
 0x1db   :  { %414 = vst.msk [vmem:[%s805_s6 + $0x60] sm:$0xff] %vm401_vm2, %v387_v52  ;;  %v390_v56 = vadd.f32 %v438_v24, %v389_v55 }
 0x1dc   :  { %417 = vst.msk [vmem:[%s805_s6 + $0x78] sm:$0xff] %vm401_vm2, %v398_v54 }
 0x1dd   :  { %415 = vst.msk [vmem:[%s805_s6 + $0x68] sm:$0xff] %vm401_vm2, %v390_v56 }

// kernel: all2cross_forward.11
= control target key start
LH: loop header
LB: loop body
LE: loop exit
PB: predicated region body
PF: predicated region fallthrough
CT: control target
= control target key end

     0   :  { %vm204_vm0 = vcmask 523264   ;;  %s348_s0 = inlined_call_operand.vmem [shape: f32[32,128], index: 0, kind: input, shape index: {}]   ;;  %s349_s3 = inlined_call_operand.vmem [shape: bf16[128,64], index: 3, kind: input, shape index: {}]   ;;  %s350_s1 = inlined_call_operand.vmem [shape: f32[1,128], index: 1, kind: input, shape index: {}]   ;;  %s351_s2 = inlined_call_operand.vmem [shape: f32[1,128], index: 2, kind: input, shape index: {}]   ;;  %s352_s4 = inlined_call_operand.vmem [shape: f32[32,64], index: 4, kind: output, shape index: {}]  }
   0x1   :  { %v18_v0 = vld [vmem:[%s348_s0] sm:$0xff]  ;;  %v20_v1 = vld [vmem:[%s348_s0 + $0x10] sm:$0xff]  ;;  %v19_v2 = vld [vmem:[%s348_s0 + $0x8] sm:$0xff] }
   0x2   :  { %24 = vadd.xlane.f32.xlu0 %v18_v0  ;;  %28 = vadd.xlane.f32.xlu1 %v20_v1  ;;  %v21_v3 = vld [vmem:[%s348_s0 + $0x18] sm:$0xff]  ;;  %v253_v4 = vld [vmem:[%s349_s3] sm:$0xff]   ;;  %v254_v21 = vld [vmem:[%s349_s3 + $0x8] sm:$0xff]  }
   0x3   :  { %233 = vmatprep.subr.bf16.mxu0 %v253_v4  ;;  %v255_v22 = vld [vmem:[%s349_s3 + $0x10] sm:$0xff]   ;;  %v256_v23 = vld [vmem:[%s349_s3 + $0x18] sm:$0xff]   ;;  %v257_v24 = vld [vmem:[%s349_s3 + $0x20] sm:$0xff]  }
   0x4   :  { %234 = vmatpush3.bf16.msra.mxu0 %v253_v4  ;;  %v258_v25 = vld [vmem:[%s349_s3 + $0x28] sm:$0xff]   ;;  %v259_v26 = vld [vmem:[%s349_s3 + $0x30] sm:$0xff]   ;;  %v260_v27 = vld [vmem:[%s349_s3 + $0x38] sm:$0xff]  }
   0x5   :  { %235 = vmatprep.subr.bf16.mxu0 %v254_v21  ;;  %v213_v42 = vld [vmem:[%s350_s1] ss:$0 sm:$0xff] }
   0x6   :  { %26 = vadd.xlane.f32.xlu0 %v19_v2  ;;  %30 = vadd.xlane.f32.xlu1 %v21_v3  ;;  %v214_v47 = vld [vmem:[%s351_s2] ss:$0 sm:$0xff] }
   0x8   :  { %236 = vmatpush3.bf16.msra.mxu0 %v254_v21 }
   0x9   :  { %237 = vmatprep.subr.bf16.mxu0 %v255_v22 }
   0xc   :  { %238 = vmatpush3.bf16.msra.mxu0 %v255_v22 }
   0xd   :  { %239 = vmatprep.subr.bf16.mxu0 %v256_v23 }
  0x10   :  { %240 = vmatpush3.bf16.msra.mxu0 %v256_v23 }
  0x11   :  { %241 = vmatprep.subr.bf16.mxu0 %v257_v24 }
  0x14   :  { %242 = vmatpush3.bf16.msra.mxu0 %v257_v24 }
  0x15   :  { %243 = vmatprep.subr.bf16.mxu0 %v258_v25 }
  0x18   :  { %244 = vmatpush3.bf16.msra.mxu0 %v258_v25 }
  0x19   :  { %245 = vmatprep.subr.bf16.mxu0 %v259_v26 }
  0x1c   :  { %246 = vmatpush3.bf16.msra.mxu0 %v259_v26 }
  0x1d   :  { %247 = vmatprep.subr.bf16.mxu0 %v260_v27 }
  0x20   :  { %248 = vmatpush3.bf16.msra.mxu0 %v260_v27 }
  0x8f   :  { %v25_v5 = vpop.xlane.xlu0 %24  ;;  %v29_v6 = vpop.xlane.xlu1 %28 }
  0x90   :  { %v33_v7 = vmul.f32 0.0078125, %v25_v5  ;;  %v35_v8 = vmul.f32 0.0078125, %v29_v6 }
  0x92   :  { %v37_v9 = vsub.f32 %v18_v0, %v33_v7  ;;  %v39_v10 = vsub.f32 %v20_v1, %v35_v8 }
  0x93   :  { %v27_v11 = vpop.xlane.xlu0 %26  ;;  %v31_v12 = vpop.xlane.xlu1 %30 }
  0x94   :  { %v34_v13 = vmul.f32 0.0078125, %v27_v11  ;;  %v41_v14 = vmul.f32 %v37_v9, %v37_v9  ;;  %v36_v15 = vmul.f32 0.0078125, %v31_v12  ;;  %v43_v18 = vmul.f32 %v39_v10, %v39_v10 }
  0x96   :  { %v38_v16 = vsub.f32 %v19_v2, %v34_v13  ;;  %45 = vadd.xlane.f32.xlu0 %v41_v14  ;;  %v40_v17 = vsub.f32 %v21_v3, %v36_v15 }
  0x98   :  { %v42_v19 = vmul.f32 %v38_v16, %v38_v16  ;;  %v44_v20 = vmul.f32 %v40_v17, %v40_v17 }
  0x9a   :  { %49 = vadd.xlane.f32.xlu0 %v43_v18  ;;  %47 = vadd.xlane.f32.xlu1 %v42_v19 }
  0x9e   :  { %51 = vadd.xlane.f32.xlu1 %v44_v20 }
 0x123   :  { %v46_v28 = vpop.xlane.xlu0 %45 }
 0x124   :  { %v53_v29 = vmul.f32 0.0078125, %v46_v28 }
 0x126   :  { %v57_v30 = vadd.f32 1e-05, %v53_v29 }
 0x127   :  { %v48_v31 = vpop.xlane.xlu1 %47  ;;  %v50_v32 = vpop.xlane.xlu0 %49 }
 0x128   :  { %261 = vrsqrt.f32 %v57_v30  ;;  %v54_v33 = vmul.f32 0.0078125, %v48_v31  ;;  %v55_v34 = vmul.f32 0.0078125, %v50_v32 }
 0x12a   :  { %v58_v35 = vadd.f32 1e-05, %v54_v33  ;;  %v59_v36 = vadd.f32 1e-05, %v55_v34 }
 0x12b   :  { %v52_v37 = vpop.xlane.xlu1 %51 }
 0x12c   :  { %263 = vrsqrt.f32 %v58_v35  ;;  %v56_v38 = vmul.f32 0.0078125, %v52_v37 }
 0x12d   :  { %265 = vrsqrt.f32 %v59_v36 }
 0x12e   :  { %v60_v39 = vadd.f32 1e-05, %v56_v38 }
 0x130   :  { %267 = vrsqrt.f32 %v60_v39 }
 0x132   :  { %v262_v40 = vpop.eup %261 }
 0x133   :  { %v65_v41 = vmul.f32 %v262_v40, %v37_v9 }
 0x135   :  { %v75_v46 = vmul.f32 %v213_v42, %v65_v41 }
 0x136   :  { %v264_v43 = vpop.eup %263 }
 0x137   :  { %v266_v44 = vpop.eup %265  ;;  %v66_v45 = vmul.f32 %v264_v43, %v38_v16  ;;  %v85_v51 = vadd.f32 %v214_v47, %v75_v46 }
 0x138   :  { %v67_v48 = vmul.f32 %v266_v44, %v39_v10 }
 0x139   :  { %v76_v49 = vmul.f32 %v213_v42, %v66_v45 }
 0x13a   :  { %v268_v50 = vpop.eup %267  ;;  %v77_v54 = vmul.f32 %v213_v42, %v67_v48 }
 0x13b   :  { %v86_v52 = vadd.f32 %v214_v47, %v76_v49  ;;  %v68_v53 = vmul.f32 %v268_v50, %v40_v17 }
 0x13c   :  { %v87_v57 = vadd.f32 %v214_v47, %v77_v54 }
 0x13d   :  { %v89_v55 = vpack.c.bf16 %v86_v52, %v85_v51  ;;  %v78_v56 = vmul.f32 %v213_v42, %v68_v53 }
 0x13f   :  { %249 = vmatprep.mubr.bf16.mxu0 %v89_v55  ;;  %v88_v58 = vadd.f32 %v214_v47, %v78_v56 }
 0x141   :  { %v90_v59 = vpack.c.bf16 %v88_v58, %v87_v57 }
 0x143   :  { %250 = vmatmul.mubr.bf16.vlgmr.msra.gmra.mrb[0].mxu0 %v90_v59 }
 0x216   :  { %v251_v60 = vpop.f32.mrb[0].mxu0 }
 0x217   :  { %207 = vst.msk [vmem:[%s352_s4 + $0x10] sm:$0xff] %vm204_vm0, %v251_v60  ;;  %v189_v61 = vpop.f32.mrb[1].mxu0 }
 0x218   :  { %205 = vst.msk [vmem:[%s352_s4] sm:$0xff] %vm204_vm0, %v189_v61  ;;  %v252_v62 = vpop.f32.mrb[2].mxu0 }
 0x219   :  { %208 = vst.msk [vmem:[%s352_s4 + $0x18] sm:$0xff] %vm204_vm0, %v252_v62  ;;  %v192_v63 = vpop.f32.mrb[3].mxu0 }
 0x21a   :  { %206 = vst.msk [vmem:[%s352_s4 + $0x8] sm:$0xff] %vm204_vm0, %v192_v63 }

// kernel: all2cross_forward.12
= control target key start
LH: loop header
LB: loop body
LE: loop exit
PB: predicated region body
PF: predicated region fallthrough
CT: control target
= control target key end

     0   :  { %vm360_vm0 = vcmask 523264   ;;  %s659_s1 = inlined_call_operand.vmem [shape: bf16[256,128], index: 1, kind: input, shape index: {}]   ;;  %s660_s0 = inlined_call_operand.vmem [shape: f32[32,256], index: 0, kind: input, shape index: {}]   ;;  %s661_s3 = inlined_call_operand.vmem [shape: bf16[128,64], index: 3, kind: input, shape index: {}]   ;;  %s662_s2 = inlined_call_operand.vmem [shape: f32[1,128], index: 2, kind: input, shape index: {}]   ;;  %s663_s6 = inlined_call_operand.vmem [shape: f32[32,128], index: 6, kind: output, shape index: {0}]   ;;  %s664_s4 = inlined_call_operand.vmem [shape: f32[1,64], index: 4, kind: input, shape index: {}]   ;;  %s665_s5 = inlined_call_operand.vmem [shape: f32[32,64], index: 5, kind: input, shape index: {}]   ;;  %s666_s7 = inlined_call_operand.vmem [shape: f32[32,64], index: 7, kind: output, shape index: {1}]  }
   0x1   :  { %v457_v0 = vld [vmem:[%s659_s1 + $0x40] sm:$0xff]   ;;  %v459_v2 = vld [vmem:[%s659_s1 + $0x48] sm:$0xff]   ;;  %v461_v4 = vld [vmem:[%s659_s1 + $0x50] sm:$0xff]  }
   0x2   :  { %v458_v1 = vld [vmem:[%s659_s1] sm:$0xff]   ;;  %399 = vmatprep.subr.bf16.mxu0 %v457_v0  ;;  %v460_v3 = vld [vmem:[%s659_s1 + $0x8] sm:$0xff]   ;;  %v462_v5 = vld [vmem:[%s659_s1 + $0x10] sm:$0xff]  }
   0x3   :  { %400 = vmatpush3.bf16.msra.mxu0 %v458_v1  ;;  %v463_v6 = vld [vmem:[%s659_s1 + $0x58] sm:$0xff]   ;;  %v465_v8 = vld [vmem:[%s659_s1 + $0x60] sm:$0xff]   ;;  %v467_v10 = vld [vmem:[%s659_s1 + $0x68] sm:$0xff]  }
   0x4   :  { %401 = vmatprep.subr.bf16.mxu0 %v459_v2  ;;  %v464_v7 = vld [vmem:[%s659_s1 + $0x18] sm:$0xff]   ;;  %v466_v9 = vld [vmem:[%s659_s1 + $0x20] sm:$0xff]   ;;  %v27_v11 = vld [vmem:[%s660_s0 + $0x8] sm:$0xff] }
   0x5   :  { %v29_v12 = vld [vmem:[%s660_s0 + $0x18] sm:$0xff]  ;;  %v468_v14 = vld [vmem:[%s659_s1 + $0x28] sm:$0xff]   ;;  %v469_v15 = vld [vmem:[%s659_s1 + $0x70] sm:$0xff]  }
   0x6   :  { %v35_v13 = vpack.c.bf16 %v29_v12, %v27_v11  ;;  %v473_v16 = vld [vmem:[%s661_s3] sm:$0xff]   ;;  %v474_v17 = vld [vmem:[%s661_s3 + $0x8] sm:$0xff]   ;;  %v470_v18 = vld [vmem:[%s659_s1 + $0x30] sm:$0xff]  }
   0x7   :  { %402 = vmatpush3.bf16.msra.mxu0 %v460_v3  ;;  %437 = vmatprep.subr.bf16.mxu1 %v473_v16  ;;  %v475_v19 = vld [vmem:[%s661_s3 + $0x10] sm:$0xff]   ;;  %v471_v20 = vld [vmem:[%s659_s1 + $0x78] sm:$0xff]   ;;  %v26_v22 = vld [vmem:[%s660_s0] sm:$0xff] }
   0x8   :  { %403 = vmatprep.subr.bf16.mxu0 %v461_v4  ;;  %205 = vmatprep.mubr.bf16.mxu0 %v35_v13  ;;  %v472_v21 = vld [vmem:[%s659_s1 + $0x38] sm:$0xff]   ;;  %v28_v23 = vld [vmem:[%s660_s0 + $0x10] sm:$0xff]  ;;  %v31_v24 = vld [vmem:[%s660_s0 + $0x28] sm:$0xff] }
   0x9   :  { %438 = vmatpush3.bf16.msra.mxu1 %v473_v16  ;;  %v33_v25 = vld [vmem:[%s660_s0 + $0x38] sm:$0xff]  ;;  %v34_v26 = vpack.c.bf16 %v28_v23, %v26_v22  ;;  %v30_v28 = vld [vmem:[%s660_s0 + $0x20] sm:$0xff]  ;;  %v32_v29 = vld [vmem:[%s660_s0 + $0x30] sm:$0xff] }
   0xa   :  { %439 = vmatprep.subr.bf16.mxu1 %v474_v17  ;;  %v37_v27 = vpack.c.bf16 %v33_v25, %v31_v24  ;;  %v36_v30 = vpack.c.bf16 %v32_v29, %v30_v28  ;;  %v476_v31 = vld [vmem:[%s661_s3 + $0x18] sm:$0xff]   ;;  %v477_v32 = vld [vmem:[%s661_s3 + $0x20] sm:$0xff]   ;;  %v478_v33 = vld [vmem:[%s661_s3 + $0x28] sm:$0xff]  }
   0xb   :  { %404 = vmatpush3.bf16.msra.mxu0 %v462_v5  ;;  %v479_v34 = vld [vmem:[%s661_s3 + $0x30] sm:$0xff]   ;;  %v480_v35 = vld [vmem:[%s661_s3 + $0x38] sm:$0xff]   ;;  %v373_v38 = vld [vmem:[%s662_s2] ss:$0 sm:$0xff] }
   0xc   :  { %405 = vmatprep.subr.bf16.mxu0 %v463_v6  ;;  %v390_v59 = vld [vmem:[%s664_s4] ss:$0 sm:$0xff]  ;;  %v354_v61 = vld [vmem:[%s665_s5 + $0x10] sm:$0xff]  ;;  %v355_v3 = vld [vmem:[%s665_s5 + $0x18] sm:$0xff] }
   0xd   :  { %440 = vmatpush3.bf16.msra.mxu1 %v474_v17  ;;  %v352_v0 = vld [vmem:[%s665_s5] sm:$0xff] }
   0xe   :  { %441 = vmatprep.subr.bf16.mxu1 %v475_v19 }
   0xf   :  { %406 = vmatpush3.bf16.msra.mxu0 %v464_v7  ;;  %v353_v7 = vld [vmem:[%s665_s5 + $0x8] sm:$0xff] }
  0x10   :  { %407 = vmatprep.subr.bf16.mxu0 %v465_v8 }
  0x11   :  { %442 = vmatpush3.bf16.msra.mxu1 %v475_v19 }
  0x12   :  { %443 = vmatprep.subr.bf16.mxu1 %v476_v31 }
  0x13   :  { %408 = vmatpush3.bf16.msra.mxu0 %v466_v9 }
  0x14   :  { %409 = vmatprep.subr.bf16.mxu0 %v467_v10 }
  0x15   :  { %444 = vmatpush3.bf16.msra.mxu1 %v476_v31 }
  0x16   :  { %445 = vmatprep.subr.bf16.mxu1 %v477_v32 }
  0x17   :  { %410 = vmatpush3.bf16.msra.mxu0 %v468_v14 }
  0x18   :  { %411 = vmatprep.subr.bf16.mxu0 %v469_v15 }
  0x19   :  { %446 = vmatpush3.bf16.msra.mxu1 %v477_v32 }
  0x1a   :  { %447 = vmatprep.subr.bf16.mxu1 %v478_v33 }
  0x1b   :  { %412 = vmatpush3.bf16.msra.mxu0 %v470_v18 }
  0x1c   :  { %413 = vmatprep.subr.bf16.mxu0 %v471_v20 }
  0x1d   :  { %448 = vmatpush3.bf16.msra.mxu1 %v478_v33 }
  0x1e   :  { %449 = vmatprep.subr.bf16.mxu1 %v479_v34 }
  0x1f   :  { %414 = vmatpush3.bf16.msra.mxu0 %v472_v21 }
  0x21   :  { %450 = vmatpush3.bf16.msra.mxu1 %v479_v34 }
  0x22   :  { %206 = vmatmul.mubr.bf16.vlgmr.msra.gmra.mrb[0].mxu0 %v34_v26  ;;  %451 = vmatprep.subr.bf16.mxu1 %v480_v35 }
  0x23   :  { %213 = vmatprep.mubr.bf16.mxu0 %v37_v27 }
  0x25   :  { %452 = vmatpush3.bf16.msra.mxu1 %v480_v35 }
  0x2a   :  { %214 = vmatmul.mubr.bf16.gmra.mrb[4].mxu0 %v36_v30 }
  0xf5   :  { %v415_v36 = vpop.f32.mrb[0].mxu0 }
  0xf6   :  { %v416_v37 = vpop.f32.mrb[1].mxu0 }
  0xf7   :  { %v417_v39 = vadd.f32 %v416_v37, %v415_v36  ;;  %v418_v40 = vpop.f32.mrb[2].mxu0 }
  0xf8   :  { %v419_v41 = vpop.f32.mrb[3].mxu0 }
  0xf9   :  { %v420_v42 = vadd.f32 %v419_v41, %v418_v40  ;;  %v208_v43 = vadd.f32 %v417_v39, %v373_v38 }
  0xfb   :  { %v211_v44 = vadd.f32 %v420_v42, %v373_v38  ;;  %v222_v45 = vmax.f32 %v208_v43, 0.0 }
  0xfd   :  { %v421_v46 = vpop.f32.mrb[4].mxu0  ;;  %v223_v47 = vmax.f32 %v211_v44, 0.0  ;;  %226 = vst [vmem:[%s663_s6] sm:$0xff] %v222_v45 }
  0xfe   :  { %v422_v48 = vpop.f32.mrb[5].mxu0 }
  0xff   :  { %v423_v49 = vadd.f32 %v422_v48, %v421_v46  ;;  %v424_v50 = vpop.f32.mrb[6].mxu0  ;;  %227 = vst [vmem:[%s663_s6 + $0x8] sm:$0xff] %v223_v47  ;;  %v230_v51 = vpack.c.bf16 %v223_v47, %v222_v45 }
 0x100   :  { %v425_v52 = vpop.f32.mrb[7].mxu0 }
 0x101   :  { %v216_v53 = vadd.f32 %v423_v49, %v373_v38  ;;  %v426_v54 = vadd.f32 %v425_v52, %v424_v50  ;;  %453 = vmatprep.mubr.bf16.mxu1 %v230_v51 }
 0x103   :  { %v224_v55 = vmax.f32 %v216_v53, 0.0  ;;  %v219_v56 = vadd.f32 %v426_v54, %v373_v38 }
 0x105   :  { %228 = vst [vmem:[%s663_s6 + $0x10] sm:$0xff] %v224_v55  ;;  %v225_v57 = vmax.f32 %v219_v56, 0.0 }
 0x107   :  { %229 = vst [vmem:[%s663_s6 + $0x18] sm:$0xff] %v225_v57  ;;  %v231_v58 = vpack.c.bf16 %v225_v57, %v224_v55 }
 0x109   :  { %454 = vmatmul.mubr.bf16.vlgmr.msra.gmra.mrb[0].mxu1 %v231_v58 }
 0x1dc   :  { %v455_v60 = vpop.f32.mrb[0].mxu1 }
 0x1dd   :  { %v346_v62 = vadd.f32 %v455_v60, %v390_v59  ;;  %v337_v63 = vpop.f32.mrb[1].mxu1 }
 0x1de   :  { %v338_v1 = vadd.f32 %v390_v59, %v337_v63  ;;  %v456_v2 = vpop.f32.mrb[2].mxu1 }
 0x1df   :  { %v358_v4 = vadd.f32 %v354_v61, %v346_v62  ;;  %v349_v5 = vadd.f32 %v456_v2, %v390_v59  ;;  %v340_v6 = vpop.f32.mrb[3].mxu1 }
 0x1e0   :  { %v356_v8 = vadd.f32 %v352_v0, %v338_v1  ;;  %v341_v9 = vadd.f32 %v390_v59, %v340_v6 }
 0x1e1   :  { %363 = vst.msk [vmem:[%s666_s7 + $0x10] sm:$0xff] %vm360_vm0, %v358_v4  ;;  %v359_v10 = vadd.f32 %v355_v3, %v349_v5 }
 0x1e2   :  { %361 = vst.msk [vmem:[%s666_s7] sm:$0xff] %vm360_vm0, %v356_v8  ;;  %v357_v11 = vadd.f32 %v353_v7, %v341_v9 }
 0x1e3   :  { %364 = vst.msk [vmem:[%s666_s7 + $0x18] sm:$0xff] %vm360_vm0, %v359_v10 }
 0x1e4   :  { %362 = vst.msk [vmem:[%s666_s7 + $0x8] sm:$0xff] %vm360_vm0, %v357_v11 }

// kernel: all2cross_forward.15
= control target key start
LH: loop header
LB: loop body
LE: loop exit
PB: predicated region body
PF: predicated region fallthrough
CT: control target
= control target key end

     0   :  { %vm18_vm0 = vcmask 1043456   ;;  %s135_s0 = inlined_call_operand.vmem [shape: f32[2,4,128], index: 0, kind: input, shape index: {}]   ;;  %s136_s1 = inlined_call_operand.vmem [shape: f32[1,1,128], index: 1, kind: input, shape index: {}]   ;;  %s137_s2 = inlined_call_operand.vmem [shape: f32[1,1,128], index: 2, kind: input, shape index: {}]   ;;  %s138_s3 = inlined_call_operand.vmem [shape: f32[2,1,128], index: 3, kind: output, shape index: {}]  }
   0x1   :  { %v14_v0 = vld [vmem:[%s135_s0] sm:$0xf]  ;;  %v15_v1 = vld [vmem:[%s135_s0 + $0x4] sm:$0xf] }
   0x2   :  { %v19_v2 = vsel %vm18_vm0, %v14_v0, 0.0  ;;  %v22_v3 = vsel %vm18_vm0, %v15_v1, 0.0  ;;  %v85_v21 = vld [vmem:[%s136_s1] ss:$0 sm:$0xff] }
   0x3   :  { %20 = vadd.xlane.f32.xlu0 %v19_v2  ;;  %v86_v23 = vld [vmem:[%s137_s2] ss:$0 sm:$0xff] }
   0x7   :  { %23 = vadd.xlane.f32.xlu0 %v22_v3 }
  0x90   :  { %v21_v4 = vpop.xlane.xlu0 %20 }
  0x91   :  { %v26_v5 = vmul.f32 0.0078125, %v21_v4 }
  0x93   :  { %v28_v6 = vsub.f32 %v14_v0, %v26_v5 }
  0x94   :  { %v24_v7 = vpop.xlane.xlu0 %23 }
  0x95   :  { %v27_v8 = vmul.f32 0.0078125, %v24_v7  ;;  %v30_v9 = vmul.f32 %v28_v6, %v28_v6 }
  0x97   :  { %v29_v10 = vsub.f32 %v15_v1, %v27_v8  ;;  %v32_v11 = vsel %vm18_vm0, %v30_v9, 0.0 }
  0x98   :  { %33 = vadd.xlane.f32.xlu1 %v32_v11 }
  0x99   :  { %v31_v12 = vmul.f32 %v29_v10, %v29_v10 }
  0x9b   :  { %v35_v13 = vsel %vm18_vm0, %v31_v12, 0.0 }
  0x9c   :  { %36 = vadd.xlane.f32.xlu1 %v35_v13 }
 0x125   :  { %v34_v14 = vpop.xlane.xlu1 %33 }
 0x126   :  { %v38_v15 = vmul.f32 0.0078125, %v34_v14 }
 0x128   :  { %v40_v16 = vadd.f32 1e-05, %v38_v15 }
 0x129   :  { %v37_v17 = vpop.xlane.xlu1 %36 }
 0x12a   :  { %87 = vrsqrt.f32 %v40_v16  ;;  %v39_v18 = vmul.f32 0.0078125, %v37_v17 }
 0x12c   :  { %v41_v19 = vadd.f32 1e-05, %v39_v18 }
 0x12e   :  { %89 = vrsqrt.f32 %v41_v19 }
 0x134   :  { %v88_v20 = vpop.eup %87 }
 0x135   :  { %v44_v22 = vmul.f32 %v88_v20, %v28_v6 }
 0x137   :  { %v52_v24 = vmul.f32 %v85_v21, %v44_v22 }
 0x138   :  { %v90_v25 = vpop.eup %89 }
 0x139   :  { %v60_v26 = vadd.f32 %v86_v23, %v52_v24  ;;  %v45_v27 = vmul.f32 %v90_v25, %v29_v10 }
 0x13b   :  { %v62_v28 = vsel %vm18_vm0, %v60_v26, 0.0  ;;  %v53_v29 = vmul.f32 %v85_v21, %v45_v27 }
 0x13c   :  { %v63_v30 = vrot.slane %v62_v28, 4 }
 0x13d   :  { %v61_v31 = vadd.f32 %v86_v23, %v53_v29 }
 0x13e   :  { %v64_v32 = vadd.f32 %v63_v30, %v62_v28 }
 0x13f   :  { %v69_v33 = vsel %vm18_vm0, %v61_v31, 0.0 }
 0x140   :  { %v65_v34 = vrot.slane %v64_v32, 2  ;;  %v70_v35 = vrot.slane %v69_v33, 4 }
 0x142   :  { %v66_v36 = vadd.f32 %v65_v34, %v64_v32  ;;  %v71_v37 = vadd.f32 %v70_v35, %v69_v33 }
 0x144   :  { %v67_v38 = vrot.slane %v66_v36, 1  ;;  %v72_v39 = vrot.slane %v71_v37, 2 }
 0x146   :  { %v68_v40 = vadd.f32 %v67_v38, %v66_v36  ;;  %v73_v41 = vadd.f32 %v72_v39, %v71_v37 }
 0x148   :  { %v77_v42 = vmul.f32 0.25, %v68_v40  ;;  %v74_v43 = vrot.slane %v73_v41, 1 }
 0x14a   :  { %79 = vst [vmem:[%s138_s3] sm:$0x1] %v77_v42  ;;  %v75_v44 = vadd.f32 %v74_v43, %v73_v41 }
 0x14c   :  { %v78_v45 = vmul.f32 0.25, %v75_v44 }
 0x14e   :  { %80 = vst [vmem:[%s138_s3 + $0x1] sm:$0x1] %v78_v45 }

// kernel: all2cross_forward.13
= control target key start
LH: loop header
LB: loop body
LE: loop exit
PB: predicated region body
PF: predicated region fallthrough
CT: control target
= control target key end

     0   :  { %v40_v28 = vlaneseq  ;;  %s384_s0 = inlined_call_operand.vmem [shape: f32[8,256], index: 0, kind: input, shape index: {}]   ;;  %s385_s3 = inlined_call_operand.vmem [shape: bf16[256,128], index: 3, kind: input, shape index: {}]   ;;  %s386_s1 = inlined_call_operand.vmem [shape: f32[1,256], index: 1, kind: input, shape index: {}]   ;;  %s387_s2 = inlined_call_operand.vmem [shape: f32[1,256], index: 2, kind: input, shape index: {}]   ;;  %s388_s4 = inlined_call_operand.vmem [shape: f32[8,128], index: 4, kind: output, shape index: {}]  }
   0x1   :  { %v18_v0 = vld [vmem:[%s384_s0] sm:$0xff]  ;;  %v19_v1 = vld [vmem:[%s384_s0 + $0x8] sm:$0xff]  ;;  %v282_v14 = vld [vmem:[%s385_s3 + $0x50] sm:$0xff]  }
   0x2   :  { %v22_v2 = vadd.f32 %v19_v1, %v18_v0  ;;  %v278_v3 = vld [vmem:[%s385_s3 + $0x40] sm:$0xff]   ;;  %v280_v5 = vld [vmem:[%s385_s3 + $0x48] sm:$0xff]   ;;  %v283_v15 = vld [vmem:[%s385_s3 + $0x10] sm:$0xff]   ;;  %v41_v30 = vshrl.u32 %v40_v28, 7 }
   0x3   :  { %v279_v4 = vld [vmem:[%s385_s3] sm:$0xff]   ;;  %256 = vmatprep.subr.bf16.mxu0 %v278_v3  ;;  %v281_v6 = vld [vmem:[%s385_s3 + $0x8] sm:$0xff]   ;;  %v284_v16 = vld [vmem:[%s385_s3 + $0x58] sm:$0xff]  }
   0x4   :  { %23 = vadd.xlane.f32.xlu0 %v22_v2  ;;  %257 = vmatpush3.bf16.msra.mxu0 %v279_v4  ;;  %v285_v17 = vld [vmem:[%s385_s3 + $0x18] sm:$0xff]   ;;  %v286_v18 = vld [vmem:[%s385_s3 + $0x60] sm:$0xff]   ;;  %v288_v20 = vld [vmem:[%s385_s3 + $0x68] sm:$0xff]   ;;  %v42_v31 = vsub.s32 0, %v41_v30  ;;  %v46_v32 = vsub.s32 1, %v41_v30 }
   0x5   :  { %258 = vmatprep.subr.bf16.mxu0 %v280_v5  ;;  %v287_v19 = vld [vmem:[%s385_s3 + $0x20] sm:$0xff]   ;;  %v289_v21 = vld [vmem:[%s385_s3 + $0x28] sm:$0xff]   ;;  %v290_v22 = vld [vmem:[%s385_s3 + $0x70] sm:$0xff]  }
   0x6   :  { %v291_v23 = vld [vmem:[%s385_s3 + $0x30] sm:$0xff]   ;;  %v292_v24 = vld [vmem:[%s385_s3 + $0x78] sm:$0xff]   ;;  %v20_v33 = vld [vmem:[%s386_s1] sm:$0x3] }
   0x7   :  { %v293_v25 = vld [vmem:[%s385_s3 + $0x38] sm:$0xff]   ;;  %v21_v34 = vld [vmem:[%s387_s2] sm:$0x3]  ;;  %v43_v35 = vrot.slane %v20_v33, %v42_v31  ;;  %v47_v36 = vrot.slane %v20_v33, %v46_v32 }
   0x8   :  { %259 = vmatpush3.bf16.msra.mxu0 %v281_v6  ;;  %v56_v39 = vrot.slane %v21_v34, %v42_v31  ;;  %v60_v40 = vrot.slane %v21_v34, %v46_v32 }
   0x9   :  { %260 = vmatprep.subr.bf16.mxu0 %v282_v14 }
   0xc   :  { %261 = vmatpush3.bf16.msra.mxu0 %v283_v15 }
   0xd   :  { %262 = vmatprep.subr.bf16.mxu0 %v284_v16 }
  0x10   :  { %263 = vmatpush3.bf16.msra.mxu0 %v285_v17 }
  0x11   :  { %264 = vmatprep.subr.bf16.mxu0 %v286_v18 }
  0x14   :  { %265 = vmatpush3.bf16.msra.mxu0 %v287_v19 }
  0x15   :  { %266 = vmatprep.subr.bf16.mxu0 %v288_v20 }
  0x18   :  { %267 = vmatpush3.bf16.msra.mxu0 %v289_v21 }
  0x19   :  { %268 = vmatprep.subr.bf16.mxu0 %v290_v22 }
  0x1c   :  { %269 = vmatpush3.bf16.msra.mxu0 %v291_v23 }
  0x1d   :  { %270 = vmatprep.subr.bf16.mxu0 %v292_v24 }
  0x20   :  { %271 = vmatpush3.bf16.msra.mxu0 %v293_v25 }
  0x91   :  { %v24_v7 = vpop.xlane.xlu0 %23 }
  0x92   :  { %v26_v8 = vmul.f32 0.00390625, %v24_v7 }
  0x94   :  { %v27_v9 = vsub.f32 %v18_v0, %v26_v8  ;;  %v28_v10 = vsub.f32 %v19_v1, %v26_v8 }
  0x96   :  { %v29_v11 = vmul.f32 %v27_v9, %v27_v9  ;;  %v30_v12 = vmul.f32 %v28_v10, %v28_v10 }
  0x98   :  { %v31_v13 = vadd.f32 %v30_v12, %v29_v11 }
  0x9a   :  { %32 = vadd.xlane.f32.xlu0 %v31_v13 }
 0x127   :  { %v33_v26 = vpop.xlane.xlu0 %32 }
 0x128   :  { %v34_v27 = vmul.f32 0.00390625, %v33_v26 }
 0x12a   :  { %v35_v29 = vadd.f32 1e-05, %v34_v27 }
 0x12c   :  { %294 = vrsqrt.f32 %v35_v29 }
 0x136   :  { %v295_v37 = vpop.eup %294 }
 0x137   :  { %v38_v38 = vmul.f32 %v295_v37, %v28_v10  ;;  %v37_v41 = vmul.f32 %v295_v37, %v27_v9 }
 0x139   :  { %v51_v42 = vmul.f32 %v47_v36, %v38_v38  ;;  %v50_v43 = vmul.f32 %v43_v35, %v37_v41 }
 0x13b   :  { %v64_v44 = vadd.f32 %v60_v40, %v51_v42  ;;  %v63_v45 = vadd.f32 %v56_v39, %v50_v43 }
 0x13d   :  { %v66_v46 = vpack.c.bf16 %v64_v44, %v64_v44  ;;  %v65_v47 = vpack.c.bf16 %v63_v45, %v63_v45 }
 0x13f   :  { %227 = vmatprep.mubr.bf16.mxu0 %v66_v46 }
 0x140   :  { %228 = vmatmul.mubr.bf16.vlgmr.msra.gmra.mrb[0].mxu0 %v65_v47 }
 0x213   :  { %v272_v48 = vpop.f32.mrb[0].mxu0 }
 0x214   :  { %v273_v49 = vpop.f32.mrb[1].mxu0 }
 0x215   :  { %v274_v50 = vadd.f32 %v273_v49, %v272_v48  ;;  %v275_v51 = vpop.f32.mrb[2].mxu0 }
 0x216   :  { %v276_v52 = vpop.f32.mrb[3].mxu0 }
 0x217   :  { %235 = vst [vmem:[%s388_s4] sm:$0xff] %v274_v50 }

// kernel: all2cross_forward.14
= control target key start
LH: loop header
LB: loop body
LE: loop exit
PB: predicated region body
PF: predicated region fallthrough
CT: control target
= control target key end

     0   :  { %s1214_s1 = inlined_call_operand.vmem [shape: bf16[512,256], index: 1, kind: input, shape index: {}]   ;;  %s1215_s0 = inlined_call_operand.vmem [shape: f32[8,512], index: 0, kind: input, shape index: {}]   ;;  %s1216_s3 = inlined_call_operand.vmem [shape: bf16[256,128], index: 3, kind: input, shape index: {}]   ;;  %s1217_s2 = inlined_call_operand.vmem [shape: f32[1,256], index: 2, kind: input, shape index: {}]   ;;  %s1218_s4 = inlined_call_operand.vmem [shape: f32[1,128], index: 4, kind: input, shape index: {}]   ;;  %s1219_s5 = inlined_call_operand.vmem [shape: f32[8,128], index: 5, kind: input, shape index: {}]   ;;  %s1220_s6 = inlined_call_operand.vmem [shape: f32[8,128], index: 6, kind: output, shape index: {}]  }
   0x1   :  { %v803_v0 = vld [vmem:[%s1214_s1 + $0x4] ss:$8 sps:$4 sm:$0xff]   ;;  %v807_v2 = vld [vmem:[%s1214_s1] ss:$8 sps:$4 sm:$0xff]   ;;  %v809_v4 = vld [vmem:[%s1214_s1 + $0x14] ss:$8 sps:$4 sm:$0xff]  }
   0x2   :  { %v805_v1 = vld [vmem:[%s1214_s1 + $0x104] ss:$8 sps:$4 sm:$0xff]   ;;  %428 = vmatprep.subr.bf16.mxu1 %v803_v0  ;;  %v808_v3 = vld [vmem:[%s1214_s1 + $0x100] ss:$8 sps:$4 sm:$0xff]   ;;  %v811_v5 = vld [vmem:[%s1214_s1 + $0x114] ss:$8 sps:$4 sm:$0xff]  }
   0x3   :  { %469 = vmatprep.subr.bf16.mxu0 %v805_v1  ;;  %429 = vmatpush1.bf16.msra.mxu1 %v807_v2  ;;  %v813_v6 = vld [vmem:[%s1214_s1 + $0x10] ss:$8 sps:$4 sm:$0xff]   ;;  %v815_v8 = vld [vmem:[%s1214_s1 + $0x24] ss:$8 sps:$4 sm:$0xff]   ;;  %v819_v10 = vld [vmem:[%s1214_s1 + $0x20] ss:$8 sps:$4 sm:$0xff]  }
   0x4   :  { %470 = vmatpush1.bf16.msra.mxu0 %v808_v3  ;;  %430 = vmatprep.subr.bf16.mxu1 %v809_v4  ;;  %v814_v7 = vld [vmem:[%s1214_s1 + $0x110] ss:$8 sps:$4 sm:$0xff]   ;;  %v817_v9 = vld [vmem:[%s1214_s1 + $0x124] ss:$8 sps:$4 sm:$0xff]   ;;  %v820_v11 = vld [vmem:[%s1214_s1 + $0x120] ss:$8 sps:$4 sm:$0xff]  }
   0x5   :  { %471 = vmatprep.subr.bf16.mxu0 %v811_v5  ;;  %v821_v12 = vld [vmem:[%s1214_s1 + $0x34] ss:$8 sps:$4 sm:$0xff]   ;;  %v825_v14 = vld [vmem:[%s1214_s1 + $0x30] ss:$8 sps:$4 sm:$0xff]   ;;  %v827_v16 = vld [vmem:[%s1214_s1 + $0x44] ss:$8 sps:$4 sm:$0xff]  }
   0x6   :  { %v823_v13 = vld [vmem:[%s1214_s1 + $0x134] ss:$8 sps:$4 sm:$0xff]   ;;  %v826_v15 = vld [vmem:[%s1214_s1 + $0x130] ss:$8 sps:$4 sm:$0xff]   ;;  %v829_v17 = vld [vmem:[%s1214_s1 + $0x144] ss:$8 sps:$4 sm:$0xff]  }
   0x7   :  { %431 = vmatpush1.bf16.msra.mxu1 %v813_v6  ;;  %v831_v18 = vld [vmem:[%s1214_s1 + $0x40] ss:$8 sps:$4 sm:$0xff]   ;;  %v833_v20 = vld [vmem:[%s1214_s1 + $0x54] ss:$8 sps:$4 sm:$0xff]   ;;  %v837_v22 = vld [vmem:[%s1214_s1 + $0x50] ss:$8 sps:$4 sm:$0xff]  }
   0x8   :  { %472 = vmatpush1.bf16.msra.mxu0 %v814_v7  ;;  %432 = vmatprep.subr.bf16.mxu1 %v815_v8  ;;  %v832_v19 = vld [vmem:[%s1214_s1 + $0x140] ss:$8 sps:$4 sm:$0xff]   ;;  %v835_v21 = vld [vmem:[%s1214_s1 + $0x154] ss:$8 sps:$4 sm:$0xff]   ;;  %v838_v23 = vld [vmem:[%s1214_s1 + $0x150] ss:$8 sps:$4 sm:$0xff]  }
   0x9   :  { %473 = vmatprep.subr.bf16.mxu0 %v817_v9  ;;  %v839_v24 = vld [vmem:[%s1214_s1 + $0x64] ss:$8 sps:$4 sm:$0xff]   ;;  %v843_v26 = vld [vmem:[%s1214_s1 + $0x60] ss:$8 sps:$4 sm:$0xff]   ;;  %v845_v28 = vld [vmem:[%s1214_s1 + $0x74] ss:$8 sps:$4 sm:$0xff]  }
   0xa   :  { %v841_v25 = vld [vmem:[%s1214_s1 + $0x164] ss:$8 sps:$4 sm:$0xff]   ;;  %v844_v27 = vld [vmem:[%s1214_s1 + $0x160] ss:$8 sps:$4 sm:$0xff]   ;;  %v847_v29 = vld [vmem:[%s1214_s1 + $0x174] ss:$8 sps:$4 sm:$0xff]  }
   0xb   :  { %433 = vmatpush1.bf16.msra.mxu1 %v819_v10  ;;  %v849_v30 = vld [vmem:[%s1214_s1 + $0x70] ss:$8 sps:$4 sm:$0xff]   ;;  %v851_v32 = vld [vmem:[%s1214_s1 + $0x84] ss:$8 sps:$4 sm:$0xff]   ;;  %v855_v34 = vld [vmem:[%s1214_s1 + $0x80] ss:$8 sps:$4 sm:$0xff]  }
   0xc   :  { %474 = vmatpush1.bf16.msra.mxu0 %v820_v11  ;;  %434 = vmatprep.subr.bf16.mxu1 %v821_v12  ;;  %v850_v31 = vld [vmem:[%s1214_s1 + $0x170] ss:$8 sps:$4 sm:$0xff]   ;;  %v853_v33 = vld [vmem:[%s1214_s1 + $0x184] ss:$8 sps:$4 sm:$0xff]   ;;  %v856_v35 = vld [vmem:[%s1214_s1 + $0x180] ss:$8 sps:$4 sm:$0xff]  }
   0xd   :  { %475 = vmatprep.subr.bf16.mxu0 %v823_v13  ;;  %v857_v36 = vld [vmem:[%s1214_s1 + $0x94] ss:$8 sps:$4 sm:$0xff]   ;;  %v861_v38 = vld [vmem:[%s1214_s1 + $0x90] ss:$8 sps:$4 sm:$0xff]   ;;  %v863_v40 = vld [vmem:[%s1214_s1 + $0xa4] ss:$8 sps:$4 sm:$0xff]  }
   0xe   :  { %v859_v37 = vld [vmem:[%s1214_s1 + $0x194] ss:$8 sps:$4 sm:$0xff]   ;;  %v862_v39 = vld [vmem:[%s1214_s1 + $0x190] ss:$8 sps:$4 sm:$0xff]   ;;  %v865_v41 = vld [vmem:[%s1214_s1 + $0x1a4] ss:$8 sps:$4 sm:$0xff]  }
   0xf   :  { %435 = vmatpush1.bf16.msra.mxu1 %v825_v14  ;;  %v867_v42 = vld [vmem:[%s1214_s1 + $0xa0] ss:$8 sps:$4 sm:$0xff]   ;;  %v869_v44 = vld [vmem:[%s1214_s1 + $0xb4] ss:$8 sps:$4 sm:$0xff]   ;;  %v873_v47 = vld [vmem:[%s1214_s1 + $0xb0] ss:$8 sps:$4 sm:$0xff]  }
  0x10   :  { %476 = vmatpush1.bf16.msra.mxu0 %v826_v15  ;;  %436 = vmatprep.subr.bf16.mxu1 %v827_v16  ;;  %v868_v43 = vld [vmem:[%s1214_s1 + $0x1a0] ss:$8 sps:$4 sm:$0xff]   ;;  %v871_v45 = vld [vmem:[%s1214_s1 + $0x1b4] ss:$8 sps:$4 sm:$0xff]   ;;  %v874_v48 = vld [vmem:[%s1214_s1 + $0x1b0] ss:$8 sps:$4 sm:$0xff]  }
  0x11   :  { %477 = vmatprep.subr.bf16.mxu0 %v829_v17  ;;  %v25_v46 = vld [vmem:[%s1215_s0 + $0x8] sm:$0xff]  ;;  %v27_v50 = vld [vmem:[%s1215_s0 + $0x18] sm:$0xff]  ;;  %v24_v4 = vld [vmem:[%s1215_s0] sm:$0xff] }
  0x12   :  { %v29_v49 = vpack.c.bf16 %v25_v46, %v25_v46  ;;  %v875_v51 = vld [vmem:[%s1214_s1 + $0xc4] ss:$8 sps:$4 sm:$0xff]   ;;  %v31_v52 = vpack.c.bf16 %v27_v50, %v27_v50  ;;  %v879_v54 = vld [vmem:[%s1214_s1 + $0xc0] ss:$8 sps:$4 sm:$0xff]   ;;  %v881_v56 = vld [vmem:[%s1214_s1 + $0xd4] ss:$8 sps:$4 sm:$0xff]   ;;  %v28_v7 = vpack.c.bf16 %v24_v4, %v24_v4 }
  0x13   :  { %437 = vmatpush1.bf16.msra.mxu1 %v831_v18  ;;  %v877_v53 = vld [vmem:[%s1214_s1 + $0x1c4] ss:$8 sps:$4 sm:$0xff]   ;;  %v880_v55 = vld [vmem:[%s1214_s1 + $0x1c0] ss:$8 sps:$4 sm:$0xff]   ;;  %v883_v57 = vld [vmem:[%s1214_s1 + $0x1d4] ss:$8 sps:$4 sm:$0xff]  }
  0x14   :  { %478 = vmatpush1.bf16.msra.mxu0 %v832_v19  ;;  %438 = vmatprep.subr.bf16.mxu1 %v833_v20  ;;  %v885_v58 = vld [vmem:[%s1214_s1 + $0xd0] ss:$8 sps:$4 sm:$0xff]   ;;  %v887_v60 = vld [vmem:[%s1214_s1 + $0xe4] ss:$8 sps:$4 sm:$0xff]   ;;  %v891_v62 = vld [vmem:[%s1214_s1 + $0xe0] ss:$8 sps:$4 sm:$0xff]  }
  0x15   :  { %479 = vmatprep.subr.bf16.mxu0 %v835_v21  ;;  %460 = vmatprep.mubr.bf16.mxu1 %v29_v49  ;;  %v886_v59 = vld [vmem:[%s1214_s1 + $0x1d0] ss:$8 sps:$4 sm:$0xff]   ;;  %v889_v61 = vld [vmem:[%s1214_s1 + $0x1e4] ss:$8 sps:$4 sm:$0xff]   ;;  %v892_v63 = vld [vmem:[%s1214_s1 + $0x1e0] ss:$8 sps:$4 sm:$0xff]  }
  0x16   :  { %501 = vmatprep.mubr.bf16.mxu0 %v31_v52  ;;  %v893_v0 = vld [vmem:[%s1214_s1 + $0xf4] ss:$8 sps:$4 sm:$0xff]   ;;  %v897_v2 = vld [vmem:[%s1214_s1 + $0xf0] ss:$8 sps:$4 sm:$0xff]   ;;  %v899_v6 = vld [vmem:[%s1216_s3 + $0x40] sm:$0xff]  }
  0x17   :  { %439 = vmatpush1.bf16.msra.mxu1 %v837_v22  ;;  %v895_v1 = vld [vmem:[%s1214_s1 + $0x1f4] ss:$8 sps:$4 sm:$0xff]   ;;  %v898_v3 = vld [vmem:[%s1214_s1 + $0x1f0] ss:$8 sps:$4 sm:$0xff]   ;;  %v900_v9 = vld [vmem:[%s1216_s3] sm:$0xff]  }
  0x18   :  { %480 = vmatpush1.bf16.msra.mxu0 %v838_v23  ;;  %440 = vmatprep.subr.bf16.mxu1 %v839_v24  ;;  %v26_v5 = vld [vmem:[%s1215_s0 + $0x10] sm:$0xff]  ;;  %v901_v10 = vld [vmem:[%s1216_s3 + $0x48] sm:$0xff]   ;;  %v905_v14 = vld [vmem:[%s1216_s3 + $0x58] sm:$0xff]   ;;  %v98_v24 = vlaneseq }
  0x19   :  { %481 = vmatprep.subr.bf16.mxu0 %v841_v25  ;;  %v30_v8 = vpack.c.bf16 %v26_v5, %v26_v5  ;;  %v902_v11 = vld [vmem:[%s1216_s3 + $0x8] sm:$0xff]   ;;  %v903_v12 = vld [vmem:[%s1216_s3 + $0x50] sm:$0xff]   ;;  %v906_v15 = vld [vmem:[%s1216_s3 + $0x18] sm:$0xff]  }
  0x1a   :  { %v904_v13 = vld [vmem:[%s1216_s3 + $0x10] sm:$0xff]   ;;  %v907_v16 = vld [vmem:[%s1216_s3 + $0x60] sm:$0xff]   ;;  %v909_v18 = vld [vmem:[%s1216_s3 + $0x68] sm:$0xff]   ;;  %v99_v25 = vshrl.u32 %v98_v24, 7 }
  0x1b   :  { %441 = vmatpush1.bf16.msra.mxu1 %v843_v26  ;;  %v908_v17 = vld [vmem:[%s1216_s3 + $0x20] sm:$0xff]   ;;  %v910_v19 = vld [vmem:[%s1216_s3 + $0x28] sm:$0xff]   ;;  %v911_v20 = vld [vmem:[%s1216_s3 + $0x70] sm:$0xff]  }
  0x1c   :  { %482 = vmatpush1.bf16.msra.mxu0 %v844_v27  ;;  %442 = vmatprep.subr.bf16.mxu1 %v845_v28  ;;  %v912_v21 = vld [vmem:[%s1216_s3 + $0x30] sm:$0xff]   ;;  %v913_v22 = vld [vmem:[%s1216_s3 + $0x78] sm:$0xff]   ;;  %v100_v26 = vsub.s32 0, %v99_v25  ;;  %v96_v27 = vld [vmem:[%s1217_s2] sm:$0x3]  ;;  %v104_v28 = vsub.s32 1, %v99_v25 }
  0x1d   :  { %483 = vmatprep.subr.bf16.mxu0 %v847_v29  ;;  %v914_v23 = vld [vmem:[%s1216_s3 + $0x38] sm:$0xff]   ;;  %v689_v52 = vld [vmem:[%s1219_s5] sm:$0xff] }
  0x1e   :  { %v101_v29 = vrot.slane %v96_v27, %v100_v26 }
  0x1f   :  { %443 = vmatpush1.bf16.msra.mxu1 %v849_v30  ;;  %v105_v30 = vrot.slane %v96_v27, %v104_v28 }
  0x20   :  { %484 = vmatpush1.bf16.msra.mxu0 %v850_v31  ;;  %444 = vmatprep.subr.bf16.mxu1 %v851_v32 }
  0x21   :  { %485 = vmatprep.subr.bf16.mxu0 %v853_v33 }
  0x23   :  { %445 = vmatpush1.bf16.msra.mxu1 %v855_v34 }
  0x24   :  { %486 = vmatpush1.bf16.msra.mxu0 %v856_v35  ;;  %446 = vmatprep.subr.bf16.mxu1 %v857_v36 }
  0x25   :  { %487 = vmatprep.subr.bf16.mxu0 %v859_v37 }
  0x27   :  { %447 = vmatpush1.bf16.msra.mxu1 %v861_v38 }
  0x28   :  { %488 = vmatpush1.bf16.msra.mxu0 %v862_v39  ;;  %448 = vmatprep.subr.bf16.mxu1 %v863_v40 }
  0x29   :  { %489 = vmatprep.subr.bf16.mxu0 %v865_v41 }
  0x2b   :  { %449 = vmatpush1.bf16.msra.mxu1 %v867_v42 }
  0x2c   :  { %490 = vmatpush1.bf16.msra.mxu0 %v868_v43  ;;  %450 = vmatprep.subr.bf16.mxu1 %v869_v44 }
  0x2d   :  { %491 = vmatprep.subr.bf16.mxu0 %v871_v45 }
  0x2f   :  { %451 = vmatpush1.bf16.msra.mxu1 %v873_v47 }
  0x30   :  { %492 = vmatpush1.bf16.msra.mxu0 %v874_v48  ;;  %452 = vmatprep.subr.bf16.mxu1 %v875_v51  ;;  %v760_v48 = vld [vmem:[%s1218_s4] ss:$0 sm:$0xff] }
  0x31   :  { %493 = vmatprep.subr.bf16.mxu0 %v877_v53 }
  0x33   :  { %453 = vmatpush1.bf16.msra.mxu1 %v879_v54 }
  0x34   :  { %494 = vmatpush1.bf16.msra.mxu0 %v880_v55  ;;  %454 = vmatprep.subr.bf16.mxu1 %v881_v56 }
  0x35   :  { %495 = vmatprep.subr.bf16.mxu0 %v883_v57 }
  0x37   :  { %455 = vmatpush1.bf16.msra.mxu1 %v885_v58 }
  0x38   :  { %496 = vmatpush1.bf16.msra.mxu0 %v886_v59  ;;  %456 = vmatprep.subr.bf16.mxu1 %v887_v60 }
  0x39   :  { %497 = vmatprep.subr.bf16.mxu0 %v889_v61 }
  0x3b   :  { %457 = vmatpush1.bf16.msra.mxu1 %v891_v62 }
  0x3c   :  { %498 = vmatpush1.bf16.msra.mxu0 %v892_v63  ;;  %458 = vmatprep.subr.bf16.mxu1 %v893_v0 }
  0x3d   :  { %499 = vmatprep.subr.bf16.mxu0 %v895_v1 }
  0x3f   :  { %459 = vmatpush1.bf16.msra.mxu1 %v897_v2 }
  0x40   :  { %500 = vmatpush1.bf16.msra.mxu0 %v898_v3  ;;  %777 = vmatprep.subr.bf16.mxu1 %v899_v6 }
  0x42   :  { %461 = vmatmul.mubr.bf16.vlgmr.msra.gmra.mrb[0].mxu1 %v28_v7 }
  0x43   :  { %502 = vmatmul.mubr.bf16.vlgmr.msra.gmra.mrb[0].mxu0 %v30_v8  ;;  %778 = vmatpush3.bf16.msra.mxu1 %v900_v9 }
  0x44   :  { %779 = vmatprep.subr.bf16.mxu1 %v901_v10 }
  0x47   :  { %780 = vmatpush3.bf16.msra.mxu1 %v902_v11 }
  0x48   :  { %781 = vmatprep.subr.bf16.mxu1 %v903_v12 }
  0x4b   :  { %782 = vmatpush3.bf16.msra.mxu1 %v904_v13 }
  0x4c   :  { %783 = vmatprep.subr.bf16.mxu1 %v905_v14 }
  0x4f   :  { %784 = vmatpush3.bf16.msra.mxu1 %v906_v15 }
  0x50   :  { %785 = vmatprep.subr.bf16.mxu1 %v907_v16 }
  0x53   :  { %786 = vmatpush3.bf16.msra.mxu1 %v908_v17 }
  0x54   :  { %787 = vmatprep.subr.bf16.mxu1 %v909_v18 }
  0x57   :  { %788 = vmatpush3.bf16.msra.mxu1 %v910_v19 }
  0x58   :  { %789 = vmatprep.subr.bf16.mxu1 %v911_v20 }
  0x5b   :  { %790 = vmatpush3.bf16.msra.mxu1 %v912_v21 }
  0x5c   :  { %791 = vmatprep.subr.bf16.mxu1 %v913_v22 }
  0x5f   :  { %792 = vmatpush3.bf16.msra.mxu1 %v914_v23 }
 0x115   :  { %v462_v31 = vpop.f32.mrb[0].mxu1 }
 0x116   :  { %v503_v32 = vpop.f32.mrb[0].mxu0  ;;  %v463_v33 = vadd.f32 %v462_v31, %v101_v29  ;;  %v464_v34 = vpop.f32.mrb[1].mxu1 }
 0x117   :  { %v505_v35 = vpop.f32.mrb[1].mxu0  ;;  %v465_v36 = vadd.f32 %v464_v34, %v105_v30  ;;  %v466_v37 = vpop.f32.mrb[2].mxu1 }
 0x118   :  { %v507_v38 = vpop.f32.mrb[2].mxu0  ;;  %v504_v39 = vadd.f32 %v503_v32, %v463_v33  ;;  %v467_v40 = vpop.f32.mrb[3].mxu1 }
 0x119   :  { %v508_v41 = vpop.f32.mrb[3].mxu0  ;;  %v506_v42 = vadd.f32 %v505_v35, %v465_v36 }
 0x11a   :  { %v510_v43 = vmax.f32 %v504_v39, 0.0 }
 0x11b   :  { %v511_v44 = vmax.f32 %v506_v42, 0.0 }
 0x11c   :  { %v512_v46 = vpack.c.bf16 %v510_v43, %v510_v43 }
 0x11d   :  { %v513_v45 = vpack.c.bf16 %v511_v44, %v511_v44 }
 0x11f   :  { %681 = vmatprep.mubr.bf16.mxu1 %v513_v45 }
 0x120   :  { %682 = vmatmul.mubr.bf16.vlgmr.msra.gmra.mrb[4].mxu1 %v512_v46 }
 0x1f3   :  { %v793_v47 = vpop.f32.mrb[4].mxu1 }
 0x1f4   :  { %v794_v49 = vpop.f32.mrb[5].mxu1 }
 0x1f5   :  { %v795_v50 = vadd.f32 %v794_v49, %v793_v47  ;;  %v796_v51 = vpop.f32.mrb[6].mxu1 }
 0x1f6   :  { %v797_v53 = vpop.f32.mrb[7].mxu1 }
 0x1f7   :  { %v684_v54 = vadd.f32 %v795_v50, %v760_v48 }
 0x1f9   :  { %v690_v55 = vadd.f32 %v689_v52, %v684_v54 }
 0x1fb   :  { %691 = vst [vmem:[%s1220_s6] sm:$0xff] %v690_v55 }

// kernel: all2cross_forward.17
= control target key start
LH: loop header
LB: loop body
LE: loop exit
PB: predicated region body
PF: predicated region fallthrough
CT: control target
= control target key end

     0   :  { %vm24_vm0 = vcmask 1044480   ;;  %s130_s0 = inlined_call_operand.vmem [shape: f32[2,5,128], index: 0, kind: input, shape index: {}]   ;;  %s131_s1 = inlined_call_operand.vmem [shape: f32[1,5,128], index: 1, kind: input, shape index: {}]   ;;  %s132_s2 = inlined_call_operand.vmem [shape: f32[1,1,128], index: 2, kind: input, shape index: {}]   ;;  %s133_s3 = inlined_call_operand.vmem [shape: f32[1,1,128], index: 3, kind: input, shape index: {}]   ;;  %s134_s4 = inlined_call_operand.vmem [shape: f32[2,5,128], index: 4, kind: output, shape index: {}]  }
   0x1   :  { %v17_v0 = vld [vmem:[%s130_s0] sm:$0x1f]  ;;  %v18_v2 = vld [vmem:[%s130_s0 + $0x8] sm:$0x1f] }
   0x2   :  { %v19_v1 = vld [vmem:[%s131_s1] sm:$0x1f] }
   0x3   :  { %v20_v3 = vadd.f32 %v19_v1, %v17_v0  ;;  %v21_v4 = vadd.f32 %v19_v1, %v18_v2  ;;  %v74_v24 = vld [vmem:[%s132_s2] ss:$0 sm:$0xff] }
   0x4   :  { %v75_v26 = vld [vmem:[%s133_s3] ss:$0 sm:$0xff] }
   0x5   :  { %v25_v5 = vsel %vm24_vm0, %v20_v3, 0.0  ;;  %v28_v6 = vsel %vm24_vm0, %v21_v4, 0.0 }
   0x6   :  { %26 = vadd.xlane.f32.xlu0 %v25_v5 }
   0xa   :  { %29 = vadd.xlane.f32.xlu0 %v28_v6 }
  0x93   :  { %v27_v7 = vpop.xlane.xlu0 %26 }
  0x94   :  { %v32_v8 = vmul.f32 0.0078125, %v27_v7 }
  0x96   :  { %v34_v9 = vsub.f32 %v20_v3, %v32_v8 }
  0x97   :  { %v30_v10 = vpop.xlane.xlu0 %29 }
  0x98   :  { %v33_v11 = vmul.f32 0.0078125, %v30_v10  ;;  %v36_v12 = vmul.f32 %v34_v9, %v34_v9 }
  0x9a   :  { %v35_v13 = vsub.f32 %v21_v4, %v33_v11  ;;  %v38_v14 = vsel %vm24_vm0, %v36_v12, 0.0 }
  0x9b   :  { %39 = vadd.xlane.f32.xlu1 %v38_v14 }
  0x9c   :  { %v37_v15 = vmul.f32 %v35_v13, %v35_v13 }
  0x9e   :  { %v41_v16 = vsel %vm24_vm0, %v37_v15, 0.0 }
  0x9f   :  { %42 = vadd.xlane.f32.xlu1 %v41_v16 }
 0x128   :  { %v40_v17 = vpop.xlane.xlu1 %39 }
 0x129   :  { %v44_v18 = vmul.f32 0.0078125, %v40_v17 }
 0x12b   :  { %v46_v19 = vadd.f32 1e-05, %v44_v18 }
 0x12c   :  { %v43_v20 = vpop.xlane.xlu1 %42 }
 0x12d   :  { %76 = vrsqrt.f32 %v46_v19  ;;  %v45_v21 = vmul.f32 0.0078125, %v43_v20 }
 0x12f   :  { %v47_v22 = vadd.f32 1e-05, %v45_v21 }
 0x131   :  { %78 = vrsqrt.f32 %v47_v22 }
 0x137   :  { %v77_v23 = vpop.eup %76 }
 0x138   :  { %v50_v25 = vmul.f32 %v77_v23, %v34_v9 }
 0x13a   :  { %v58_v27 = vmul.f32 %v74_v24, %v50_v25 }
 0x13b   :  { %v79_v28 = vpop.eup %78 }
 0x13c   :  { %v66_v29 = vadd.f32 %v75_v26, %v58_v27  ;;  %v51_v30 = vmul.f32 %v79_v28, %v35_v13 }
 0x13e   :  { %68 = vst [vmem:[%s134_s4] sm:$0x1f] %v66_v29  ;;  %v59_v31 = vmul.f32 %v74_v24, %v51_v30 }
 0x140   :  { %v67_v32 = vadd.f32 %v75_v26, %v59_v31 }
 0x142   :  { %69 = vst [vmem:[%s134_s4 + $0x8] sm:$0x1f] %v67_v32 }

// kernel: all2cross_forward.16
= control target key start
LH: loop header
LB: loop body
LE: loop exit
PB: predicated region body
PF: predicated region fallthrough
CT: control target
= control target key end

     0   :  { %vm64_vm0 = vcmask 261120   ;;  %vm89_vm1 = vcmask 253952   ;;  %s831_s0 = inlined_call_operand.vmem [shape: f32[2,65,32], index: 0, kind: input, shape index: {}]   ;;  %s832_s1 = inlined_call_operand.vmem [shape: f32[1,65,32], index: 1, kind: input, shape index: {}]   ;;  %s833_s2 = inlined_call_operand.vmem [shape: f32[1,1,32], index: 2, kind: input, shape index: {}]   ;;  %s834_s3 = inlined_call_operand.vmem [shape: f32[1,1,32], index: 3, kind: input, shape index: {}]   ;;  %s835_s4 = inlined_call_operand.vmem [shape: f32[2,65,32], index: 4, kind: output, shape index: {}]  }
   0x1   :  { %v17_v0 = vld [vmem:[%s831_s0] sm:$0xff]  ;;  %v19_v2 = vld [vmem:[%s831_s0 + $0x10] sm:$0xff]  ;;  %v18_v5 = vld [vmem:[%s831_s0 + $0x8] sm:$0xff] }
   0x2   :  { %v35_v1 = vld [vmem:[%s832_s1] sm:$0xff]  ;;  %v37_v4 = vld [vmem:[%s832_s1 + $0x10] sm:$0xff]  ;;  %v36_v6 = vld [vmem:[%s832_s1 + $0x8] sm:$0xff] }
   0x3   :  { %v443_v3 = vadd.f32 %v35_v1, %v17_v0  ;;  %v454_v7 = vadd.f32 %v37_v4, %v19_v2  ;;  %v456_v8 = vadd.f32 %v36_v6, %v18_v5  ;;  %v20_v9 = vld [vmem:[%s831_s0 + $0x18] sm:$0xff]  ;;  %v21_v11 = vld [vmem:[%s831_s0 + $0x20] sm:$0xff]  ;;  %v22_v15 = vld [vmem:[%s831_s0 + $0x28] sm:$0xff] }
   0x4   :  { %v38_v10 = vld [vmem:[%s832_s1 + $0x18] sm:$0xff]  ;;  %v39_v14 = vld [vmem:[%s832_s1 + $0x20] sm:$0xff]  ;;  %v40_v16 = vld [vmem:[%s832_s1 + $0x28] sm:$0xff] }
   0x5   :  { %v65_v12 = vsel %vm64_vm0, %v443_v3, 0.0  ;;  %v469_v13 = vadd.f32 %v38_v10, %v20_v9  ;;  %v71_v17 = vsel %vm64_vm0, %v454_v7, 0.0  ;;  %v68_v18 = vsel %vm64_vm0, %v456_v8, 0.0  ;;  %v23_v22 = vld [vmem:[%s831_s0 + $0x30] sm:$0xff]  ;;  %v24_v24 = vld [vmem:[%s831_s0 + $0x38] sm:$0xff]  ;;  %v26_v32 = vld [vmem:[%s831_s0 + $0x48] sm:$0xff] }
   0x6   :  { %66 = vadd.xlane.f32.xlu0 %v65_v12  ;;  %72 = vadd.xlane.f32.xlu1 %v71_v17  ;;  %v484_v19 = vadd.f32 %v39_v14, %v21_v11  ;;  %v488_v21 = vadd.f32 %v40_v16, %v22_v15  ;;  %v41_v23 = vld [vmem:[%s832_s1 + $0x30] sm:$0xff]  ;;  %v42_v25 = vld [vmem:[%s832_s1 + $0x38] sm:$0xff]  ;;  %v25_v30 = vld [vmem:[%s831_s0 + $0x40] sm:$0x1]  ;;  %v525_v36 = vadd.f32 %v35_v1, %v26_v32 }
   0x7   :  { %v74_v20 = vsel %vm64_vm0, %v469_v13, 0.0  ;;  %v504_v27 = vadd.f32 %v41_v23, %v23_v22  ;;  %v508_v29 = vadd.f32 %v42_v25, %v24_v24  ;;  %v43_v31 = vld [vmem:[%s832_s1 + $0x40] sm:$0x1]  ;;  %v27_v37 = vld [vmem:[%s831_s0 + $0x50] sm:$0xff]  ;;  %v28_v38 = vld [vmem:[%s831_s0 + $0x58] sm:$0xff] }
   0x8   :  { %v77_v26 = vsel %vm64_vm0, %v484_v19, 0.0  ;;  %v80_v28 = vsel %vm64_vm0, %v488_v21, 0.0  ;;  %v521_v34 = vadd.f32 %v43_v31, %v25_v30  ;;  %v535_v40 = vadd.f32 %v36_v6, %v27_v37  ;;  %v29_v43 = vld [vmem:[%s831_s0 + $0x60] sm:$0xff]  ;;  %v30_v44 = vld [vmem:[%s831_s0 + $0x68] sm:$0xff]  ;;  %v31_v49 = vld [vmem:[%s831_s0 + $0x70] sm:$0xff] }
   0x9   :  { %v83_v33 = vsel %vm64_vm0, %v504_v27, 0.0  ;;  %v86_v35 = vsel %vm64_vm0, %v508_v29, 0.0  ;;  %v93_v41 = vsel %vm64_vm0, %v525_v36, 0.0  ;;  %v539_v42 = vadd.f32 %v37_v4, %v28_v38  ;;  %v32_v50 = vld [vmem:[%s831_s0 + $0x78] sm:$0xff]  ;;  %v33_v55 = vld [vmem:[%s831_s0 + $0x80] sm:$0xff] }
   0xa   :  { %69 = vadd.xlane.f32.xlu0 %v68_v18  ;;  %75 = vadd.xlane.f32.xlu1 %v74_v20  ;;  %v90_v39 = vsel %vm89_vm1, %v521_v34, 0.0  ;;  %v96_v45 = vsel %vm64_vm0, %v535_v40, 0.0  ;;  %v549_v46 = vadd.f32 %v38_v10, %v29_v43  ;;  %v553_v48 = vadd.f32 %v39_v14, %v30_v44  ;;  %v34_v56 = vld [vmem:[%s831_s0 + $0x88] sm:$0x1] }
   0xb   :  { %v99_v47 = vsel %vm64_vm0, %v539_v42, 0.0  ;;  %v563_v52 = vadd.f32 %v40_v16, %v31_v49  ;;  %v567_v54 = vadd.f32 %v41_v23, %v32_v50  ;;  %v577_v58 = vadd.f32 %v42_v25, %v33_v55 }
   0xc   :  { %v102_v51 = vsel %vm64_vm0, %v549_v46, 0.0  ;;  %v105_v53 = vsel %vm64_vm0, %v553_v48, 0.0  ;;  %v581_v60 = vadd.f32 %v43_v31, %v34_v56 }
   0xd   :  { %v108_v57 = vsel %vm64_vm0, %v563_v52, 0.0  ;;  %v111_v59 = vsel %vm64_vm0, %v567_v54, 0.0  ;;  %v114_v61 = vsel %vm64_vm0, %v577_v58, 0.0 }
   0xe   :  { %78 = vadd.xlane.f32.xlu0 %v77_v26  ;;  %81 = vadd.xlane.f32.xlu1 %v80_v28  ;;  %v117_v62 = vsel %vm89_vm1, %v581_v60, 0.0 }
  0x12   :  { %84 = vadd.xlane.f32.xlu0 %v83_v33  ;;  %87 = vadd.xlane.f32.xlu1 %v86_v35 }
  0x16   :  { %91 = vadd.xlane.f32.xlu0 %v90_v39  ;;  %94 = vadd.xlane.f32.xlu1 %v93_v41 }
  0x1a   :  { %97 = vadd.xlane.f32.xlu0 %v96_v45  ;;  %100 = vadd.xlane.f32.xlu1 %v99_v47 }
  0x1e   :  { %103 = vadd.xlane.f32.xlu0 %v102_v51  ;;  %106 = vadd.xlane.f32.xlu1 %v105_v53 }
  0x22   :  { %109 = vadd.xlane.f32.xlu0 %v108_v57  ;;  %112 = vadd.xlane.f32.xlu1 %v111_v59 }
  0x26   :  { %115 = vadd.xlane.f32.xlu0 %v114_v61  ;;  %118 = vadd.xlane.f32.xlu1 %v117_v62 }
  0x93   :  { %v67_v63 = vpop.xlane.xlu0 %66  ;;  %v73_v1 = vpop.xlane.xlu1 %72 }
  0x94   :  { %v121_v0 = vmul.f32 0.03125, %v67_v63  ;;  %v123_v2 = vmul.f32 0.03125, %v73_v1 }
  0x96   :  { %v588_v4 = vsub.f32 %v443_v3, %v121_v0  ;;  %v591_v5 = vsub.f32 %v454_v7, %v123_v2 }
  0x97   :  { %v70_v6 = vpop.xlane.xlu0 %69  ;;  %v76_v10 = vpop.xlane.xlu1 %75 }
  0x98   :  { %v122_v9 = vmul.f32 0.03125, %v70_v6  ;;  %v157_v11 = vmul.f32 %v588_v4, %v588_v4  ;;  %v124_v12 = vmul.f32 0.03125, %v76_v10  ;;  %v159_v14 = vmul.f32 %v591_v5, %v591_v5 }
  0x9a   :  { %v598_v15 = vsub.f32 %v456_v8, %v122_v9  ;;  %v175_v16 = vsel %vm64_vm0, %v157_v11, 0.0  ;;  %v602_v3 = vsub.f32 %v469_v13, %v124_v12  ;;  %v181_v20 = vsel %vm64_vm0, %v159_v14, 0.0 }
  0x9b   :  { %176 = vadd.xlane.f32.xlu0 %v175_v16  ;;  %v79_v7 = vpop.xlane.xlu0 %78  ;;  %v82_v18 = vpop.xlane.xlu1 %81 }
  0x9c   :  { %v125_v17 = vmul.f32 0.03125, %v79_v7  ;;  %v158_v22 = vmul.f32 %v598_v15, %v598_v15  ;;  %v126_v23 = vmul.f32 0.03125, %v82_v18  ;;  %v160_v24 = vmul.f32 %v602_v3, %v602_v3 }
  0x9e   :  { %v610_v8 = vsub.f32 %v484_v19, %v125_v17  ;;  %v178_v25 = vsel %vm64_vm0, %v158_v22, 0.0  ;;  %v614_v13 = vsub.f32 %v488_v21, %v126_v23  ;;  %v184_v31 = vsel %vm64_vm0, %v160_v24, 0.0 }
  0x9f   :  { %182 = vadd.xlane.f32.xlu0 %v181_v20  ;;  %179 = vadd.xlane.f32.xlu1 %v178_v25  ;;  %v85_v26 = vpop.xlane.xlu0 %84  ;;  %v88_v30 = vpop.xlane.xlu1 %87 }
  0xa0   :  { %v127_v28 = vmul.f32 0.03125, %v85_v26  ;;  %v161_v32 = vmul.f32 %v610_v8, %v610_v8  ;;  %v128_v33 = vmul.f32 0.03125, %v88_v30  ;;  %v162_v19 = vmul.f32 %v614_v13, %v614_v13 }
  0xa2   :  { %v622_v35 = vsub.f32 %v504_v27, %v127_v28  ;;  %v187_v21 = vsel %vm64_vm0, %v161_v32, 0.0  ;;  %v626_v37 = vsub.f32 %v508_v29, %v128_v33  ;;  %v190_v43 = vsel %vm64_vm0, %v162_v19, 0.0 }
  0xa3   :  { %185 = vadd.xlane.f32.xlu1 %v184_v31  ;;  %188 = vadd.xlane.f32.xlu0 %v187_v21  ;;  %v92_v38 = vpop.xlane.xlu0 %91  ;;  %v95_v41 = vpop.xlane.xlu1 %94 }
  0xa4   :  { %v129_v39 = vmul.f32 0.03125, %v92_v38  ;;  %v163_v44 = vmul.f32 %v622_v35, %v622_v35  ;;  %v130_v45 = vmul.f32 0.03125, %v95_v41  ;;  %v164_v27 = vmul.f32 %v626_v37, %v626_v37 }
  0xa6   :  { %v634_v47 = vsub.f32 %v521_v34, %v129_v39  ;;  %v193_v29 = vsel %vm64_vm0, %v163_v44, 0.0  ;;  %v638_v49 = vsub.f32 %v525_v36, %v130_v45  ;;  %v196_v55 = vsel %vm64_vm0, %v164_v27, 0.0 }
  0xa7   :  { %191 = vadd.xlane.f32.xlu1 %v190_v43  ;;  %194 = vadd.xlane.f32.xlu0 %v193_v29  ;;  %v98_v50 = vpop.xlane.xlu0 %97  ;;  %v101_v53 = vpop.xlane.xlu1 %100 }
  0xa8   :  { %v131_v51 = vmul.f32 0.03125, %v98_v50  ;;  %v165_v56 = vmul.f32 %v634_v47, %v634_v47  ;;  %v132_v57 = vmul.f32 0.03125, %v101_v53  ;;  %v166_v34 = vmul.f32 %v638_v49, %v638_v49 }
  0xaa   :  { %v646_v59 = vsub.f32 %v535_v40, %v131_v51  ;;  %v199_v36 = vsel %vm89_vm1, %v165_v56, 0.0  ;;  %v650_v61 = vsub.f32 %v539_v42, %v132_v57  ;;  %v202_v1 = vsel %vm64_vm0, %v166_v34, 0.0 }
  0xab   :  { %197 = vadd.xlane.f32.xlu1 %v196_v55  ;;  %200 = vadd.xlane.f32.xlu0 %v199_v36  ;;  %v104_v62 = vpop.xlane.xlu0 %103  ;;  %v107_v0 = vpop.xlane.xlu1 %106 }
  0xac   :  { %v133_v63 = vmul.f32 0.03125, %v104_v62  ;;  %v167_v2 = vmul.f32 %v646_v59, %v646_v59  ;;  %v134_v6 = vmul.f32 0.03125, %v107_v0  ;;  %v168_v40 = vmul.f32 %v650_v61, %v650_v61 }
  0xae   :  { %v658_v9 = vsub.f32 %v549_v46, %v133_v63  ;;  %v205_v42 = vsel %vm64_vm0, %v167_v2, 0.0  ;;  %v662_v10 = vsub.f32 %v553_v48, %v134_v6  ;;  %v208_v16 = vsel %vm64_vm0, %v168_v40, 0.0 }
  0xaf   :  { %203 = vadd.xlane.f32.xlu1 %v202_v1  ;;  %206 = vadd.xlane.f32.xlu0 %v205_v42  ;;  %v110_v11 = vpop.xlane.xlu0 %109  ;;  %v113_v14 = vpop.xlane.xlu1 %112  ;;  %v698_v1 = vld [vmem:[%s833_s2] ss:$0 sm:$0xff] }
  0xb0   :  { %v135_v12 = vmul.f32 0.03125, %v110_v11  ;;  %v169_v7 = vmul.f32 %v658_v9, %v658_v9  ;;  %v136_v17 = vmul.f32 0.03125, %v113_v14  ;;  %v170_v46 = vmul.f32 %v662_v10, %v662_v10 }
  0xb2   :  { %v670_v18 = vsub.f32 %v563_v52, %v135_v12  ;;  %v211_v48 = vsel %vm64_vm0, %v169_v7, 0.0  ;;  %v674_v20 = vsub.f32 %v567_v54, %v136_v17  ;;  %v214_v25 = vsel %vm64_vm0, %v170_v46, 0.0  ;;  %v704_v12 = vld [vmem:[%s834_s3] ss:$0 sm:$0xff] }
  0xb3   :  { %209 = vadd.xlane.f32.xlu1 %v208_v16  ;;  %212 = vadd.xlane.f32.xlu0 %v211_v48  ;;  %v116_v22 = vpop.xlane.xlu0 %115  ;;  %v119_v24 = vpop.xlane.xlu1 %118 }
  0xb4   :  { %v137_v23 = vmul.f32 0.03125, %v116_v22  ;;  %v171_v26 = vmul.f32 %v670_v18, %v670_v18  ;;  %v138_v28 = vmul.f32 0.03125, %v119_v24  ;;  %v172_v52 = vmul.f32 %v674_v20, %v674_v20 }
  0xb6   :  { %v682_v30 = vsub.f32 %v577_v58, %v137_v23  ;;  %v217_v54 = vsel %vm64_vm0, %v171_v26, 0.0  ;;  %v686_v31 = vsub.f32 %v581_v60, %v138_v28  ;;  %v220_v32 = vsel %vm64_vm0, %v172_v52, 0.0 }
  0xb7   :  { %215 = vadd.xlane.f32.xlu1 %v214_v25  ;;  %218 = vadd.xlane.f32.xlu0 %v217_v54 }
  0xb8   :  { %v173_v33 = vmul.f32 %v682_v30, %v682_v30  ;;  %v174_v19 = vmul.f32 %v686_v31, %v686_v31 }
  0xba   :  { %v223_v21 = vsel %vm64_vm0, %v173_v33, 0.0  ;;  %v226_v58 = vsel %vm89_vm1, %v174_v19, 0.0 }
  0xbb   :  { %221 = vadd.xlane.f32.xlu1 %v220_v32  ;;  %224 = vadd.xlane.f32.xlu0 %v223_v21 }
  0xbf   :  { %227 = vadd.xlane.f32.xlu1 %v226_v58 }
 0x128   :  { %v177_v38 = vpop.xlane.xlu0 %176 }
 0x129   :  { %v229_v60 = vmul.f32 0.03125, %v177_v38 }
 0x12b   :  { %v247_v39 = vadd.f32 1e-05, %v229_v60 }
 0x12c   :  { %v180_v41 = vpop.xlane.xlu1 %179  ;;  %v183_v43 = vpop.xlane.xlu0 %182 }
 0x12d   :  { %373 = vrsqrt.f32 %v247_v39  ;;  %v230_v44 = vmul.f32 0.03125, %v180_v41  ;;  %v231_v45 = vmul.f32 0.03125, %v183_v43 }
 0x12f   :  { %v248_v27 = vadd.f32 1e-05, %v230_v44  ;;  %v249_v29 = vadd.f32 1e-05, %v231_v45 }
 0x130   :  { %v186_v50 = vpop.xlane.xlu1 %185  ;;  %v189_v51 = vpop.xlane.xlu0 %188 }
 0x131   :  { %375 = vrsqrt.f32 %v248_v27  ;;  %v232_v53 = vmul.f32 0.03125, %v186_v50  ;;  %v233_v55 = vmul.f32 0.03125, %v189_v51 }
 0x132   :  { %377 = vrsqrt.f32 %v249_v29 }
 0x133   :  { %v250_v56 = vadd.f32 1e-05, %v232_v53  ;;  %v251_v57 = vadd.f32 1e-05, %v233_v55 }
 0x134   :  { %v192_v34 = vpop.xlane.xlu1 %191  ;;  %v195_v36 = vpop.xlane.xlu0 %194 }
 0x135   :  { %379 = vrsqrt.f32 %v250_v56  ;;  %v234_v62 = vmul.f32 0.03125, %v192_v34  ;;  %v235_v63 = vmul.f32 0.03125, %v195_v36 }
 0x136   :  { %381 = vrsqrt.f32 %v251_v57 }
 0x137   :  { %v374_v0 = vpop.eup %373  ;;  %v252_v2 = vadd.f32 1e-05, %v234_v62  ;;  %v253_v6 = vadd.f32 1e-05, %v235_v63 }
 0x138   :  { %v283_v40 = vmul.f32 %v374_v0, %v588_v4  ;;  %v198_v42 = vpop.xlane.xlu1 %197  ;;  %v201_v11 = vpop.xlane.xlu0 %200 }
 0x139   :  { %383 = vrsqrt.f32 %v252_v2  ;;  %v236_v14 = vmul.f32 0.03125, %v198_v42  ;;  %v237_v16 = vmul.f32 0.03125, %v201_v11 }
 0x13a   :  { %v307_v7 = vmul.f32 %v698_v1, %v283_v40  ;;  %385 = vrsqrt.f32 %v253_v6 }
 0x13b   :  { %v376_v17 = vpop.eup %375  ;;  %v254_v46 = vadd.f32 1e-05, %v236_v14  ;;  %v255_v48 = vadd.f32 1e-05, %v237_v16 }
 0x13c   :  { %v378_v22 = vpop.eup %377  ;;  %v331_v23 = vadd.f32 %v704_v12, %v307_v7  ;;  %v284_v4 = vmul.f32 %v376_v17, %v598_v15  ;;  %v204_v24 = vpop.xlane.xlu1 %203 }
 0x13d   :  { %v207_v25 = vpop.xlane.xlu0 %206  ;;  %v285_v26 = vmul.f32 %v378_v22, %v591_v5  ;;  %387 = vrsqrt.f32 %v254_v46  ;;  %v238_v28 = vmul.f32 0.03125, %v204_v24 }
 0x13e   :  { %v239_v52 = vmul.f32 0.03125, %v207_v25  ;;  %349 = vst.msk [vmem:[%s835_s4] sm:$0xff] %vm64_vm0, %v331_v23  ;;  %v308_v54 = vmul.f32 %v698_v1, %v284_v4  ;;  %389 = vrsqrt.f32 %v255_v48 }
 0x13f   :  { %v380_v32 = vpop.eup %379  ;;  %v309_v33 = vmul.f32 %v698_v1, %v285_v26  ;;  %v256_v19 = vadd.f32 1e-05, %v238_v28 }
 0x140   :  { %v257_v15 = vadd.f32 1e-05, %v239_v52  ;;  %v382_v21 = vpop.eup %381  ;;  %v332_v58 = vadd.f32 %v704_v12, %v308_v54  ;;  %v286_v5 = vmul.f32 %v380_v32, %v602_v3  ;;  %v210_v38 = vpop.xlane.xlu1 %209 }
 0x141   :  { %v213_v60 = vpop.xlane.xlu0 %212  ;;  %v333_v39 = vadd.f32 %v704_v12, %v309_v33  ;;  %v287_v41 = vmul.f32 %v382_v21, %v610_v8  ;;  %391 = vrsqrt.f32 %v256_v19  ;;  %v240_v43 = vmul.f32 0.03125, %v210_v38 }
 0x142   :  { %350 = vst.msk [vmem:[%s835_s4 + $0x8] sm:$0xff] %vm64_vm0, %v332_v58  ;;  %v310_v44 = vmul.f32 %v698_v1, %v286_v5  ;;  %393 = vrsqrt.f32 %v257_v15  ;;  %v241_v45 = vmul.f32 0.03125, %v213_v60 }
 0x143   :  { %v384_v27 = vpop.eup %383  ;;  %351 = vst.msk [vmem:[%s835_s4 + $0x10] sm:$0xff] %vm64_vm0, %v333_v39  ;;  %v311_v3 = vmul.f32 %v698_v1, %v287_v41  ;;  %v258_v8 = vadd.f32 1e-05, %v240_v43 }
 0x144   :  { %v386_v29 = vpop.eup %385  ;;  %v334_v50 = vadd.f32 %v704_v12, %v310_v44  ;;  %v288_v51 = vmul.f32 %v384_v27, %v614_v13  ;;  %v259_v53 = vadd.f32 1e-05, %v241_v45  ;;  %v216_v55 = vpop.xlane.xlu1 %215 }
 0x145   :  { %v219_v56 = vpop.xlane.xlu0 %218  ;;  %v335_v57 = vadd.f32 %v704_v12, %v311_v3  ;;  %v289_v34 = vmul.f32 %v386_v29, %v622_v35  ;;  %395 = vrsqrt.f32 %v258_v8  ;;  %v242_v36 = vmul.f32 0.03125, %v216_v55 }
 0x146   :  { %352 = vst.msk [vmem:[%s835_s4 + $0x18] sm:$0xff] %vm64_vm0, %v334_v50  ;;  %v312_v62 = vmul.f32 %v698_v1, %v288_v51  ;;  %397 = vrsqrt.f32 %v259_v53  ;;  %v243_v63 = vmul.f32 0.03125, %v219_v56 }
 0x147   :  { %v388_v0 = vpop.eup %387  ;;  %353 = vst.msk [vmem:[%s835_s4 + $0x20] sm:$0xff] %vm64_vm0, %v335_v57  ;;  %v313_v13 = vmul.f32 %v698_v1, %v289_v34  ;;  %v260_v35 = vadd.f32 1e-05, %v242_v36 }
 0x148   :  { %v390_v2 = vpop.eup %389  ;;  %v336_v6 = vadd.f32 %v704_v12, %v312_v62  ;;  %v290_v40 = vmul.f32 %v388_v0, %v626_v37  ;;  %v261_v42 = vadd.f32 1e-05, %v243_v63  ;;  %v222_v11 = vpop.xlane.xlu1 %221 }
 0x149   :  { %v225_v14 = vpop.xlane.xlu0 %224  ;;  %v337_v16 = vadd.f32 %v704_v12, %v313_v13  ;;  %v291_v7 = vmul.f32 %v390_v2, %v634_v47  ;;  %399 = vrsqrt.f32 %v260_v35  ;;  %v244_v17 = vmul.f32 0.03125, %v222_v11 }
 0x14a   :  { %354 = vst.msk [vmem:[%s835_s4 + $0x28] sm:$0xff] %vm64_vm0, %v336_v6  ;;  %v314_v46 = vmul.f32 %v698_v1, %v290_v40  ;;  %401 = vrsqrt.f32 %v261_v42  ;;  %v245_v48 = vmul.f32 0.03125, %v225_v14 }
 0x14b   :  { %v392_v22 = vpop.eup %391  ;;  %355 = vst.msk [vmem:[%s835_s4 + $0x30] sm:$0xff] %vm64_vm0, %v337_v16  ;;  %v315_v37 = vmul.f32 %v698_v1, %v291_v7  ;;  %v262_v47 = vadd.f32 1e-05, %v244_v17 }
 0x14c   :  { %v394_v23 = vpop.eup %393  ;;  %v338_v4 = vadd.f32 %v704_v12, %v314_v46  ;;  %v292_v24 = vmul.f32 %v392_v22, %v638_v49  ;;  %v263_v25 = vadd.f32 1e-05, %v245_v48  ;;  %v228_v26 = vpop.xlane.xlu1 %227 }
 0x14d   :  { %v339_v28 = vadd.f32 %v704_v12, %v315_v37  ;;  %v293_v52 = vmul.f32 %v394_v23, %v646_v59  ;;  %403 = vrsqrt.f32 %v262_v47  ;;  %v246_v54 = vmul.f32 0.03125, %v228_v26 }
 0x14e   :  { %356 = vst.msk [vmem:[%s835_s4 + $0x38] sm:$0xff] %vm64_vm0, %v338_v4  ;;  %v316_v32 = vmul.f32 %v698_v1, %v292_v24  ;;  %405 = vrsqrt.f32 %v263_v25 }
 0x14f   :  { %v396_v33 = vpop.eup %395  ;;  %357 = vst.msk [vmem:[%s835_s4 + $0x40] sm:$0x1] %vm89_vm1, %v339_v28  ;;  %v317_v49 = vmul.f32 %v698_v1, %v293_v52  ;;  %v264_v19 = vadd.f32 1e-05, %v246_v54 }
 0x150   :  { %v398_v59 = vpop.eup %397  ;;  %v340_v15 = vadd.f32 %v704_v12, %v316_v32  ;;  %v294_v21 = vmul.f32 %v396_v33, %v650_v61 }
 0x151   :  { %v341_v58 = vadd.f32 %v704_v12, %v317_v49  ;;  %v295_v5 = vmul.f32 %v398_v59, %v658_v9  ;;  %407 = vrsqrt.f32 %v264_v19 }
 0x152   :  { %358 = vst.msk [vmem:[%s835_s4 + $0x48] sm:$0xff] %vm64_vm0, %v340_v15  ;;  %v318_v38 = vmul.f32 %v698_v1, %v294_v21 }
 0x153   :  { %v400_v60 = vpop.eup %399  ;;  %359 = vst.msk [vmem:[%s835_s4 + $0x50] sm:$0xff] %vm64_vm0, %v341_v58  ;;  %v319_v61 = vmul.f32 %v698_v1, %v295_v5 }
 0x154   :  { %v402_v39 = vpop.eup %401  ;;  %v342_v41 = vadd.f32 %v704_v12, %v318_v38  ;;  %v296_v9 = vmul.f32 %v400_v60, %v662_v10 }
 0x155   :  { %v343_v43 = vadd.f32 %v704_v12, %v319_v61  ;;  %v297_v44 = vmul.f32 %v402_v39, %v670_v18 }
 0x156   :  { %360 = vst.msk [vmem:[%s835_s4 + $0x58] sm:$0xff] %vm64_vm0, %v342_v41  ;;  %v320_v45 = vmul.f32 %v698_v1, %v296_v9 }
 0x157   :  { %v404_v27 = vpop.eup %403  ;;  %361 = vst.msk [vmem:[%s835_s4 + $0x60] sm:$0xff] %vm64_vm0, %v343_v43  ;;  %v321_v3 = vmul.f32 %v698_v1, %v297_v44 }
 0x158   :  { %v406_v10 = vpop.eup %405  ;;  %v344_v8 = vadd.f32 %v704_v12, %v320_v45  ;;  %v298_v18 = vmul.f32 %v404_v27, %v674_v20 }
 0x159   :  { %v345_v29 = vadd.f32 %v704_v12, %v321_v3  ;;  %v299_v50 = vmul.f32 %v406_v10, %v682_v30 }
 0x15a   :  { %362 = vst.msk [vmem:[%s835_s4 + $0x68] sm:$0xff] %vm64_vm0, %v344_v8  ;;  %v322_v51 = vmul.f32 %v698_v1, %v298_v18 }
 0x15b   :  { %v408_v53 = vpop.eup %407  ;;  %363 = vst.msk [vmem:[%s835_s4 + $0x70] sm:$0xff] %vm64_vm0, %v345_v29  ;;  %v323_v55 = vmul.f32 %v698_v1, %v299_v50 }
 0x15c   :  { %v346_v20 = vadd.f32 %v704_v12, %v322_v51  ;;  %v300_v56 = vmul.f32 %v408_v53, %v686_v31 }
 0x15d   :  { %v347_v30 = vadd.f32 %v704_v12, %v323_v55 }
 0x15e   :  { %364 = vst.msk [vmem:[%s835_s4 + $0x78] sm:$0xff] %vm64_vm0, %v346_v20  ;;  %v324_v57 = vmul.f32 %v698_v1, %v300_v56 }
 0x15f   :  { %365 = vst.msk [vmem:[%s835_s4 + $0x80] sm:$0xff] %vm64_vm0, %v347_v30 }
 0x160   :  { %v348_v34 = vadd.f32 %v704_v12, %v324_v57 }
 0x162   :  { %366 = vst.msk [vmem:[%s835_s4 + $0x88] sm:$0x1] %vm89_vm1, %v348_v34 }

</bundles_post_ra>
